<compile_context>
chip_gen: v5e
topology: v5e:2x2
jax: 0.10.0
libtpu: 0.0.40
codegen_flags: <defaults>
</compile_context>

<pallas_src>
import math
import functools

import jax
import jax.numpy as jnp
from jax.experimental import pallas as pl
from jax.experimental.pallas import tpu as pltpu


# sin(a) range reduction: a = k*pi + r, |r| <= pi/2.
_INV_PI = 0.3183098861837907
_PI_HI = 3.140625                    # high bits; k*_PI_HI exact for |k| < 2**15
_PI_LO = 9.676535897932385e-04       # pi - _PI_HI

# Odd Taylor coefficients of sin(r): r, r^3, ..., r^11  (|r| <= pi/2 -> ~6e-8 abs err).
_SIN_COEFFS = (1.0, -1.0 / 6.0, 1.0 / 120.0, -1.0 / 5040.0,
               1.0 / 362880.0, -1.0 / 39916800.0)


def _bessel_kernel(w_ref, sel_ref, x_ref, o_ref, *, coeffs):
    # w_ref:   (1, 128)          pre-scaled weights tiled along lanes
    # sel_ref: (group, 128)      0/1 lane-replication matrix
    # x_ref:   (tile_rows, group) edge distances
    # o_ref:   (tile_rows, 128)  interleaved output block
    xg = x_ref[...]

    # Replicate each distance across its num_basis lanes on the (idle) MXU.
    x_rep = jnp.dot(xg, sel_ref[...],
                    precision=jax.lax.Precision.HIGHEST,
                    preferred_element_type=jnp.float32)        # (tile_rows, 128)

    # 1/x: EUP approx reciprocal + one Newton step (~1e-7 relative error).
    inv = pl.reciprocal(x_rep, approx=True)
    inv = inv * (2.0 - x_rep * inv)

    # Sine argument; weights already carry the 1/r_max factor.
    a = x_rep * w_ref[...]

    # Bounded-range sine: reduce to |r| <= pi/2, sign = (-1)^k folded into r
    # (the polynomial is odd); the 2/r_max prefactor is folded into coeffs.
    k = jnp.floor(a * _INV_PI + 0.5)
    r = (a - k * _PI_HI) - k * _PI_LO
    parity = k - 2.0 * jnp.floor(0.5 * k)          # 0.0 or 1.0
    r = r * (1.0 - 2.0 * parity)

    s = r * r
    c1, c3, c5, c7, c9, c11 = coeffs
    p = c11 * s + c9
    p = p * s + c7
    p = p * s + c5
    p = p * s + c3
    p = p * s + c1

    o_ref[...] = (r * p) * inv


def _bessel_ref_jnp(x, w_scaled, prefactor):
    """Fused pure-jnp path for small N / unsupported num_basis."""
    x = x.astype(jnp.float32)[:, None]
    return prefactor * jnp.sin(x * w_scaled[None, :]) / x


def bessel_basis(x, bessel_weights, r_max, *, tile_edges=131072, min_pallas_edges=2048):
    """x: (N,) float distances. Returns (N, num_basis) float32 (PyTorch layout)."""
    n = x.shape[0]
    num_basis = bessel_weights.shape[0]
    prefactor = 2.0 / float(r_max)
    w_scaled = bessel_weights.astype(jnp.float32) / float(r_max)

    # Small-N fast path (fixed pallas/pad/slice overheads dominate there) and
    # fallback when num_basis does not divide the 128-lane vreg width.
    if n < min_pallas_edges or num_basis > 128 or 128 % num_basis != 0:
        return _bessel_ref_jnp(x, w_scaled, prefactor)

    group = 128 // num_basis                       # edges packed per output row
    rows = pl.cdiv(n, group)
    n_pad = rows * group

    # Lane-aligned tile: tile_rows rows of `group` edges each (multiple of 8 sublanes).
    tile_rows = max(8, (int(tile_edges) // group // 8) * 8)
    tile_rows = min(tile_rows, pl.cdiv(rows, 8) * 8)
    grid = pl.cdiv(rows, tile_rows)                # ragged last block handled by Pallas

    x_pad = x.astype(jnp.float32)
    if n_pad != n:
        # Pad only to the `group` boundary (pad value 1.0 keeps the tail finite).
        x_pad = jnp.pad(x_pad, (0, n_pad - n), constant_values=1.0)
    x2 = x_pad.reshape(rows, group)

    # (1, 128) lane row of pre-scaled weights: w_row[0, j*num_basis + b] = w_scaled[b].
    w_row = jnp.tile(w_scaled, group).reshape(1, 128)
    # (group, 128) replication matrix: sel[j, j*num_basis + b] = 1.
    sel = jnp.repeat(jnp.eye(group, dtype=jnp.float32), num_basis, axis=1)

    coeffs = tuple(prefactor * c for c in _SIN_COEFFS)
    kernel = functools.partial(_bessel_kernel, coeffs=coeffs)

    y = pl.pallas_call(
        kernel,
        out_shape=jax.ShapeDtypeStruct((rows, 128), jnp.float32),
        grid_spec=pltpu.PrefetchScalarGridSpec(
            num_scalar_prefetch=0,
            grid=(grid,),
            in_specs=[
                pl.BlockSpec((1, 128), lambda i: (0, 0)),          # weights (replicated)
                pl.BlockSpec((group, 128), lambda i: (0, 0)),      # selection matrix
                pl.BlockSpec((tile_rows, group), lambda i: (i, 0)),  # distances
            ],
            out_specs=pl.BlockSpec((tile_rows, 128), lambda i: (i, 0)),
        ),
        compiler_params=pltpu.CompilerParams(
            dimension_semantics=("parallel",),       # shards grid across TCs on v7x
            vmem_limit_bytes=48 * 1024 * 1024,
        ),
    )(w_row, sel, x2)

    # Free row-major relabeling to the PyTorch layout (no data movement).
    y = y.reshape(n_pad, num_basis)
    if n_pad != n:
        y = y[:n]                                   # copies only when N % group != 0
    return y


if __name__ == "__main__":
    r_max = 5.0
    num_basis = 8

    # Deterministic parameter init, mirroring __init__:
    # bessel_weights = linspace(1, num_basis, num_basis) * pi
    bessel_weights = jnp.linspace(1.0, float(num_basis), num_basis) * math.pi

    key = jax.random.PRNGKey(0)
    k1, k2 = jax.random.split(key)

    fn = jax.jit(lambda xx, ww: bessel_basis(xx, ww, r_max))

    def reference(xx, ww):
        pref = 2.0 / r_max
        return pref * jnp.sin(ww[None, :] * xx[:, None] / r_max) / xx[:, None]

    # Main check: exercises the Pallas kernel (N above the small-N threshold and
    # deliberately NOT a multiple of 16/128, so the ragged boundary block is hit).
    n_edges = 5000
    x = jax.random.uniform(k1, (n_edges,), dtype=jnp.float32, minval=0.1, maxval=r_max)
    y = jax.block_until_ready(fn(x, bessel_weights))
    y_ref = reference(x, bessel_weights)
    assert y.shape == (n_edges, num_basis)
    assert jnp.allclose(y, y_ref, rtol=1e-5, atol=1e-5), \
        float(jnp.max(jnp.abs(y - y_ref)))

    # Small-N fast path (pure jnp, fused by XLA) stays numerically consistent.
    n_small = 1000
    xs = jax.random.uniform(k2, (n_small,), dtype=jnp.float32, minval=0.1, maxval=r_max)
    ys = jax.block_until_ready(fn(xs, bessel_weights))
    assert ys.shape == (n_small, num_basis)
    assert jnp.allclose(ys, reference(xs, bessel_weights), rtol=1e-5, atol=1e-5)

    print("KERNEL_OK")
</pallas_src>

<mosaic_0001>
module attributes {stable_mosaic.version = 11 : i64} {
  func.func @_bessel_kernel(%arg0: i32, %arg1: memref<1x128xf32, #tpu.memory_space<vmem>>, %arg2: memref<16x128xf32, #tpu.memory_space<vmem>>, %arg3: memref<320x16xf32, #tpu.memory_space<vmem>>, %arg4: memref<320x128xf32, #tpu.memory_space<vmem>>) attributes {dimension_semantics = [#tpu.dimension_semantics<parallel>], iteration_bounds = array<i64: 1>, scalar_prefetch = 0 : i64, scratch_operands = 0 : i64, tpu.core_type = #tpu.core_type<tc>, window_params = [{pipeline_mode = #tpu.pipeline_mode<synchronous>, transform_indices = @transform_0, window_bounds = array<i64: 1, 128>}, {pipeline_mode = #tpu.pipeline_mode<synchronous>, transform_indices = @transform_1, window_bounds = array<i64: 16, 128>}, {transform_indices = @transform_2, window_bounds = array<i64: 320, 16>}, {transform_indices = @transform_3, window_bounds = array<i64: 320, 128>}]} {
    %c0 = arith.constant 0 : index
    %c0_0 = arith.constant 0 : index
    %0 = vector.load %arg3[%c0, %c0_0] : memref<320x16xf32, #tpu.memory_space<vmem>>, vector<320x16xf32>
    %c0_1 = arith.constant 0 : index
    %c0_2 = arith.constant 0 : index
    %1 = vector.load %arg2[%c0_1, %c0_2] : memref<16x128xf32, #tpu.memory_space<vmem>>, vector<16x128xf32>
    %cst = arith.constant dense<0.000000e+00> : vector<320x128xf32>
    %2 = tpu.matmul %0, %1, %cst {dimension_numbers = #tpu.dot_dimension_numbers<[1], [0], [0], [1], [0, 0, 1, 1], [], []>, precision = #tpu.contract_precision<fp32>} : vector<320x16xf32>, vector<16x128xf32>, vector<320x128xf32> -> vector<320x128xf32>
    %3 = tpu.reciprocal %2 {approx = true} : vector<320x128xf32> -> vector<320x128xf32>
    %4 = arith.mulf %2, %3 : vector<320x128xf32>
    %cst_3 = arith.constant 2.000000e+00 : f32
    %5 = vector.broadcast %cst_3 : f32 to vector<320x128xf32>
    %6 = arith.subf %5, %4 : vector<320x128xf32>
    %7 = arith.mulf %3, %6 : vector<320x128xf32>
    %c0_4 = arith.constant 0 : index
    %c0_5 = arith.constant 0 : index
    %8 = vector.load %arg1[%c0_4, %c0_5] : memref<1x128xf32, #tpu.memory_space<vmem>>, vector<1x128xf32>
    %9 = vector.broadcast %8 : vector<1x128xf32> to vector<320x128xf32>
    %10 = arith.mulf %2, %9 : vector<320x128xf32>
    %cst_6 = arith.constant 0.318309873 : f32
    %11 = vector.broadcast %cst_6 : f32 to vector<320x128xf32>
    %12 = arith.mulf %10, %11 : vector<320x128xf32>
    %cst_7 = arith.constant 5.000000e-01 : f32
    %13 = vector.broadcast %cst_7 : f32 to vector<320x128xf32>
    %14 = arith.addf %12, %13 : vector<320x128xf32>
    %15 = math.floor %14 : vector<320x128xf32>
    %cst_8 = arith.constant 3.140625 : f32
    %16 = vector.broadcast %cst_8 : f32 to vector<320x128xf32>
    %17 = arith.mulf %15, %16 : vector<320x128xf32>
    %18 = arith.subf %10, %17 : vector<320x128xf32>
    %cst_9 = arith.constant 9.67653584E-4 : f32
    %19 = vector.broadcast %cst_9 : f32 to vector<320x128xf32>
    %20 = arith.mulf %15, %19 : vector<320x128xf32>
    %21 = arith.subf %18, %20 : vector<320x128xf32>
    %cst_10 = arith.constant 5.000000e-01 : f32
    %22 = vector.broadcast %cst_10 : f32 to vector<320x128xf32>
    %23 = arith.mulf %22, %15 : vector<320x128xf32>
    %24 = math.floor %23 : vector<320x128xf32>
    %cst_11 = arith.constant 2.000000e+00 : f32
    %25 = vector.broadcast %cst_11 : f32 to vector<320x128xf32>
    %26 = arith.mulf %25, %24 : vector<320x128xf32>
    %27 = arith.subf %15, %26 : vector<320x128xf32>
    %cst_12 = arith.constant 2.000000e+00 : f32
    %28 = vector.broadcast %cst_12 : f32 to vector<320x128xf32>
    %29 = arith.mulf %28, %27 : vector<320x128xf32>
    %cst_13 = arith.constant 1.000000e+00 : f32
    %30 = vector.broadcast %cst_13 : f32 to vector<320x128xf32>
    %31 = arith.subf %30, %29 : vector<320x128xf32>
    %32 = arith.mulf %21, %31 : vector<320x128xf32>
    %33 = arith.mulf %32, %32 : vector<320x128xf32>
    %cst_14 = arith.constant -1.00208437E-8 : f32
    %34 = vector.broadcast %cst_14 : f32 to vector<320x128xf32>
    %35 = arith.mulf %34, %33 : vector<320x128xf32>
    %cst_15 = arith.constant 1.1022928E-6 : f32
    %36 = vector.broadcast %cst_15 : f32 to vector<320x128xf32>
    %37 = arith.addf %35, %36 : vector<320x128xf32>
    %38 = arith.mulf %37, %33 : vector<320x128xf32>
    %cst_16 = arith.constant -7.9365076E-5 : f32
    %39 = vector.broadcast %cst_16 : f32 to vector<320x128xf32>
    %40 = arith.addf %38, %39 : vector<320x128xf32>
    %41 = arith.mulf %40, %33 : vector<320x128xf32>
    %cst_17 = arith.constant 0.00333333341 : f32
    %42 = vector.broadcast %cst_17 : f32 to vector<320x128xf32>
    %43 = arith.addf %41, %42 : vector<320x128xf32>
    %44 = arith.mulf %43, %33 : vector<320x128xf32>
    %cst_18 = arith.constant -0.0666666701 : f32
    %45 = vector.broadcast %cst_18 : f32 to vector<320x128xf32>
    %46 = arith.addf %44, %45 : vector<320x128xf32>
    %47 = arith.mulf %46, %33 : vector<320x128xf32>
    %cst_19 = arith.constant 4.000000e-01 : f32
    %48 = vector.broadcast %cst_19 : f32 to vector<320x128xf32>
    %49 = arith.addf %47, %48 : vector<320x128xf32>
    %50 = arith.mulf %32, %49 : vector<320x128xf32>
    %51 = arith.mulf %50, %7 : vector<320x128xf32>
    %c0_20 = arith.constant 0 : index
    %c0_21 = arith.constant 0 : index
    %52 = vector.load %arg4[%c0_20, %c0_21] : memref<320x128xf32, #tpu.memory_space<vmem>>, vector<320x128xf32>
    tpu.vector_store %arg4[%c0_20, %c0_21], %51 {strides = array<i32>} : memref<320x128xf32, #tpu.memory_space<vmem>>, vector<320x128xf32>,
    return
  }
  func.func @transform_0(%arg0: i32) -> (i32, i32) {
    %c0_i32 = arith.constant 0 : i32
    %c0_i32_0 = arith.constant 0 : i32
    %c0_i32_1 = arith.constant 0 : i32
    return %c0_i32, %c0_i32_0 : i32, i32
  }
  func.func @transform_1(%arg0: i32) -> (i32, i32) {
    %c0_i32 = arith.constant 0 : i32
    %c0_i32_0 = arith.constant 0 : i32
    %c0_i32_1 = arith.constant 0 : i32
    return %c0_i32, %c0_i32_0 : i32, i32
  }
  func.func @transform_2(%arg0: i32) -> (i32, i32) {
    %c0_i32 = arith.constant 0 : i32
    %c0_i32_0 = arith.constant 0 : i32
    return %arg0, %c0_i32 : i32, i32
  }
  func.func @transform_3(%arg0: i32) -> (i32, i32) {
    %c0_i32 = arith.constant 0 : i32
    %c0_i32_0 = arith.constant 0 : i32
    return %arg0, %c0_i32 : i32, i32
  }
}

</mosaic_0001>

<bundles_post_ra>
// kernel: tile.8
= control target key start
LH: loop header
LB: loop body
LE: loop exit
PB: predicated region body
PF: predicated region fallthrough
CT: control target
= control target key end

     0   :  { %s28_s0 = inlined_call_operand.vmem [shape: f32[8], index: 0, kind: input, shape index: {}]   ;;  %s29_s1 = inlined_call_operand.vmem [shape: f32[16,8], index: 1, kind: output, shape index: {}]  }
   0x1   :  { %v4_v0 = vld [vmem:[%s28_s0] ss:$0 sm:$0xff] }
   0x2   :  { %5 = vst [vmem:[%s29_s1] sm:$0xff] %v4_v0 }
   0x3   :  { %8 = vst [vmem:[%s29_s1 + $0x8] sm:$0xff] %v4_v0 }

// kernel: tile.9
= control target key start
LH: loop header
LB: loop body
LE: loop exit
PB: predicated region body
PF: predicated region fallthrough
CT: control target
= control target key end

     0   :  { %s131_s10 = smov 120   ;;  %s132_s11 = smov 104   ;;  %vm3_vm0 = vcmask 64512   ;;  %vm9_vm1 = vcmask 1048512   ;;  %vm15_vm2 = vcmask 982912   ;;  %vm21_vm3 = vcmask 917312   ;;  %s207_s0 = inlined_call_operand.vmem [shape: f32[16,8], index: 0, kind: input, shape index: {}]   ;;  %s208_s1 = inlined_call_operand.vmem [shape: f32[1,128], index: 1, kind: output, shape index: {}]  }
   0x1   :  { %v101_v0 = vld [vmem:[%s207_s0 + $0xf] sm:$0x1]   ;;  %v103_v1 = vld [vmem:[%s207_s0 + $0xd] sm:$0x1]   ;;  %v105_v2 = vld [vmem:[%s207_s0 + $0xb] sm:$0x1]  }
   0x2   :  { %7 = vrot.lane.b32.xlu0 %v101_v0, %s131_s10  ;;  %19 = vrot.lane.b32.xlu1 %v103_v1, %s132_s11  ;;  %s133_s14 = smov 88   ;;  %v102_v3 = vld [vmem:[%s207_s0 + $0xe] sm:$0x1]   ;;  %v104_v4 = vld [vmem:[%s207_s0 + $0xc] sm:$0x1]   ;;  %s134_s19 = smov 112  }
   0x3   :  { %31 = vrot.lane.b32.xlu2 %v105_v2, %s133_s14  ;;  %s135_s20 = smov 96   ;;  %v106_v5 = vld [vmem:[%s207_s0 + $0xa] sm:$0x1]   ;;  %s136_s23 = smov 80   ;;  %v107_v6 = vld [vmem:[%s207_s0 + $0x9] sm:$0x1]  }
   0x4   :  { %v108_v7 = vld [vmem:[%s207_s0 + $0x8] sm:$0x1]   ;;  %s137_s28 = smov 72   ;;  %s138_s29 = smov 64   ;;  %v109_v8 = vld [vmem:[%s207_s0 + $0x7] sm:$0x1]  }
   0x5   :  { %s139_s3 = smov 56   ;;  %v110_v9 = vld [vmem:[%s207_s0 + $0x6] sm:$0x1]   ;;  %v111_v10 = vld [vmem:[%s207_s0 + $0x5] sm:$0x1]   ;;  %s140_s8 = smov 48  }
   0x6   :  { %s141_s9 = smov 40   ;;  %v112_v11 = vld [vmem:[%s207_s0 + $0x4] sm:$0x1]   ;;  %s142_s12 = smov 32   ;;  %v113_v12 = vld [vmem:[%s207_s0 + $0x3] sm:$0x1]  }
   0x7   :  { %v114_v13 = vld [vmem:[%s207_s0 + $0x2] sm:$0x1]   ;;  %s143_s17 = smov 24   ;;  %s144_s18 = smov 16   ;;  %v115_v14 = vld [vmem:[%s207_s0 + $0x1] sm:$0x1]  }
   0x8   :  { %s145_s21 = smov 8   ;;  %v2_v15 = vld [vmem:[%s207_s0] sm:$0x1]   ;;  %vm27_vm4 = vcmask 851712   ;;  %vm33_vm5 = vcmask 786112   ;;  %vm39_vm6 = vcmask 720512  }
   0x9   :  { %4 = vst.msk [vmem:[#allocation0] sm:$0x1] %vm3_vm0, %v2_v15   ;;  %vm45_vm7 = vcmask 654912   ;;  %vm51_vm8 = vcmask 589312   ;;  %vm57_vm9 = vcmask 523712   ;;  %vm63_vm10 = vcmask 458112  }
   0xa   :  { %13 = vrot.lane.b32.xlu0 %v102_v3, %s134_s19  ;;  %25 = vrot.lane.b32.xlu1 %v104_v4, %s135_s20  ;;  %vm69_vm11 = vcmask 392512   ;;  %vm75_vm12 = vcmask 326912   ;;  %vm81_vm13 = vcmask 261312   ;;  %vm87_vm14 = vcmask 195712  }
   0xb   :  { %37 = vrot.lane.b32.xlu2 %v106_v5, %s136_s23  ;;  %vm93_vm15 = vcmask 130112  }
  0x12   :  { %43 = vrot.lane.b32.xlu0 %v107_v6, %s137_s28  ;;  %49 = vrot.lane.b32.xlu1 %v108_v7, %s138_s29 }
  0x13   :  { %55 = vrot.lane.b32.xlu2 %v109_v8, %s139_s3 }
  0x1a   :  { %61 = vrot.lane.b32.xlu0 %v110_v9, %s140_s8  ;;  %67 = vrot.lane.b32.xlu1 %v111_v10, %s141_s9 }
  0x1b   :  { %73 = vrot.lane.b32.xlu2 %v112_v11, %s142_s12 }
  0x22   :  { %79 = vrot.lane.b32.xlu0 %v113_v12, %s143_s17  ;;  %85 = vrot.lane.b32.xlu1 %v114_v13, %s144_s18 }
  0x23   :  { %91 = vrot.lane.b32.xlu2 %v115_v14, %s145_s21 }
  0x5d   :  { %v32_v16 = vpop.permute.xlu2 %31  }
  0x65   :  { %v38_v17 = vpop.permute.xlu2 %37  }
  0x6d   :  { %v56_v18 = vpop.permute.xlu2 %55  }
  0x74   :  { %v8_v19 = vpop.permute.xlu0 %7   ;;  %v20_v20 = vpop.permute.xlu1 %19  }
  0x75   :  { %10 = vst.msk [vmem:[#allocation0] sm:$0x1] %vm9_vm1, %v8_v19   ;;  %v74_v21 = vpop.permute.xlu2 %73  }
  0x7c   :  { %v14_v22 = vpop.permute.xlu0 %13   ;;  %v26_v23 = vpop.permute.xlu1 %25  }
  0x7d   :  { %16 = vst.msk [vmem:[#allocation0] sm:$0x1] %vm15_vm2, %v14_v22   ;;  %v92_v24 = vpop.permute.xlu2 %91  }
  0x7e   :  { %22 = vst.msk [vmem:[#allocation0] sm:$0x1] %vm21_vm3, %v20_v20  }
  0x7f   :  { %28 = vst.msk [vmem:[#allocation0] sm:$0x1] %vm27_vm4, %v26_v23  }
  0x80   :  { %34 = vst.msk [vmem:[#allocation0] sm:$0x1] %vm33_vm5, %v32_v16  }
  0x81   :  { %40 = vst.msk [vmem:[#allocation0] sm:$0x1] %vm39_vm6, %v38_v17  }
  0x84   :  { %v44_v25 = vpop.permute.xlu0 %43   ;;  %v50_v26 = vpop.permute.xlu1 %49  }
  0x85   :  { %46 = vst.msk [vmem:[#allocation0] sm:$0x1] %vm45_vm7, %v44_v25  }
  0x86   :  { %52 = vst.msk [vmem:[#allocation0] sm:$0x1] %vm51_vm8, %v50_v26  }
  0x87   :  { %58 = vst.msk [vmem:[#allocation0] sm:$0x1] %vm57_vm9, %v56_v18  }
  0x8c   :  { %v62_v27 = vpop.permute.xlu0 %61   ;;  %v68_v28 = vpop.permute.xlu1 %67  }
  0x8d   :  { %64 = vst.msk [vmem:[#allocation0] sm:$0x1] %vm63_vm10, %v62_v27  }
  0x8e   :  { %70 = vst.msk [vmem:[#allocation0] sm:$0x1] %vm69_vm11, %v68_v28  }
  0x8f   :  { %76 = vst.msk [vmem:[#allocation0] sm:$0x1] %vm75_vm12, %v74_v21  }
  0x94   :  { %v80_v29 = vpop.permute.xlu0 %79   ;;  %v86_v30 = vpop.permute.xlu1 %85  }
  0x95   :  { %82 = vst.msk [vmem:[#allocation0] sm:$0x1] %vm81_vm13, %v80_v29  }
  0x96   :  { %88 = vst.msk [vmem:[#allocation0] sm:$0x1] %vm87_vm14, %v86_v30  }
  0x97   :  { %94 = vst.msk [vmem:[#allocation0] sm:$0x1] %vm93_vm15, %v92_v24  }
  0x9e   :  { %v97_v31 = vld [vmem:[#allocation0] sm:$0x1] }
  0x9f   :  { %100 = vst [vmem:[%s208_s1] sm:$0x1] %v97_v31 }

// kernel: _lambda_.1
= control target key start
LH: loop header
LB: loop body
LE: loop exit
PB: predicated region body
PF: predicated region fallthrough
CT: control target
= control target key end

     0   :  { %vm56_vm0 = vcmask 130048   ;;  %s5419_s1 = inlined_call_operand.vmem [shape: f32[16,128], index: 1, kind: input, shape index: {}]   ;;  %s5420_s2 = inlined_call_operand.vmem [shape: f32[313,16], index: 2, kind: input, shape index: {}]   ;;  %s5421_s0 = inlined_call_operand.vmem [shape: f32[1,128], index: 0, kind: input, shape index: {}]   ;;  %s5422_s3 = inlined_call_operand.vmem [shape: f32[313,128], index: 3, kind: output, shape index: {}]  }
   0x1   :  { %v55_v0 = vld [vmem:[%s5419_s1 + $0x8] sm:$0xff]  ;;  %v54_v1 = vld [vmem:[%s5419_s1] sm:$0xff]  ;;  %v36_v8 = vld [vmem:[%s5420_s2 + $0xb0] sm:$0xff] }
   0x2   :  { %v34_v2 = vld [vmem:[%s5420_s2 + $0xa0] sm:$0xff]  ;;  %v2990_v3 = vand.u32 4294901760, %v55_v0  ;;  %v2992_v4 = vand.u32 4294901760, %v54_v1  ;;  %v35_v6 = vld [vmem:[%s5420_s2 + $0xa8] sm:$0xff]  ;;  %v124_v18 = vsel %vm56_vm0, %v36_v8, 0  ;;  %v16_v33 = vld [vmem:[%s5420_s2 + $0x10] sm:$0xff] }
   0x3   :  { %v118_v5 = vsel %vm56_vm0, %v34_v2, 0  ;;  %v14_v7 = vld [vmem:[%s5420_s2] sm:$0xff]  ;;  %v121_v10 = vsel %vm56_vm0, %v35_v6, 0  ;;  %v15_v12 = vld [vmem:[%s5420_s2 + $0x8] sm:$0xff]  ;;  %v3040_v31 = vand.u32 4294901760, %v124_v18  ;;  %v37_v39 = vld [vmem:[%s5420_s2 + $0xb8] sm:$0xff] }
   0x4   :  { %v3004_v9 = vand.u32 4294901760, %v118_v5  ;;  %v58_v11 = vsel %vm56_vm0, %v14_v7, 0  ;;  %2873 = vmatpush.msra.mxu2 %v2990_v3  ;;  %v531_v13 = vsub.f32 %v55_v0, %v2990_v3  ;;  %v537_v14 = vsub.f32 %v54_v1, %v2992_v4  ;;  %192 = vmatpush.msra.mxu0 %v2990_v3  ;;  %v17_v45 = vld [vmem:[%s5420_s2 + $0x18] sm:$0xff]  ;;  %v38_v55 = vld [vmem:[%s5420_s2 + $0xc0] sm:$0xff] }
   0x5   :  { %v3015_v15 = vand.u32 4294901760, %v121_v10  ;;  %v3017_v16 = vand.u32 4294901760, %v58_v11  ;;  %v61_v19 = vsel %vm56_vm0, %v15_v12, 0  ;;  %5537 = vst [vmem:[#allocation3_spill] sm:$0xff] %v3040_v31  ;;  %v64_v41 = vsel %vm56_vm0, %v16_v33, 0  ;;  %v18_v59 = vld [vmem:[%s5420_s2 + $0x20] sm:$0xff] }
   0x6   :  { %v3020_v17 = vsub.f32 %v118_v5, %v3004_v9  ;;  %2874 = vmatpush.msra.mxu2 %v2992_v4  ;;  %v532_v20 = vand.u32 4294901760, %v531_v13  ;;  %v538_v21 = vand.u32 4294901760, %v537_v14  ;;  %194 = vmatpush.msra.mxu0 %v2992_v4  ;;  %v3033_v25 = vand.u32 4294901760, %v61_v19  ;;  %v39_v5 = vld [vmem:[%s5420_s2 + $0xc8] sm:$0xff] }
   0x7   :  { %5536 = vst [vmem:[#allocation2_spill] sm:$0xff] %v3015_v15  ;;  %v3026_v22 = vsub.f32 %v121_v10, %v3015_v15  ;;  %v3030_v23 = vsub.f32 %v58_v11, %v3017_v16  ;;  %v3060_v43 = vsub.f32 %v124_v18, %v3040_v31  ;;  %v3062_v44 = vand.u32 4294901760, %v64_v41  ;;  %v19_v10 = vld [vmem:[%s5420_s2 + $0x28] sm:$0xff] }
   0x8   :  { %v5432_v24 = vand.u32 4294901760, %v3020_v17  ;;  %719 = vmatpush.msrb.mxu2 %v531_v13  ;;  %v533_v26 = vsub.f32 %v531_v13, %v532_v20  ;;  %v539_v27 = vsub.f32 %v537_v14, %v538_v21  ;;  %1200 = vmatpush.msrb.mxu0 %v532_v20  ;;  %v3043_v32 = vsub.f32 %v61_v19, %v3033_v25 }
   0x9   :  { %v5445_v28 = vand.u32 4294901760, %v3030_v23  ;;  %v5430_v30 = vand.u32 4294901760, %v3026_v22  ;;  %5538 = vst [vmem:[#allocation4_spill] sm:$0xff] %v3060_v43  ;;  %v127_v46 = vsel %vm56_vm0, %v37_v39, 0  ;;  %v3073_v48 = vsub.f32 %v64_v41, %v3062_v44 }
   0xa   :  { %v358_v29 = vsub.f32 %v3020_v17, %v5432_v24  ;;  %722 = vmatpush.msrb.mxu2 %v537_v14  ;;  %v534_v34 = vand.u32 4294901760, %v533_v26  ;;  %v540_v35 = vand.u32 4294901760, %v539_v27  ;;  %1204 = vmatpush.msrb.mxu0 %v538_v21  ;;  %v5444_v38 = vand.u32 4294901760, %v3043_v32  ;;  %v40_v27 = vld [vmem:[%s5420_s2 + $0xd0] sm:$0xff] }
   0xb   :  { %v198_v36 = vsub.f32 %v3030_v23, %v5445_v28  ;;  %v366_v42 = vsub.f32 %v3026_v22, %v5430_v30  ;;  %v67_v49 = vsel %vm56_vm0, %v17_v45, 0  ;;  %v5429_v51 = vand.u32 4294901760, %v3060_v43 }
   0xc   :  { %v359_v37 = vand.u32 4294901760, %v358_v29  ;;  %2875 = vmatpush.msra.mxu3 %v534_v34  ;;  %535 = vmatpush.msra.mxu1 %v534_v34  ;;  %v206_v47 = vsub.f32 %v3043_v32, %v5444_v38  ;;  %v3080_v52 = vand.u32 4294901760, %v127_v46  ;;  %v5442_v54 = vand.u32 4294901760, %v3073_v48 }
   0xd   :  { %v199_v40 = vand.u32 4294901760, %v198_v36  ;;  %v367_v50 = vand.u32 4294901760, %v366_v42  ;;  %v3087_v56 = vand.u32 4294901760, %v67_v49  ;;  %v374_v57 = vsub.f32 %v3060_v43, %v5429_v51 }
   0xe   :  { %360 = vmatmul.f32.vlgmr.msra.gmra.mxu2 %v359_v37  ;;  %2876 = vmatpush.msra.mxu3 %v540_v35  ;;  %5539 = vst [vmem:[#allocation5_spill] sm:$0xff] %v3080_v52  ;;  %v207_v53 = vand.u32 4294901760, %v206_v47  ;;  %v3094_v58 = vsub.f32 %v127_v46, %v3080_v52  ;;  %v130_v60 = vsel %vm56_vm0, %v38_v55, 0  ;;  %v214_v61 = vsub.f32 %v3073_v48, %v5442_v54 }
   0xf   :  { %541 = vmatpush.msra.mxu1 %v540_v35  ;;  %623 = vmatmul.f32.vlgmr.msra.gmra.mxu3 %v3004_v9  ;;  %v3105_v62 = vsub.f32 %v67_v49, %v3087_v56  ;;  %v70_v63 = vsel %vm56_vm0, %v18_v59, 0  ;;  %v375_v0 = vand.u32 4294901760, %v374_v57  ;;  %v3110_v2 = vand.u32 4294901760, %v130_v60  ;;  %v20_v35 = vld [vmem:[%s5420_s2 + $0x30] sm:$0xff]  ;;  %v41_v49 = vld [vmem:[%s5420_s2 + $0xd8] sm:$0xff] }
  0x10   :  { %200 = vmatmul.f32.vlgmr.msra.gmra.mxu0 %v199_v40  ;;  %939 = vmatpush.msrb.mxu3 %v2990_v3  ;;  %5540 = vst [vmem:[#allocation6_spill] sm:$0xff] %v3094_v58  ;;  %v5428_v1 = vand.u32 4294901760, %v3094_v58  ;;  %v3116_v6 = vand.u32 4294901760, %v70_v63  ;;  %v133_v11 = vsel %vm56_vm0, %v39_v5, 0  ;;  %v73_v14 = vsel %vm56_vm0, %v19_v10, 0  ;;  %v21_v57 = vld [vmem:[%s5420_s2 + $0x38] sm:$0xff] }
  0x11   :  { %543 = vmatmul.f32.vlgmr.msra.gmra.mxu1 %v3017_v16  ;;  %5541 = vst [vmem:[#allocation7_spill] sm:$0xff] %v3110_v2  ;;  %v3122_v8 = vsub.f32 %v130_v60, %v3110_v2  ;;  %v3138_v20 = vand.u32 4294901760, %v133_v11  ;;  %v3144_v29 = vand.u32 4294901760, %v73_v14  ;;  %v136_v36 = vsel %vm56_vm0, %v40_v27, 0 }
  0x12   :  { %1381 = vmatpush.msrb.mxu1 %v2990_v3  ;;  %941 = vmatpush.msrb.mxu3 %v2992_v4  ;;  %v215_v3 = vand.u32 4294901760, %v214_v61  ;;  %v382_v7 = vsub.f32 %v3094_v58, %v5428_v1  ;;  %v3133_v13 = vsub.f32 %v70_v63, %v3116_v6  ;;  %v76_v40 = vsel %vm56_vm0, %v20_v35, 0 }
  0x13   :  { %5542 = vst [vmem:[#allocation8_spill] sm:$0xff] %v3122_v8  ;;  %v5427_v19 = vand.u32 4294901760, %v3122_v8  ;;  %v3150_v34 = vsub.f32 %v133_v11, %v3138_v20  ;;  %v3161_v39 = vsub.f32 %v73_v14, %v3144_v29  ;;  %v3166_v45 = vand.u32 4294901760, %v136_v36  ;;  %v42_v11 = vld [vmem:[%s5420_s2 + $0xe0] sm:$0xff] }
  0x14   :  { %1383 = vmatpush.msrb.mxu1 %v2992_v4  ;;  %v5440_v4 = vand.u32 4294901760, %v3105_v62  ;;  %v383_v18 = vand.u32 4294901760, %v382_v7  ;;  %5543 = vst [vmem:[#allocation9_spill] sm:$0xff] %v3138_v20  ;;  %v5439_v26 = vand.u32 4294901760, %v3133_v13  ;;  %v139_v59 = vsel %vm56_vm0, %v41_v49, 0 }
  0x15   :  { %v390_v33 = vsub.f32 %v3122_v8, %v5427_v19  ;;  %5544 = vst [vmem:[#allocation10_spill] sm:$0xff] %v3150_v34  ;;  %v5426_v42 = vand.u32 4294901760, %v3150_v34  ;;  %v5438_v47 = vand.u32 4294901760, %v3161_v39  ;;  %v3178_v55 = vsub.f32 %v136_v36, %v3166_v45 }
  0x16   :  { %368 = vmatmul.f32.gmra.mxu2 %v367_v50  ;;  %v222_v12 = vsub.f32 %v3105_v62, %v5440_v4  ;;  %v230_v37 = vsub.f32 %v3133_v13, %v5439_v26  ;;  %5545 = vst [vmem:[#allocation11_spill] sm:$0xff] %v3166_v45  ;;  %v3172_v50 = vand.u32 4294901760, %v76_v40  ;;  %v79_v63 = vsel %vm56_vm0, %v21_v57, 0 }
  0x17   :  { %627 = vmatmul.f32.gmra.mxu3 %v3015_v15  ;;  %v391_v41 = vand.u32 4294901760, %v390_v33  ;;  %5546 = vst [vmem:[#allocation12_spill] sm:$0xff] %v3178_v55  ;;  %v238_v60 = vsub.f32 %v3161_v39, %v5438_v47  ;;  %v3194_v5 = vand.u32 4294901760, %v139_v59  ;;  %v142_v27 = vsel %vm56_vm0, %v42_v11, 0 }
  0x18   :  { %208 = vmatmul.f32.gmra.mxu0 %v207_v53  ;;  %v223_v21 = vand.u32 4294901760, %v222_v12  ;;  %v231_v46 = vand.u32 4294901760, %v230_v37  ;;  %v398_v53 = vsub.f32 %v3150_v34, %v5426_v42  ;;  %v3189_v61 = vsub.f32 %v76_v40, %v3172_v50 }
  0x19   :  { %547 = vmatmul.f32.gmra.mxu1 %v3033_v25  ;;  %5547 = vst [vmem:[#allocation13_spill] sm:$0xff] %v3194_v5  ;;  %v239_v7 = vand.u32 4294901760, %v238_v60  ;;  %v3200_v12 = vand.u32 4294901760, %v79_v63 }
  0x1a   :  { %v5436_v10 = vand.u32 4294901760, %v3189_v61 }
  0x1b   :  { %v3217_v35 = vsub.f32 %v79_v63, %v3200_v12  ;;  %v23_v63 = vld [vmem:[%s5420_s2 + $0x48] sm:$0xff] }
  0x1c   :  { %v246_v33 = vsub.f32 %v3189_v61, %v5436_v10 }
  0x1d   :  { %v5434_v49 = vand.u32 4294901760, %v3217_v35 }
  0x1e   :  { %376 = vmatmul.f32.gmra.mxu2 %v375_v0  ;;  %v399_v0 = vand.u32 4294901760, %v398_v53  ;;  %v43_v53 = vld [vmem:[%s5420_s2 + $0xe8] sm:$0xff] }
  0x1f   :  { %631 = vmatmul.f32.gmra.mxu3 %v3040_v31 }
  0x20   :  { %216 = vmatmul.f32.gmra.mxu0 %v215_v3  ;;  %v5424_v3 = vand.u32 4294901760, %v3178_v55 }
  0x21   :  { %551 = vmatmul.f32.gmra.mxu1 %v3062_v44 }
  0x22   :  { %v406_v14 = vsub.f32 %v3178_v55, %v5424_v3 }
  0x24   :  { %v407_v37 = vand.u32 4294901760, %v406_v14  ;;  %v85_v14 = vsel %vm56_vm0, %v23_v63, 0  ;;  %v24_v63 = vld [vmem:[%s5420_s2 + $0x50] sm:$0xff] }
  0x26   :  { %384 = vmatmul.f32.gmra.mxu2 %v383_v18  ;;  %v3206_v18 = vsub.f32 %v139_v59, %v3194_v5 }
  0x27   :  { %635 = vmatmul.f32.gmra.mxu3 %v3080_v52 }
  0x28   :  { %224 = vmatmul.f32.gmra.mxu0 %v223_v21  ;;  %5548 = vst [vmem:[#allocation14_spill] sm:$0xff] %v3206_v18  ;;  %v22_v21 = vld [vmem:[%s5420_s2 + $0x40] sm:$0xff]  ;;  %v5423_v40 = vand.u32 4294901760, %v3206_v18 }
  0x29   :  { %555 = vmatmul.f32.gmra.mxu1 %v3087_v56  ;;  %v82_v36 = vsel %vm56_vm0, %v22_v21, 0 }
  0x2a   :  { %v3228_v57 = vand.u32 4294901760, %v82_v36  ;;  %v414_v59 = vsub.f32 %v3206_v18, %v5423_v40  ;;  %v3256_v40 = vand.u32 4294901760, %v85_v14 }
  0x2c   :  { %v3245_v11 = vsub.f32 %v82_v36, %v3228_v57  ;;  %v415_v21 = vand.u32 4294901760, %v414_v59  ;;  %v3273_v3 = vsub.f32 %v85_v14, %v3256_v40 }
  0x2e   :  { %392 = vmatmul.f32.gmra.mxu2 %v391_v41  ;;  %v3222_v41 = vand.u32 4294901760, %v142_v27  ;;  %v5435_v1 = vand.u32 4294901760, %v3273_v3 }
  0x2f   :  { %639 = vmatmul.f32.gmra.mxu3 %v3110_v2 }
  0x30   :  { %232 = vmatmul.f32.gmra.mxu0 %v231_v46  ;;  %5549 = vst [vmem:[#allocation15_spill] sm:$0xff] %v3222_v41  ;;  %v247_v46 = vand.u32 4294901760, %v246_v33  ;;  %v3234_v60 = vsub.f32 %v142_v27, %v3222_v41 }
  0x31   :  { %559 = vmatmul.f32.gmra.mxu1 %v3116_v6 }
  0x32   :  { %5550 = vst [vmem:[#allocation16_spill] sm:$0xff] %v3234_v60  ;;  %v5425_v27 = vand.u32 4294901760, %v3234_v60 }
  0x34   :  { %v422_v36 = vsub.f32 %v3234_v60, %v5425_v27 }
  0x36   :  { %400 = vmatmul.f32.gmra.mxu2 %v399_v0  ;;  %v145_v0 = vsel %vm56_vm0, %v43_v53, 0  ;;  %v5433_v53 = vand.u32 4294901760, %v3245_v11  ;;  %v423_v27 = vand.u32 4294901760, %v422_v36 }
  0x37   :  { %643 = vmatmul.f32.gmra.mxu3 %v3138_v20  ;;  %v3250_v33 = vand.u32 4294901760, %v145_v0 }
  0x38   :  { %240 = vmatmul.f32.gmra.mxu0 %v239_v7  ;;  %v254_v7 = vsub.f32 %v3217_v35, %v5434_v49 }
  0x39   :  { %563 = vmatmul.f32.gmra.mxu1 %v3144_v29  ;;  %5551 = vst [vmem:[#allocation17_spill] sm:$0xff] %v3250_v33  ;;  %v3262_v59 = vsub.f32 %v145_v0, %v3250_v33  ;;  %v88_v0 = vsel %vm56_vm0, %v24_v63, 0  ;;  %v25_v63 = vld [vmem:[%s5420_s2 + $0x58] sm:$0xff] }
  0x3a   :  { %v3284_v51 = vand.u32 4294901760, %v88_v0 }
  0x3b   :  { %5552 = vst [vmem:[#allocation18_spill] sm:$0xff] %v3262_v59  ;;  %v5431_v42 = vand.u32 4294901760, %v3262_v59 }
  0x3c   :  { %v3301_v30 = vsub.f32 %v88_v0, %v3284_v51 }
  0x3d   :  { %v430_v14 = vsub.f32 %v3262_v59, %v5431_v42 }
  0x3e   :  { %408 = vmatmul.f32.gmra.mxu2 %v407_v37  ;;  %v255_v37 = vand.u32 4294901760, %v254_v7  ;;  %v5441_v49 = vand.u32 4294901760, %v3301_v30 }
  0x3f   :  { %647 = vmatmul.f32.gmra.mxu3 %v3166_v45  ;;  %v431_v42 = vand.u32 4294901760, %v430_v14 }
  0x40   :  { %248 = vmatmul.f32.gmra.mxu0 %v247_v46  ;;  %v44_v46 = vld [vmem:[%s5420_s2 + $0xf0] sm:$0xff] }
  0x41   :  { %567 = vmatmul.f32.gmra.mxu1 %v3172_v50  ;;  %v148_v7 = vsel %vm56_vm0, %v44_v46, 0 }
  0x42   :  { %v3278_v19 = vand.u32 4294901760, %v148_v7 }
  0x44   :  { %5553 = vst [vmem:[#allocation19_spill] sm:$0xff] %v3278_v19  ;;  %v3290_v36 = vsub.f32 %v148_v7, %v3278_v19  ;;  %v91_v7 = vsel %vm56_vm0, %v25_v63, 0  ;;  %v26_v63 = vld [vmem:[%s5420_s2 + $0x60] sm:$0xff] }
  0x46   :  { %416 = vmatmul.f32.gmra.mxu2 %v415_v21  ;;  %v262_v21 = vsub.f32 %v3245_v11, %v5433_v53  ;;  %5554 = vst [vmem:[#allocation20_spill] sm:$0xff] %v3290_v36  ;;  %v5437_v24 = vand.u32 4294901760, %v3290_v36 }
  0x47   :  { %651 = vmatmul.f32.gmra.mxu3 %v3194_v5 }
  0x48   :  { %256 = vmatmul.f32.gmra.mxu0 %v255_v37  ;;  %v263_v46 = vand.u32 4294901760, %v262_v21  ;;  %v45_v37 = vld [vmem:[%s5420_s2 + $0xf8] sm:$0xff]  ;;  %v438_v0 = vsub.f32 %v3290_v36, %v5437_v24 }
  0x49   :  { %571 = vmatmul.f32.gmra.mxu1 %v3200_v12  ;;  %v151_v21 = vsel %vm56_vm0, %v45_v37, 0 }
  0x4a   :  { %v3306_v53 = vand.u32 4294901760, %v151_v21  ;;  %v439_v24 = vand.u32 4294901760, %v438_v0 }
  0x4c   :  { %5555 = vst [vmem:[#allocation21_spill] sm:$0xff] %v3306_v53  ;;  %v3318_v14 = vsub.f32 %v151_v21, %v3306_v53  ;;  %v94_v21 = vsel %vm56_vm0, %v26_v63, 0  ;;  %v27_v63 = vld [vmem:[%s5420_s2 + $0x68] sm:$0xff] }
  0x4e   :  { %424 = vmatmul.f32.gmra.mxu2 %v423_v27  ;;  %v270_v27 = vsub.f32 %v3273_v3, %v5435_v1  ;;  %v3312_v1 = vand.u32 4294901760, %v91_v7  ;;  %5556 = vst [vmem:[#allocation22_spill] sm:$0xff] %v3318_v14  ;;  %v5443_v47 = vand.u32 4294901760, %v3318_v14 }
  0x4f   :  { %655 = vmatmul.f32.gmra.mxu3 %v3222_v41 }
  0x50   :  { %264 = vmatmul.f32.gmra.mxu0 %v263_v46  ;;  %v271_v37 = vand.u32 4294901760, %v270_v27  ;;  %v46_v46 = vld [vmem:[%s5420_s2 + $0x100] sm:$0xff]  ;;  %v3329_v10 = vsub.f32 %v91_v7, %v3312_v1  ;;  %v446_v7 = vsub.f32 %v3318_v14, %v5443_v47 }
  0x51   :  { %575 = vmatmul.f32.gmra.mxu1 %v3228_v57  ;;  %v154_v27 = vsel %vm56_vm0, %v46_v46, 0 }
  0x52   :  { %v3334_v26 = vand.u32 4294901760, %v154_v27  ;;  %v5448_v4 = vand.u32 4294901760, %v3329_v10  ;;  %v447_v47 = vand.u32 4294901760, %v446_v7 }
  0x54   :  { %5557 = vst [vmem:[#allocation23_spill] sm:$0xff] %v3334_v26  ;;  %v3346_v0 = vsub.f32 %v154_v27, %v3334_v26  ;;  %v97_v27 = vsel %vm56_vm0, %v27_v63, 0  ;;  %v28_v63 = vld [vmem:[%s5420_s2 + $0x70] sm:$0xff] }
  0x56   :  { %432 = vmatmul.f32.gmra.mxu2 %v431_v42  ;;  %v278_v42 = vsub.f32 %v3301_v30, %v5441_v49  ;;  %v3340_v49 = vand.u32 4294901760, %v94_v21  ;;  %5558 = vst [vmem:[#allocation24_spill] sm:$0xff] %v3346_v0  ;;  %v5451_v38 = vand.u32 4294901760, %v3346_v0 }
  0x57   :  { %659 = vmatmul.f32.gmra.mxu3 %v3250_v33 }
  0x58   :  { %272 = vmatmul.f32.gmra.mxu0 %v271_v37  ;;  %v279_v46 = vand.u32 4294901760, %v278_v42  ;;  %v47_v37 = vld [vmem:[%s5420_s2 + $0x108] sm:$0xff]  ;;  %v3357_v54 = vsub.f32 %v94_v21, %v3340_v49  ;;  %v454_v21 = vsub.f32 %v3346_v0, %v5451_v38 }
  0x59   :  { %579 = vmatmul.f32.gmra.mxu1 %v3256_v40  ;;  %v157_v42 = vsel %vm56_vm0, %v47_v37, 0 }
  0x5a   :  { %v3362_v28 = vand.u32 4294901760, %v157_v42  ;;  %v5458_v14 = vand.u32 4294901760, %v3357_v54  ;;  %v455_v38 = vand.u32 4294901760, %v454_v21 }
  0x5c   :  { %5559 = vst [vmem:[#allocation25_spill] sm:$0xff] %v3362_v28  ;;  %v3374_v7 = vsub.f32 %v157_v42, %v3362_v28  ;;  %v100_v42 = vsel %vm56_vm0, %v28_v63, 0  ;;  %v29_v63 = vld [vmem:[%s5420_s2 + $0x78] sm:$0xff] }
  0x5e   :  { %440 = vmatmul.f32.gmra.mxu2 %v439_v24  ;;  %v286_v24 = vsub.f32 %v3329_v10, %v5448_v4  ;;  %v3368_v4 = vand.u32 4294901760, %v97_v27  ;;  %5560 = vst [vmem:[#allocation26_spill] sm:$0xff] %v3374_v7  ;;  %v5461_v0 = vand.u32 4294901760, %v3374_v7 }
  0x5f   :  { %663 = vmatmul.f32.gmra.mxu3 %v3278_v19 }
  0x60   :  { %280 = vmatmul.f32.gmra.mxu0 %v279_v46  ;;  %v287_v37 = vand.u32 4294901760, %v286_v24  ;;  %v48_v46 = vld [vmem:[%s5420_s2 + $0x110] sm:$0xff]  ;;  %v3385_v19 = vsub.f32 %v97_v27, %v3368_v4  ;;  %v462_v27 = vsub.f32 %v3374_v7, %v5461_v0 }
  0x61   :  { %583 = vmatmul.f32.gmra.mxu1 %v3284_v51  ;;  %v160_v24 = vsel %vm56_vm0, %v48_v46, 0 }
  0x62   :  { %v3390_v36 = vand.u32 4294901760, %v160_v24  ;;  %v463_v0 = vand.u32 4294901760, %v462_v27 }
  0x64   :  { %5561 = vst [vmem:[#allocation27_spill] sm:$0xff] %v3390_v36  ;;  %v3402_v21 = vsub.f32 %v160_v24, %v3390_v36  ;;  %v103_v24 = vsel %vm56_vm0, %v29_v63, 0  ;;  %v30_v63 = vld [vmem:[%s5420_s2 + $0x80] sm:$0xff] }
  0x66   :  { %448 = vmatmul.f32.gmra.mxu2 %v447_v47  ;;  %v294_v47 = vsub.f32 %v3357_v54, %v5458_v14  ;;  %v3396_v14 = vand.u32 4294901760, %v100_v42  ;;  %5562 = vst [vmem:[#allocation28_spill] sm:$0xff] %v3402_v21  ;;  %v5471_v7 = vand.u32 4294901760, %v3402_v21 }
  0x67   :  { %667 = vmatmul.f32.gmra.mxu3 %v3306_v53  ;;  %v5468_v53 = vand.u32 4294901760, %v3385_v19 }
  0x68   :  { %288 = vmatmul.f32.gmra.mxu0 %v287_v37  ;;  %v295_v46 = vand.u32 4294901760, %v294_v47  ;;  %v49_v37 = vld [vmem:[%s5420_s2 + $0x118] sm:$0xff]  ;;  %v3413_v33 = vsub.f32 %v100_v42, %v3396_v14  ;;  %v470_v42 = vsub.f32 %v3402_v21, %v5471_v7 }
  0x69   :  { %587 = vmatmul.f32.gmra.mxu1 %v3312_v1  ;;  %v163_v47 = vsel %vm56_vm0, %v49_v37, 0 }
  0x6a   :  { %v3418_v59 = vand.u32 4294901760, %v163_v47  ;;  %v471_v7 = vand.u32 4294901760, %v470_v42 }
  0x6c   :  { %5563 = vst [vmem:[#allocation29_spill] sm:$0xff] %v3418_v59  ;;  %v3430_v27 = vsub.f32 %v163_v47, %v3418_v59  ;;  %v106_v47 = vsel %vm56_vm0, %v30_v63, 0  ;;  %v31_v63 = vld [vmem:[%s5420_s2 + $0x88] sm:$0xff] }
  0x6e   :  { %456 = vmatmul.f32.gmra.mxu2 %v455_v38  ;;  %v302_v38 = vsub.f32 %v3385_v19, %v5468_v53  ;;  %v3424_v53 = vand.u32 4294901760, %v103_v24  ;;  %5564 = vst [vmem:[#allocation30_spill] sm:$0xff] %v3430_v27  ;;  %v5481_v21 = vand.u32 4294901760, %v3430_v27 }
  0x6f   :  { %671 = vmatmul.f32.gmra.mxu3 %v3334_v26  ;;  %v5478_v26 = vand.u32 4294901760, %v3413_v33 }
  0x70   :  { %296 = vmatmul.f32.gmra.mxu0 %v295_v46  ;;  %v303_v37 = vand.u32 4294901760, %v302_v38  ;;  %v50_v46 = vld [vmem:[%s5420_s2 + $0x120] sm:$0xff]  ;;  %v3441_v41 = vsub.f32 %v103_v24, %v3424_v53  ;;  %v478_v24 = vsub.f32 %v3430_v27, %v5481_v21 }
  0x71   :  { %591 = vmatmul.f32.gmra.mxu1 %v3340_v49  ;;  %v166_v38 = vsel %vm56_vm0, %v50_v46, 0 }
  0x72   :  { %v3446_v60 = vand.u32 4294901760, %v166_v38  ;;  %v479_v21 = vand.u32 4294901760, %v478_v24 }
  0x74   :  { %5565 = vst [vmem:[#allocation31_spill] sm:$0xff] %v3446_v60  ;;  %v3458_v42 = vsub.f32 %v166_v38, %v3446_v60  ;;  %v109_v38 = vsel %vm56_vm0, %v31_v63, 0  ;;  %v32_v63 = vld [vmem:[%s5420_s2 + $0x90] sm:$0xff] }
  0x76   :  { %464 = vmatmul.f32.gmra.mxu2 %v463_v0  ;;  %v310_v0 = vsub.f32 %v3413_v33, %v5478_v26  ;;  %v3452_v26 = vand.u32 4294901760, %v106_v47  ;;  %5566 = vst [vmem:[#allocation32_spill] sm:$0xff] %v3458_v42  ;;  %v5491_v27 = vand.u32 4294901760, %v3458_v42 }
  0x77   :  { %675 = vmatmul.f32.gmra.mxu3 %v3362_v28  ;;  %v5488_v28 = vand.u32 4294901760, %v3441_v41 }
  0x78   :  { %304 = vmatmul.f32.gmra.mxu0 %v303_v37  ;;  %v311_v46 = vand.u32 4294901760, %v310_v0  ;;  %v51_v37 = vld [vmem:[%s5420_s2 + $0x128] sm:$0xff]  ;;  %v3469_v5 = vsub.f32 %v106_v47, %v3452_v26  ;;  %v486_v47 = vsub.f32 %v3458_v42, %v5491_v27 }
  0x79   :  { %595 = vmatmul.f32.gmra.mxu1 %v3368_v4  ;;  %v169_v0 = vsel %vm56_vm0, %v51_v37, 0 }
  0x7a   :  { %v3474_v18 = vand.u32 4294901760, %v169_v0  ;;  %v487_v27 = vand.u32 4294901760, %v486_v47 }
  0x7c   :  { %5567 = vst [vmem:[#allocation33_spill] sm:$0xff] %v3474_v18  ;;  %v3486_v24 = vsub.f32 %v169_v0, %v3474_v18  ;;  %v112_v0 = vsel %vm56_vm0, %v32_v63, 0 }
  0x7e   :  { %472 = vmatmul.f32.gmra.mxu2 %v471_v7  ;;  %v318_v7 = vsub.f32 %v3441_v41, %v5488_v28  ;;  %v3480_v28 = vand.u32 4294901760, %v109_v38  ;;  %5568 = vst [vmem:[#allocation34_spill] sm:$0xff] %v3486_v24  ;;  %v5505_v42 = vand.u32 4294901760, %v3486_v24 }
  0x7f   :  { %679 = vmatmul.f32.gmra.mxu3 %v3390_v36  ;;  %v5498_v36 = vand.u32 4294901760, %v3469_v5 }
  0x80   :  { %312 = vmatmul.f32.gmra.mxu0 %v311_v46  ;;  %v319_v37 = vand.u32 4294901760, %v318_v7  ;;  %v52_v46 = vld [vmem:[%s5420_s2 + $0x130] sm:$0xff]  ;;  %v3497_v45 = vsub.f32 %v109_v38, %v3480_v28  ;;  %v494_v47 = vsub.f32 %v3486_v24, %v5505_v42 }
  0x81   :  { %599 = vmatmul.f32.gmra.mxu1 %v3396_v14  ;;  %v172_v7 = vsel %vm56_vm0, %v52_v46, 0 }
  0x82   :  { %v3502_v55 = vand.u32 4294901760, %v172_v7  ;;  %v495_v24 = vand.u32 4294901760, %v494_v47 }
  0x84   :  { %5569 = vst [vmem:[#allocation35_spill] sm:$0xff] %v3502_v55  ;;  %v3518_v63 = vsub.f32 %v172_v7, %v3502_v55 }
  0x86   :  { %480 = vmatmul.f32.gmra.mxu2 %v479_v21  ;;  %v326_v21 = vsub.f32 %v3469_v5, %v5498_v36  ;;  %v3508_v36 = vand.u32 4294901760, %v112_v0  ;;  %5570 = vst [vmem:[#allocation36_spill] sm:$0xff] %v3518_v63  ;;  %v5518_v8 = vand.u32 4294901760, %v3518_v63 }
  0x87   :  { %683 = vmatmul.f32.gmra.mxu3 %v3418_v59 }
  0x88   :  { %320 = vmatmul.f32.gmra.mxu0 %v319_v37  ;;  %v327_v46 = vand.u32 4294901760, %v326_v21  ;;  %v53_v37 = vld [vmem:[%s5420_s2 + $0x138] sm:$0xff]  ;;  %v3529_v2 = vsub.f32 %v112_v0, %v3508_v36  ;;  %v502_v47 = vsub.f32 %v3518_v63, %v5518_v8 }
  0x89   :  { %603 = vmatmul.f32.gmra.mxu1 %v3424_v53  ;;  %v33_v21 = vld [vmem:[%s5420_s2 + $0x98] sm:$0xff]  ;;  %v175_v59 = vsel %vm56_vm0, %v53_v37, 0 }
  0x8a   :  { %v115_v7 = vsel %vm56_vm0, %v33_v21, 0  ;;  %v3534_v52 = vand.u32 4294901760, %v175_v59  ;;  %v5525_v58 = vand.u32 4294901760, %v3529_v2 }
  0x8c   :  { %5572 = vst [vmem:[#allocation37_spill] sm:$0xff] %v3534_v52  ;;  %v3549_v21 = vsub.f32 %v175_v59, %v3534_v52 }
  0x8d   :  { %v3510_v38 = vpop.f32.mrf.mxu0 }
  0x8e   :  { %488 = vmatmul.f32.gmra.mxu2 %v487_v27  ;;  %v3512_v20 = vpop.f32.mrf.mxu1  ;;  %v5571_v27 = vand.u32 4294901760, %v3497_v45  ;;  %5574 = vst [vmem:[#allocation39_spill] sm:$0xff] %v3549_v21 }
  0x8f   :  { %687 = vmatmul.f32.gmra.mxu3 %v3446_v60 }
  0x90   :  { %328 = vmatmul.f32.gmra.mxu0 %v327_v46  ;;  %v334_v34 = vsub.f32 %v3497_v45, %v5571_v27  ;;  %v3539_v27 = vand.u32 4294901760, %v115_v7 }
  0x91   :  { %v361_v42 = vpop.f32.mrf.mxu2  ;;  %607 = vmatmul.f32.gmra.mxu1 %v3452_v26 }
  0x92   :  { %v624_v37 = vpop.f32.mrf.mxu3  ;;  %v335_v46 = vand.u32 4294901760, %v334_v34  ;;  %v342_v34 = vsub.f32 %v3529_v2, %v5525_v58 }
  0x93   :  { %v3536_v60 = vadd.f32 %v624_v37, %v361_v42  ;;  %v3556_v42 = vsub.f32 %v115_v7, %v3539_v27  ;;  %v503_v37 = vand.u32 4294901760, %v502_v47 }
  0x94   :  { %v343_v59 = vand.u32 4294901760, %v342_v34 }
  0x95   :  { %5573 = vst [vmem:[#allocation38_spill] sm:$0xff] %v3536_v60  ;;  %v3541_v0 = vpop.f32.mrf.mxu0  ;;  %v5528_v60 = vand.u32 4294901760, %v3549_v21 }
  0x96   :  { %496 = vmatmul.f32.gmra.mxu2 %v495_v24  ;;  %v3543_v31 = vpop.f32.mrf.mxu1 }
  0x97   :  { %691 = vmatmul.f32.gmra.mxu3 %v3474_v18  ;;  %v5529_v18 = vand.u32 4294901760, %v3556_v42  ;;  %v510_v7 = vsub.f32 %v3549_v21, %v5528_v60 }
  0x98   :  { %336 = vmatmul.f32.gmra.mxu0 %v335_v46 }
  0x99   :  { %v369_v24 = vpop.f32.mrf.mxu2  ;;  %611 = vmatmul.f32.gmra.mxu1 %v3480_v28  ;;  %v511_v34 = vand.u32 4294901760, %v510_v7 }
  0x9a   :  { %v628_v8 = vpop.f32.mrf.mxu3 }
  0x9b   :  { %v3560_v63 = vadd.f32 %v628_v8, %v369_v24  ;;  %v350_v8 = vsub.f32 %v3556_v42, %v5529_v18 }
  0x9d   :  { %5575 = vst [vmem:[#allocation40_spill] sm:$0xff] %v3560_v63  ;;  %v3563_v46 = vpop.f32.mrf.mxu0 }
  0x9e   :  { %504 = vmatmul.f32.gmra.mxu2 %v503_v37  ;;  %v3565_v43 = vpop.f32.mrf.mxu1  ;;  %v351_v37 = vand.u32 4294901760, %v350_v8  ;;  %v5578_v8 = vand.u32 4294901760, %v3030_v23 }
  0x9f   :  { %695 = vmatmul.f32.gmra.mxu3 %v3502_v55 }
  0xa0   :  { %344 = vmatmul.f32.gmra.mxu0 %v343_v59 }
  0xa1   :  { %v377_v47 = vpop.f32.mrf.mxu2  ;;  %615 = vmatmul.f32.gmra.mxu1 %v3508_v36 }
  0xa2   :  { %v632_v24 = vpop.f32.mrf.mxu3 }
  0xa3   :  { %v3575_v58 = vadd.f32 %v632_v24, %v377_v47 }
  0xa5   :  { %5576 = vst [vmem:[#allocation41_spill] sm:$0xff] %v3575_v58  ;;  %v3577_v63 = vpop.f32.mrf.mxu0 }
  0xa6   :  { %512 = vmatmul.f32.gmra.mxu2 %v511_v34  ;;  %v3579_v15 = vpop.f32.mrf.mxu1 }
  0xa7   :  { %699 = vmatmul.f32.gmra.mxu3 %v3534_v52 }
  0xa8   :  { %352 = vmatmul.f32.gmra.mxu0 %v351_v37 }
  0xa9   :  { %v385_v59 = vpop.f32.mrf.mxu2  ;;  %619 = vmatmul.f32.gmra.mxu1 %v3539_v27 }
  0xaa   :  { %v636_v60 = vpop.f32.mrf.mxu3 }
  0xab   :  { %v3583_v18 = vadd.f32 %v636_v60, %v385_v59  ;;  %v5580_v59 = vand.u32 4294901760, %v3043_v32 }
  0xad   :  { %5577 = vst [vmem:[#allocation42_spill] sm:$0xff] %v3583_v18  ;;  %v3585_v21 = vpop.f32.mrf.mxu0 }
  0xae   :  { %725 = vmatmul.f32.vlgmr.msrb.gmra.mxu2 %v3030_v23  ;;  %v3588_v7 = vpop.f32.mrf.mxu1 }
  0xaf   :  { %945 = vmatmul.f32.vlgmr.msrb.gmra.mxu3 %v5578_v8 }
  0xb0   :  { %1206 = vmatmul.f32.vlgmr.msrb.gmra.mxu0 %v3017_v16 }
  0xb1   :  { %v393_v47 = vpop.f32.mrf.mxu2  ;;  %1385 = vmatmul.f32.vlgmr.msrb.gmra.mxu1 %v3017_v16 }
  0xb2   :  { %v640_v34 = vpop.f32.mrf.mxu3 }
  0xb3   :  { %v3594_v24 = vadd.f32 %v640_v34, %v393_v47  ;;  %v5582_v34 = vand.u32 4294901760, %v3073_v48 }
  0xb5   :  { %5579 = vst [vmem:[#allocation43_spill] sm:$0xff] %v3594_v24  ;;  %v3596_v37 = vpop.f32.mrf.mxu0 }
  0xb6   :  { %730 = vmatmul.f32.gmra.mxu2 %v3043_v32  ;;  %v3599_v60 = vpop.f32.mrf.mxu1 }
  0xb7   :  { %951 = vmatmul.f32.gmra.mxu3 %v5580_v59 }
  0xb8   :  { %1210 = vmatmul.f32.gmra.mxu0 %v3033_v25 }
  0xb9   :  { %v401_v23 = vpop.f32.mrf.mxu2  ;;  %1389 = vmatmul.f32.gmra.mxu1 %v3033_v25 }
  0xba   :  { %v644_v8 = vpop.f32.mrf.mxu3 }
  0xbb   :  { %v3605_v18 = vadd.f32 %v644_v8, %v401_v23  ;;  %v5584_v8 = vand.u32 4294901760, %v3105_v62 }
  0xbd   :  { %5581 = vst [vmem:[#allocation44_spill] sm:$0xff] %v3605_v18  ;;  %v3607_v16 = vpop.f32.mrf.mxu0 }
  0xbe   :  { %735 = vmatmul.f32.gmra.mxu2 %v3073_v48  ;;  %v3610_v47 = vpop.f32.mrf.mxu1 }
  0xbf   :  { %957 = vmatmul.f32.gmra.mxu3 %v5582_v34 }
  0xc0   :  { %1214 = vmatmul.f32.gmra.mxu0 %v3062_v44 }
  0xc1   :  { %v409_v32 = vpop.f32.mrf.mxu2  ;;  %1393 = vmatmul.f32.gmra.mxu1 %v3062_v44 }
  0xc2   :  { %v648_v59 = vpop.f32.mrf.mxu3 }
  0xc3   :  { %v3616_v24 = vadd.f32 %v648_v59, %v409_v32  ;;  %v5586_v59 = vand.u32 4294901760, %v3133_v13 }
  0xc5   :  { %5583 = vst [vmem:[#allocation45_spill] sm:$0xff] %v3616_v24  ;;  %v3618_v25 = vpop.f32.mrf.mxu0 }
  0xc6   :  { %740 = vmatmul.f32.gmra.mxu2 %v3105_v62  ;;  %v3621_v23 = vpop.f32.mrf.mxu1 }
  0xc7   :  { %963 = vmatmul.f32.gmra.mxu3 %v5584_v8 }
  0xc8   :  { %1218 = vmatmul.f32.gmra.mxu0 %v3087_v56 }
  0xc9   :  { %v417_v48 = vpop.f32.mrf.mxu2  ;;  %1397 = vmatmul.f32.gmra.mxu1 %v3087_v56 }
  0xca   :  { %v652_v34 = vpop.f32.mrf.mxu3 }
  0xcb   :  { %v3627_v18 = vadd.f32 %v652_v34, %v417_v48  ;;  %v5588_v34 = vand.u32 4294901760, %v3161_v39 }
  0xcd   :  { %5585 = vst [vmem:[#allocation46_spill] sm:$0xff] %v3627_v18  ;;  %v3629_v44 = vpop.f32.mrf.mxu0 }
  0xce   :  { %745 = vmatmul.f32.gmra.mxu2 %v3133_v13  ;;  %v3632_v32 = vpop.f32.mrf.mxu1 }
  0xcf   :  { %969 = vmatmul.f32.gmra.mxu3 %v5586_v59 }
  0xd0   :  { %1222 = vmatmul.f32.gmra.mxu0 %v3116_v6 }
  0xd1   :  { %v425_v62 = vpop.f32.mrf.mxu2  ;;  %1401 = vmatmul.f32.gmra.mxu1 %v3116_v6 }
  0xd2   :  { %v656_v8 = vpop.f32.mrf.mxu3 }
  0xd3   :  { %v3638_v24 = vadd.f32 %v656_v8, %v425_v62  ;;  %v5590_v8 = vand.u32 4294901760, %v3189_v61 }
  0xd5   :  { %5587 = vst [vmem:[#allocation47_spill] sm:$0xff] %v3638_v24  ;;  %v3640_v56 = vpop.f32.mrf.mxu0 }
  0xd6   :  { %750 = vmatmul.f32.gmra.mxu2 %v3161_v39  ;;  %v3643_v48 = vpop.f32.mrf.mxu1 }
  0xd7   :  { %975 = vmatmul.f32.gmra.mxu3 %v5588_v34 }
  0xd8   :  { %1226 = vmatmul.f32.gmra.mxu0 %v3144_v29 }
  0xd9   :  { %v433_v13 = vpop.f32.mrf.mxu2  ;;  %1405 = vmatmul.f32.gmra.mxu1 %v3144_v29 }
  0xda   :  { %v660_v59 = vpop.f32.mrf.mxu3 }
  0xdb   :  { %v3649_v18 = vadd.f32 %v660_v59, %v433_v13  ;;  %v5592_v59 = vand.u32 4294901760, %v3217_v35 }
  0xdd   :  { %5589 = vst [vmem:[#allocation48_spill] sm:$0xff] %v3649_v18  ;;  %v3651_v6 = vpop.f32.mrf.mxu0 }
  0xde   :  { %755 = vmatmul.f32.gmra.mxu2 %v3189_v61  ;;  %v3654_v62 = vpop.f32.mrf.mxu1 }
  0xdf   :  { %981 = vmatmul.f32.gmra.mxu3 %v5590_v8 }
  0xe0   :  { %1230 = vmatmul.f32.gmra.mxu0 %v3172_v50 }
  0xe1   :  { %v441_v39 = vpop.f32.mrf.mxu2  ;;  %1409 = vmatmul.f32.gmra.mxu1 %v3172_v50 }
  0xe2   :  { %v664_v34 = vpop.f32.mrf.mxu3 }
  0xe3   :  { %v3660_v24 = vadd.f32 %v664_v34, %v441_v39  ;;  %v5594_v34 = vand.u32 4294901760, %v3245_v11 }
  0xe5   :  { %5591 = vst [vmem:[#allocation49_spill] sm:$0xff] %v3660_v24  ;;  %v3662_v29 = vpop.f32.mrf.mxu0 }
  0xe6   :  { %760 = vmatmul.f32.gmra.mxu2 %v3217_v35  ;;  %v3665_v13 = vpop.f32.mrf.mxu1 }
  0xe7   :  { %987 = vmatmul.f32.gmra.mxu3 %v5592_v59 }
  0xe8   :  { %1234 = vmatmul.f32.gmra.mxu0 %v3200_v12 }
  0xe9   :  { %v449_v61 = vpop.f32.mrf.mxu2  ;;  %1413 = vmatmul.f32.gmra.mxu1 %v3200_v12 }
  0xea   :  { %v668_v8 = vpop.f32.mrf.mxu3 }
  0xeb   :  { %v3671_v18 = vadd.f32 %v668_v8, %v449_v61  ;;  %v5596_v8 = vand.u32 4294901760, %v3273_v3 }
  0xed   :  { %5593 = vst [vmem:[#allocation50_spill] sm:$0xff] %v3671_v18  ;;  %v3673_v50 = vpop.f32.mrf.mxu0 }
  0xee   :  { %765 = vmatmul.f32.gmra.mxu2 %v3245_v11  ;;  %v3676_v39 = vpop.f32.mrf.mxu1 }
  0xef   :  { %993 = vmatmul.f32.gmra.mxu3 %v5594_v34 }
  0xf0   :  { %1238 = vmatmul.f32.gmra.mxu0 %v3228_v57 }
  0xf1   :  { %v457_v35 = vpop.f32.mrf.mxu2  ;;  %1417 = vmatmul.f32.gmra.mxu1 %v3228_v57 }
  0xf2   :  { %v672_v59 = vpop.f32.mrf.mxu3 }
  0xf3   :  { %v3682_v24 = vadd.f32 %v672_v59, %v457_v35  ;;  %v5598_v59 = vand.u32 4294901760, %v3301_v30 }
  0xf5   :  { %5595 = vst [vmem:[#allocation51_spill] sm:$0xff] %v3682_v24  ;;  %v3684_v12 = vpop.f32.mrf.mxu0 }
  0xf6   :  { %770 = vmatmul.f32.gmra.mxu2 %v3273_v3  ;;  %v3687_v61 = vpop.f32.mrf.mxu1 }
  0xf7   :  { %999 = vmatmul.f32.gmra.mxu3 %v5596_v8 }
  0xf8   :  { %1242 = vmatmul.f32.gmra.mxu0 %v3256_v40 }
  0xf9   :  { %v465_v11 = vpop.f32.mrf.mxu2  ;;  %1421 = vmatmul.f32.gmra.mxu1 %v3256_v40 }
  0xfa   :  { %v676_v34 = vpop.f32.mrf.mxu3 }
  0xfb   :  { %v3693_v18 = vadd.f32 %v676_v34, %v465_v11  ;;  %v5600_v34 = vand.u32 4294901760, %v3329_v10 }
  0xfd   :  { %5597 = vst [vmem:[#allocation52_spill] sm:$0xff] %v3693_v18  ;;  %v3695_v57 = vpop.f32.mrf.mxu0 }
  0xfe   :  { %775 = vmatmul.f32.gmra.mxu2 %v3301_v30  ;;  %v3698_v35 = vpop.f32.mrf.mxu1 }
  0xff   :  { %1005 = vmatmul.f32.gmra.mxu3 %v5598_v59 }
 0x100   :  { %1246 = vmatmul.f32.gmra.mxu0 %v3284_v51 }
 0x101   :  { %v473_v3 = vpop.f32.mrf.mxu2  ;;  %1425 = vmatmul.f32.gmra.mxu1 %v3284_v51 }
 0x102   :  { %v680_v8 = vpop.f32.mrf.mxu3 }
 0x103   :  { %v3704_v24 = vadd.f32 %v680_v8, %v473_v3  ;;  %v5602_v8 = vand.u32 4294901760, %v3357_v54 }
 0x105   :  { %5599 = vst [vmem:[#allocation53_spill] sm:$0xff] %v3704_v24  ;;  %v3706_v40 = vpop.f32.mrf.mxu0 }
 0x106   :  { %780 = vmatmul.f32.gmra.mxu2 %v3329_v10  ;;  %v3709_v11 = vpop.f32.mrf.mxu1 }
 0x107   :  { %1011 = vmatmul.f32.gmra.mxu3 %v5600_v34 }
 0x108   :  { %1250 = vmatmul.f32.gmra.mxu0 %v3312_v1 }
 0x109   :  { %v481_v30 = vpop.f32.mrf.mxu2  ;;  %1429 = vmatmul.f32.gmra.mxu1 %v3312_v1 }
 0x10a   :  { %v684_v59 = vpop.f32.mrf.mxu3 }
 0x10b   :  { %v3715_v18 = vadd.f32 %v684_v59, %v481_v30  ;;  %v5604_v59 = vand.u32 4294901760, %v3385_v19 }
 0x10d   :  { %5601 = vst [vmem:[#allocation54_spill] sm:$0xff] %v3715_v18  ;;  %v3717_v51 = vpop.f32.mrf.mxu0 }
 0x10e   :  { %785 = vmatmul.f32.gmra.mxu2 %v3357_v54  ;;  %v3720_v3 = vpop.f32.mrf.mxu1 }
 0x10f   :  { %1017 = vmatmul.f32.gmra.mxu3 %v5602_v8 }
 0x110   :  { %1254 = vmatmul.f32.gmra.mxu0 %v3340_v49 }
 0x111   :  { %v489_v10 = vpop.f32.mrf.mxu2  ;;  %1433 = vmatmul.f32.gmra.mxu1 %v3340_v49 }
 0x112   :  { %v688_v34 = vpop.f32.mrf.mxu3 }
 0x113   :  { %v3726_v24 = vadd.f32 %v688_v34, %v489_v10  ;;  %v5606_v34 = vand.u32 4294901760, %v3413_v33 }
 0x115   :  { %5603 = vst [vmem:[#allocation55_spill] sm:$0xff] %v3726_v24  ;;  %v3728_v1 = vpop.f32.mrf.mxu0 }
 0x116   :  { %790 = vmatmul.f32.gmra.mxu2 %v3385_v19  ;;  %v3731_v30 = vpop.f32.mrf.mxu1 }
 0x117   :  { %1023 = vmatmul.f32.gmra.mxu3 %v5604_v59 }
 0x118   :  { %1258 = vmatmul.f32.gmra.mxu0 %v3368_v4 }
 0x119   :  { %v497_v54 = vpop.f32.mrf.mxu2  ;;  %1437 = vmatmul.f32.gmra.mxu1 %v3368_v4 }
 0x11a   :  { %v692_v8 = vpop.f32.mrf.mxu3 }
 0x11b   :  { %v3737_v18 = vadd.f32 %v692_v8, %v497_v54  ;;  %v5609_v8 = vand.u32 4294901760, %v3441_v41 }
 0x11d   :  { %5605 = vst [vmem:[#allocation56_spill] sm:$0xff] %v3737_v18  ;;  %v3739_v49 = vpop.f32.mrf.mxu0 }
 0x11e   :  { %795 = vmatmul.f32.gmra.mxu2 %v3413_v33  ;;  %v3742_v10 = vpop.f32.mrf.mxu1 }
 0x11f   :  { %1029 = vmatmul.f32.gmra.mxu3 %v5606_v34 }
 0x120   :  { %1262 = vmatmul.f32.gmra.mxu0 %v3396_v14 }
 0x121   :  { %v505_v19 = vpop.f32.mrf.mxu2  ;;  %1441 = vmatmul.f32.gmra.mxu1 %v3396_v14 }
 0x122   :  { %v696_v59 = vpop.f32.mrf.mxu3 }
 0x123   :  { %v3748_v24 = vadd.f32 %v696_v59, %v505_v19  ;;  %v545_v59 = vadd.f32 %v3512_v20, %v3510_v38 }
 0x125   :  { %5607 = vst [vmem:[#allocation57_spill] sm:$0xff] %v3748_v24  ;;  %v3750_v4 = vpop.f32.mrf.mxu0  ;;  %v5611_v24 = vand.u32 4294901760, %v3469_v5 }
 0x126   :  { %800 = vmatmul.f32.gmra.mxu2 %v3441_v41  ;;  %v3753_v54 = vpop.f32.mrf.mxu1 }
 0x127   :  { %5608 = vst [vmem:[#allocation58_spill] sm:$0xff] %v3753_v54  ;;  %1035 = vmatmul.f32.gmra.mxu3 %v5609_v8  ;;  %v5614_v54 = vand.u32 4294901760, %v3556_v42 }
 0x128   :  { %1266 = vmatmul.f32.gmra.mxu0 %v3424_v53 }
 0x129   :  { %v513_v33 = vpop.f32.mrf.mxu2  ;;  %1445 = vmatmul.f32.gmra.mxu1 %v3424_v53 }
 0x12a   :  { %v700_v34 = vpop.f32.mrf.mxu3 }
 0x12b   :  { %v3759_v18 = vadd.f32 %v700_v34, %v513_v33 }
 0x12d   :  { %5610 = vst [vmem:[#allocation59_spill] sm:$0xff] %v3759_v18  ;;  %v1207_v14 = vpop.f32.mrf.mxu0  ;;  %v3772_v18 = vld [vmem:[%s5421_s0] ss:$0 sm:$0xff] }
 0x12e   :  { %805 = vmatmul.f32.gmra.mxu2 %v3469_v5  ;;  %v1386_v19 = vpop.f32.mrf.mxu1  ;;  %v549_v5 = vadd.f32 %v3543_v31, %v3541_v0 }
 0x12f   :  { %1041 = vmatmul.f32.gmra.mxu3 %v5611_v24 }
 0x130   :  { %1270 = vmatmul.f32.gmra.mxu0 %v3452_v26 }
 0x131   :  { %v726_v41 = vpop.f32.mrf.mxu2  ;;  %1449 = vmatmul.f32.gmra.mxu1 %v3452_v26  ;;  %v5612_v26 = vand.u32 4294901760, %v3497_v45 }
 0x132   :  { %v727_v8 = vadd.f32 %v726_v41, %v545_v59  ;;  %v946_v53 = vpop.f32.mrf.mxu3 }
 0x134   :  { %v947_v58 = vadd.f32 %v946_v53, %v727_v8 }
 0x135   :  { %v1211_v33 = vpop.f32.mrf.mxu0 }
 0x136   :  { %v1208_v34 = vadd.f32 %v1207_v14, %v947_v58  ;;  %810 = vmatmul.f32.gmra.mxu2 %v3497_v45  ;;  %v1390_v20 = vpop.f32.mrf.mxu1 }
 0x137   :  { %1047 = vmatmul.f32.gmra.mxu3 %v5612_v26 }
 0x138   :  { %v3776_v38 = vadd.f32 %v1386_v19, %v1208_v34  ;;  %1274 = vmatmul.f32.gmra.mxu0 %v3480_v28  ;;  %v5613_v34 = vand.u32 4294901760, %v3529_v2 }
 0x139   :  { %v731_v24 = vpop.f32.mrf.mxu2  ;;  %1453 = vmatmul.f32.gmra.mxu1 %v3480_v28  ;;  %v553_v28 = vadd.f32 %v3565_v43, %v3563_v46 }
 0x13a   :  { %v1709_v58 = vmul.f32 %v3772_v18, %v3776_v38  ;;  %v732_v14 = vadd.f32 %v731_v24, %v549_v5  ;;  %v952_v59 = vpop.f32.mrf.mxu3  ;;  %2878 = vrcp.f32 %v3776_v38 }
 0x13c   :  { %v1749_v41 = vmul.f32 0.31830987, %v1709_v58  ;;  %v953_v8 = vadd.f32 %v952_v59, %v732_v14 }
 0x13d   :  { %v1215_v53 = vpop.f32.mrf.mxu0 }
 0x13e   :  { %v1789_v52 = vadd.f32 0.5, %v1749_v41  ;;  %v1212_v31 = vadd.f32 %v1211_v33, %v953_v8  ;;  %815 = vmatmul.f32.gmra.mxu2 %v3529_v2  ;;  %v1394_v0 = vpop.f32.mrf.mxu1 }
 0x13f   :  { %1053 = vmatmul.f32.gmra.mxu3 %v5613_v34  ;;  %v557_v34 = vadd.f32 %v3579_v15, %v3577_v63 }
 0x140   :  { %v1829_v45 = vfloor.f32 %v1789_v52  ;;  %v3785_v19 = vadd.f32 %v1390_v20, %v1212_v31  ;;  %1278 = vmatmul.f32.gmra.mxu0 %v3508_v36 }
 0x141   :  { %v736_v5 = vpop.f32.mrf.mxu2  ;;  %1457 = vmatmul.f32.gmra.mxu1 %v3508_v36 }
 0x142   :  { %v2029_v26 = vmul.f32 0.5, %v1829_v45  ;;  %v1869_v24 = vmul.f32 3.140625, %v1829_v45  ;;  %v3795_v33 = vmul.f32 %v3772_v18, %v3785_v19  ;;  %v737_v52 = vadd.f32 %v736_v5, %v553_v28  ;;  %v958_v20 = vpop.f32.mrf.mxu3 }
 0x143   :  { %v1949_v28 = vmul.f32 0.0009676536, %v1829_v45  ;;  %2880 = vrcp.f32 %v3785_v19 }
 0x144   :  { %v2069_v14 = vfloor.f32 %v2029_v26  ;;  %v1750_v2 = vmul.f32 0.31830987, %v3795_v33  ;;  %v959_v59 = vadd.f32 %v958_v20, %v737_v52  ;;  %v1909_v46 = vsub.f32 %v1709_v58, %v1869_v24 }
 0x145   :  { %v1219_v41 = vpop.f32.mrf.mxu0 }
 0x146   :  { %v2109_v8 = vmul.f32 2.0, %v2069_v14  ;;  %820 = vmatmul.f32.gmra.mxu2 %v3556_v42  ;;  %v1398_v43 = vpop.f32.mrf.mxu1  ;;  %v1790_v31 = vadd.f32 0.5, %v1750_v2  ;;  %v1216_v36 = vadd.f32 %v1215_v53, %v959_v59  ;;  %v1989_v24 = vsub.f32 %v1909_v46, %v1949_v28 }
 0x147   :  { %1059 = vmatmul.f32.gmra.mxu3 %v5614_v54  ;;  %v565_v46 = vadd.f32 %v3599_v60, %v3596_v37  ;;  %v3840_v37 = vadd.f32 %v3632_v32, %v3629_v44 }
 0x148   :  { %v2149_v55 = vsub.f32 %v1829_v45, %v2109_v8  ;;  %1282 = vmatmul.f32.gmra.mxu0 %v3539_v27  ;;  %v1830_v5 = vfloor.f32 %v1790_v31  ;;  %v3804_v26 = vadd.f32 %v1394_v0, %v1216_v36  ;;  %v561_v8 = vadd.f32 %v3588_v7, %v3585_v21 }
 0x149   :  { %v741_v52 = vpop.f32.mrf.mxu2  ;;  %1461 = vmatmul.f32.gmra.mxu1 %v3539_v27  ;;  %v3832_v21 = vadd.f32 %v3610_v47, %v3607_v16  ;;  %v3836_v7 = vadd.f32 %v3621_v23, %v3618_v25  ;;  %v3850_v47 = vadd.f32 %v3643_v48, %v3640_v56  ;;  %v3854_v25 = vadd.f32 %v3654_v62, %v3651_v6 }
 0x14a   :  { %v2189_v20 = vmul.f32 2.0, %v2149_v55  ;;  %v742_v58 = vadd.f32 %v741_v52, %v557_v34  ;;  %v2030_v53 = vmul.f32 0.5, %v1830_v5  ;;  %v964_v14 = vpop.f32.mrf.mxu3  ;;  %v1870_v15 = vmul.f32 3.140625, %v1830_v5 }
 0x14b   :  { %v3809_v63 = vmul.f32 %v3772_v18, %v3804_v26  ;;  %v3865_v6 = vadd.f32 %v3676_v39, %v3673_v50  ;;  %v3878_v50 = vadd.f32 %v3687_v61, %v3684_v12  ;;  %2882 = vrcp.f32 %v3804_v26 }
 0x14c   :  { %v2229_v2 = vsub.f32 1.0, %v2189_v20  ;;  %v965_v42 = vadd.f32 %v964_v14, %v742_v58  ;;  %v2070_v54 = vfloor.f32 %v2030_v53  ;;  %v1910_v34 = vsub.f32 %v3795_v33, %v1870_v15 }
 0x14d   :  { %v1223_v45 = vpop.f32.mrf.mxu0  ;;  %v1751_v27 = vmul.f32 0.31830987, %v3809_v63  ;;  %v3894_v61 = vadd.f32 %v3698_v35, %v3695_v57 }
 0x14e   :  { %v3812_v0 = vmul.f32 %v2229_v2, %v1989_v24  ;;  %v1220_v55 = vadd.f32 %v1219_v41, %v965_v42  ;;  %825 = vmatmul.f32.gmra.mxu2 %v3020_v17  ;;  %v1402_v59 = vpop.f32.mrf.mxu1  ;;  %v2110_v31 = vmul.f32 2.0, %v2070_v54  ;;  %v5615_v41 = vand.u32 4294901760, %v3020_v17 }
 0x14f   :  { %v1791_v28 = vadd.f32 0.5, %v1751_v27 }
 0x150   :  { %v3822_v36 = vmul.f32 %v3812_v0, %v3812_v0  ;;  %v3825_v52 = vadd.f32 %v1398_v43, %v1220_v55  ;;  %1065 = vmatmul.f32.gmra.mxu3 %v5615_v41  ;;  %1286 = vmatmul.f32.gmra.mxu0 %v3004_v9  ;;  %v2150_v60 = vsub.f32 %v1830_v5, %v2110_v31  ;;  %v1950_v43 = vmul.f32 0.0009676536, %v1830_v5 }
 0x151   :  { %v746_v33 = vpop.f32.mrf.mxu2  ;;  %1465 = vmatmul.f32.gmra.mxu1 %v3004_v9  ;;  %v1831_v20 = vfloor.f32 %v1791_v28  ;;  %v3856_v9 = vpop.eup %2878  ;;  %v3860_v5 = vadd.f32 %v3665_v13, %v3662_v29  ;;  %v5616_v31 = vand.u32 4294901760, %v3026_v22 }
 0x152   :  { %v2349_v17 = vmul.f32 -1.0020844e-08, %v3822_v36  ;;  %v3846_v16 = vmul.f32 %v3772_v18, %v3825_v52  ;;  %v2190_v23 = vmul.f32 2.0, %v2150_v60  ;;  %v747_v44 = vadd.f32 %v746_v33, %v561_v8  ;;  %v970_v32 = vpop.f32.mrf.mxu3 }
 0x153   :  { %v1990_v24 = vsub.f32 %v1910_v34, %v1950_v43  ;;  %v2031_v53 = vmul.f32 0.5, %v1831_v20  ;;  %v1871_v2 = vmul.f32 3.140625, %v1831_v20  ;;  %v1585_v13 = vmul.f32 %v3856_v9, %v3776_v38  ;;  %v5617_v34 = vld [vmem:[#allocation2_spill] sm:$0xff] }
 0x154   :  { %v2389_v58 = vadd.f32 1.1022928e-06, %v2349_v17  ;;  %v2230_v14 = vsub.f32 1.0, %v2190_v23  ;;  %v1752_v56 = vmul.f32 0.31830987, %v3846_v16  ;;  %v971_v48 = vadd.f32 %v970_v32, %v747_v44  ;;  %v3902_v44 = vpop.eup %2880 }
 0x155   :  { %v1227_v15 = vpop.f32.mrf.mxu0  ;;  %v2071_v42 = vfloor.f32 %v2031_v53  ;;  %v1911_v28 = vsub.f32 %v3809_v63, %v1871_v2  ;;  %v3899_v17 = vadd.f32 %v3709_v11, %v3706_v40  ;;  %v1625_v43 = vsub.f32 2.0, %v1585_v13  ;;  %v3911_v11 = vpop.eup %2882 }
 0x156   :  { %v2429_v62 = vmul.f32 %v2389_v58, %v3822_v36  ;;  %830 = vmatmul.f32.gmra.mxu2 %v3026_v22  ;;  %v3870_v29 = vpop.f32.mrf.mxu1  ;;  %v3874_v54 = vmul.f32 %v2230_v14, %v1990_v24  ;;  %v1792_v27 = vadd.f32 0.5, %v1752_v56  ;;  %v1224_v55 = vadd.f32 %v1223_v45, %v971_v48  ;;  %v5618_v48 = vld [vmem:[#allocation4_spill] sm:$0xff] }
 0x157   :  { %v2111_v8 = vmul.f32 2.0, %v2071_v42  ;;  %2884 = vrcp.f32 %v3825_v52  ;;  %v3919_v42 = vadd.f32 %v3720_v3, %v3717_v51  ;;  %v3923_v13 = vmul.f32 %v3902_v44, %v3785_v19 }
 0x158   :  { %v2469_v39 = vadd.f32 -7.9365076e-05, %v2429_v62  ;;  %1071 = vmatmul.f32.gmra.mxu3 %v5616_v31  ;;  %1290 = vmatmul.f32.gmra.mxu0 %v5617_v34  ;;  %v3886_v38 = vmul.f32 %v3874_v54, %v3874_v54  ;;  %v1832_v45 = vfloor.f32 %v1792_v27  ;;  %v3889_v41 = vadd.f32 %v1402_v59, %v1224_v55 }
 0x159   :  { %v751_v12 = vpop.f32.mrf.mxu2  ;;  %1469 = vmatmul.f32.gmra.mxu1 %v5617_v34  ;;  %v2151_v60 = vsub.f32 %v1831_v20, %v2111_v8  ;;  %v1951_v59 = vmul.f32 0.0009676536, %v1831_v20  ;;  %v3934_v3 = vmul.f32 %v3911_v11, %v3804_v26 }
 0x15a   :  { %v2509_v22 = vmul.f32 %v2469_v39, %v3822_v36  ;;  %v752_v33 = vadd.f32 %v751_v12, %v565_v46  ;;  %v2350_v63 = vmul.f32 -1.0020844e-08, %v3886_v38  ;;  %v976_v23 = vpop.f32.mrf.mxu3  ;;  %v2032_v57 = vmul.f32 0.5, %v1832_v45  ;;  %v5620_v12 = vld [vmem:[#allocation3_spill] sm:$0xff] }
 0x15b   :  { %v2191_v58 = vmul.f32 2.0, %v2151_v60  ;;  %v1991_v24 = vsub.f32 %v1911_v28, %v1951_v59  ;;  %v1872_v53 = vmul.f32 3.140625, %v1832_v45  ;;  %v3907_v46 = vmul.f32 %v3772_v18, %v3889_v41 }
 0x15c   :  { %v2549_v32 = vadd.f32 0.0033333334, %v2509_v22  ;;  %v2390_v35 = vadd.f32 1.1022928e-06, %v2350_v63  ;;  %v2072_v2 = vfloor.f32 %v2032_v57  ;;  %v977_v56 = vadd.f32 %v976_v23, %v752_v33 }
 0x15d   :  { %v3909_v40 = vpop.f32.mrf.mxu0  ;;  %v2231_v14 = vsub.f32 1.0, %v2191_v58  ;;  %v1753_v55 = vmul.f32 0.31830987, %v3907_v46  ;;  %v5619_v28 = vand.u32 4294901760, %v5618_v48  ;;  %v1912_v19 = vsub.f32 %v3846_v16, %v1872_v53  ;;  %v3938_v33 = vpop.eup %2884 }
 0x15e   :  { %v2589_v20 = vmul.f32 %v2549_v32, %v3822_v36  ;;  %835 = vmatmul.f32.gmra.mxu2 %v5618_v48  ;;  %v3915_v62 = vpop.f32.mrf.mxu1  ;;  %v2430_v27 = vmul.f32 %v2390_v35, %v3886_v38  ;;  %v2112_v31 = vmul.f32 2.0, %v2072_v2  ;;  %v1228_v34 = vadd.f32 %v1227_v15, %v977_v56 }
 0x15f   :  { %v3927_v8 = vmul.f32 %v2231_v14, %v1991_v24  ;;  %v1793_v22 = vadd.f32 0.5, %v1753_v55  ;;  %v1665_v15 = vmul.f32 %v3856_v9, %v1625_v43  ;;  %v1952_v32 = vmul.f32 0.0009676536, %v1832_v45 }
 0x160   :  { %v2629_v39 = vadd.f32 -0.06666667, %v2589_v20  ;;  %1077 = vmatmul.f32.gmra.mxu3 %v5619_v28  ;;  %1294 = vmatmul.f32.gmra.mxu0 %v5620_v12  ;;  %v2470_v51 = vadd.f32 -7.9365076e-05, %v2430_v27  ;;  %v2152_v23 = vsub.f32 %v1832_v45, %v2112_v31  ;;  %v3948_v16 = vadd.f32 %v3870_v29, %v1228_v34  ;;  %v5621_v27 = vld [vmem:[#allocation6_spill] sm:$0xff] }
 0x161   :  { %v756_v60 = vpop.f32.mrf.mxu2  ;;  %1473 = vmatmul.f32.gmra.mxu1 %v5620_v12  ;;  %v3944_v59 = vmul.f32 %v3927_v8, %v3927_v8  ;;  %v1833_v58 = vfloor.f32 %v1793_v22  ;;  %v1626_v24 = vsub.f32 2.0, %v3923_v13  ;;  %v1627_v53 = vsub.f32 2.0, %v3934_v3  ;;  %v5623_v3 = vld [vmem:[#allocation5_spill] sm:$0xff] }
 0x162   :  { %v2669_v63 = vmul.f32 %v2629_v39, %v3822_v36  ;;  %v2510_v26 = vmul.f32 %v2470_v51, %v3886_v38  ;;  %v982_v57 = vpop.f32.mrf.mxu3  ;;  %v2192_v43 = vmul.f32 2.0, %v2152_v23  ;;  %v1992_v20 = vsub.f32 %v1912_v19, %v1952_v32 }
 0x163   :  { %v2351_v9 = vmul.f32 -1.0020844e-08, %v3944_v59  ;;  %v757_v14 = vadd.f32 %v756_v60, %v3832_v21  ;;  %v2033_v29 = vmul.f32 0.5, %v1833_v58  ;;  %v3961_v39 = vmul.f32 %v3938_v33, %v3825_v52 }
 0x164   :  { %v2709_v35 = vadd.f32 0.4, %v2669_v63  ;;  %v2550_v36 = vadd.f32 0.0033333334, %v2510_v26  ;;  %v2232_v48 = vsub.f32 1.0, %v2192_v43  ;;  %v1873_v31 = vmul.f32 3.140625, %v1833_v58 }
 0x165   :  { %v1235_v2 = vpop.f32.mrf.mxu0  ;;  %v2391_v56 = vadd.f32 1.1022928e-06, %v2351_v9  ;;  %v3965_v21 = vmul.f32 %v3772_v18, %v3948_v16  ;;  %v2073_v12 = vfloor.f32 %v2033_v29  ;;  %v5622_v51 = vand.u32 4294901760, %v5621_v27 }
 0x166   :  { %v2749_v45 = vmul.f32 %v2709_v35, %v3812_v0  ;;  %840 = vmatmul.f32.gmra.mxu2 %v5621_v27  ;;  %v3956_v55 = vpop.f32.mrf.mxu1  ;;  %v2590_v13 = vmul.f32 %v2550_v36, %v3886_v38  ;;  %v3968_v28 = vmul.f32 %v2232_v48, %v1992_v20  ;;  %2886 = vrcp.f32 %v3889_v41 }
 0x167   :  { %v2431_v0 = vmul.f32 %v2391_v56, %v3944_v59  ;;  %v1754_v52 = vmul.f32 0.31830987, %v3965_v21  ;;  %v983_v22 = vadd.f32 %v982_v57, %v757_v14  ;;  %v2113_v23 = vmul.f32 2.0, %v2073_v12 }
 0x168   :  { %v2789_v34 = vmul.f32 %v2749_v45, %v1665_v15  ;;  %1083 = vmatmul.f32.gmra.mxu3 %v5622_v51  ;;  %1298 = vmatmul.f32.gmra.mxu0 %v5623_v3  ;;  %v2630_v19 = vadd.f32 -0.06666667, %v2590_v13  ;;  %v3981_v63 = vmul.f32 %v3968_v28, %v3968_v28  ;;  %v1913_v35 = vsub.f32 %v3907_v46, %v1873_v31  ;;  %v5624_v31 = vld [vmem:[#allocation8_spill] sm:$0xff] }
 0x169   :  { %v761_v60 = vpop.f32.mrf.mxu2  ;;  %1477 = vmatmul.f32.gmra.mxu1 %v5623_v3  ;;  %v2471_v15 = vadd.f32 -7.9365076e-05, %v2431_v0  ;;  %v1794_v57 = vadd.f32 0.5, %v1754_v52  ;;  %v1232_v9 = vadd.f32 %v3909_v40, %v983_v22  ;;  %v2153_v14 = vsub.f32 %v1833_v58, %v2113_v23  ;;  %v5626_v22 = vld [vmem:[#allocation7_spill] sm:$0xff] }
 0x16a   :  { %2829 = vst [vmem:[%s5422_s3] sm:$0xff] %v2789_v34  ;;  %v762_v26 = vadd.f32 %v761_v60, %v3836_v7  ;;  %v2670_v32 = vmul.f32 %v2630_v19, %v3886_v38  ;;  %v988_v43 = vpop.f32.mrf.mxu3  ;;  %v2352_v20 = vmul.f32 -1.0020844e-08, %v3981_v63  ;;  %v1953_v48 = vmul.f32 0.0009676536, %v1833_v58 }
 0x16b   :  { %v2511_v36 = vmul.f32 %v2471_v15, %v3944_v59  ;;  %v1834_v29 = vfloor.f32 %v1794_v57  ;;  %v3990_v27 = vadd.f32 %v3915_v62, %v1232_v9  ;;  %v1666_v38 = vmul.f32 %v3902_v44, %v1626_v24 }
 0x16c   :  { %v989_v45 = vadd.f32 %v988_v43, %v762_v26  ;;  %v2710_v56 = vadd.f32 0.4, %v2670_v32  ;;  %v2392_v13 = vadd.f32 1.1022928e-06, %v2352_v20  ;;  %v2193_v40 = vmul.f32 2.0, %v2153_v14  ;;  %v3998_v0 = vpop.eup %2886 }
 0x16d   :  { %v3992_v7 = vpop.f32.mrf.mxu0  ;;  %v2551_v46 = vadd.f32 0.0033333334, %v2511_v36  ;;  %v1667_v58 = vmul.f32 %v3911_v11, %v1627_v53  ;;  %v1993_v51 = vsub.f32 %v1913_v35, %v1953_v48  ;;  %v2034_v24 = vmul.f32 0.5, %v1834_v29 }
 0x16e   :  { %845 = vmatmul.f32.gmra.mxu2 %v5624_v31  ;;  %v3996_v34 = vpop.f32.mrf.mxu1  ;;  %v2750_v12 = vmul.f32 %v2710_v56, %v3874_v54  ;;  %v1236_v62 = vadd.f32 %v1235_v2, %v989_v45  ;;  %v2432_v19 = vmul.f32 %v2392_v13, %v3981_v63  ;;  %v2233_v44 = vsub.f32 1.0, %v2193_v40  ;;  %v5627_v40 = vld [vmem:[#allocation10_spill] sm:$0xff] }
 0x16f   :  { %v2591_v3 = vmul.f32 %v2551_v46, %v3944_v59  ;;  %v5625_v52 = vand.u32 4294901760, %v5624_v31  ;;  %v1628_v15 = vsub.f32 2.0, %v3961_v39  ;;  %v1874_v23 = vmul.f32 3.140625, %v1834_v29 }
 0x170   :  { %1302 = vmatmul.f32.gmra.mxu0 %v5626_v22  ;;  %v2790_v60 = vmul.f32 %v2750_v12, %v1666_v38  ;;  %v4010_v54 = vmul.f32 %v3772_v18, %v3990_v27  ;;  %v2472_v2 = vadd.f32 -7.9365076e-05, %v2432_v19  ;;  %v4013_v26 = vmul.f32 %v2233_v44, %v1993_v51 }
 0x171   :  { %1089 = vmatmul.f32.gmra.mxu3 %v5625_v52  ;;  %v766_v11 = vpop.f32.mrf.mxu2  ;;  %1481 = vmatmul.f32.gmra.mxu1 %v5626_v22  ;;  %v2631_v53 = vadd.f32 -0.06666667, %v2591_v3  ;;  %v2074_v32 = vfloor.f32 %v2034_v24  ;;  %v1589_v39 = vmul.f32 %v3998_v0, %v3889_v41  ;;  %2888 = vrcp.f32 %v3948_v16  ;;  %v5629_v52 = vld [vmem:[#allocation9_spill] sm:$0xff] }
 0x172   :  { %2830 = vst [vmem:[%s5422_s3 + $0x8] sm:$0xff] %v2790_v60  ;;  %v1755_v35 = vmul.f32 0.31830987, %v4010_v54  ;;  %v4023_v57 = vadd.f32 %v3956_v55, %v1236_v62  ;;  %v994_v9 = vpop.f32.mrf.mxu3  ;;  %v2512_v36 = vmul.f32 %v2472_v2, %v3981_v63  ;;  %v4029_v20 = vmul.f32 %v4013_v26, %v4013_v26 }
 0x173   :  { %v2671_v43 = vmul.f32 %v2631_v53, %v3944_v59  ;;  %v2114_v14 = vmul.f32 2.0, %v2074_v32  ;;  %v1914_v45 = vsub.f32 %v3965_v21, %v1874_v23  ;;  %v767_v55 = vadd.f32 %v766_v11, %v3840_v37 }
 0x174   :  { %v1795_v41 = vadd.f32 0.5, %v1755_v35  ;;  %v4034_v56 = vmul.f32 %v3772_v18, %v4023_v57  ;;  %v2552_v59 = vadd.f32 0.0033333334, %v2512_v36  ;;  %v2353_v46 = vmul.f32 -1.0020844e-08, %v4029_v20 }
 0x175   :  { %v4037_v48 = vpop.f32.mrf.mxu0  ;;  %v2711_v38 = vadd.f32 0.4, %v2671_v43  ;;  %v2154_v13 = vsub.f32 %v1834_v29, %v2114_v14  ;;  %v1629_v12 = vsub.f32 2.0, %v1589_v39  ;;  %v1954_v21 = vmul.f32 0.0009676536, %v1834_v29 }
 0x176   :  { %850 = vmatmul.f32.gmra.mxu2 %v5627_v40  ;;  %v4041_v31 = vpop.f32.mrf.mxu1  ;;  %v1835_v51 = vfloor.f32 %v1795_v41  ;;  %v1756_v62 = vmul.f32 0.31830987, %v4034_v56  ;;  %v2592_v37 = vmul.f32 %v2552_v59, %v3981_v63  ;;  %v2393_v19 = vadd.f32 1.1022928e-06, %v2353_v46 }
 0x177   :  { %v2751_v3 = vmul.f32 %v2711_v38, %v3927_v8  ;;  %v2194_v44 = vmul.f32 2.0, %v2154_v13  ;;  %v5628_v24 = vand.u32 4294901760, %v5627_v40  ;;  %v4049_v22 = vpop.eup %2888  ;;  %v1994_v60 = vsub.f32 %v1914_v45, %v1954_v21 }
 0x178   :  { %1306 = vmatmul.f32.gmra.mxu0 %v5629_v52  ;;  %2890 = vrcp.f32 %v3990_v27  ;;  %v2035_v29 = vmul.f32 0.5, %v1835_v51  ;;  %v995_v23 = vadd.f32 %v994_v9, %v767_v55  ;;  %v2632_v53 = vadd.f32 -0.06666667, %v2592_v37 }
 0x179   :  { %1095 = vmatmul.f32.gmra.mxu3 %v5628_v24  ;;  %v771_v11 = vpop.f32.mrf.mxu2  ;;  %1485 = vmatmul.f32.gmra.mxu1 %v5629_v52  ;;  %v2791_v8 = vmul.f32 %v2751_v3, %v1667_v58  ;;  %v2433_v2 = vmul.f32 %v2393_v19, %v4029_v20  ;;  %v2234_v32 = vsub.f32 1.0, %v2194_v44  ;;  %v4056_v39 = vadd.f32 %v3731_v30, %v3728_v1  ;;  %v5632_v44 = vld [vmem:[#allocation11_spill] sm:$0xff] }
 0x17a   :  { %v1875_v35 = vmul.f32 3.140625, %v1835_v51  ;;  %v2075_v43 = vfloor.f32 %v2035_v29  ;;  %v1796_v36 = vadd.f32 0.5, %v1756_v62  ;;  %v1000_v14 = vpop.f32.mrf.mxu3  ;;  %v1668_v9 = vmul.f32 %v3938_v33, %v1628_v15  ;;  %v5630_v15 = vld [vmem:[#allocation12_spill] sm:$0xff] }
 0x17b   :  { %2831 = vst [vmem:[%s5422_s3 + $0x10] sm:$0xff] %v2791_v8  ;;  %v2672_v58 = vmul.f32 %v2632_v53, %v3981_v63  ;;  %v2473_v45 = vadd.f32 -7.9365076e-05, %v2433_v2  ;;  %v4063_v41 = vmul.f32 %v2234_v32, %v1994_v60  ;;  %v4066_v55 = vmul.f32 %v3998_v0, %v1629_v12 }
 0x17c   :  { %v2115_v1 = vmul.f32 2.0, %v2075_v43  ;;  %v1836_v30 = vfloor.f32 %v1796_v36  ;;  %v1240_v38 = vadd.f32 %v3992_v7, %v995_v23  ;;  %v4074_v33 = vmul.f32 %v4049_v22, %v3948_v16 }
 0x17d   :  { %v4069_v59 = vpop.f32.mrf.mxu0  ;;  %v2712_v46 = vadd.f32 0.4, %v2672_v58  ;;  %v2513_v13 = vmul.f32 %v2473_v45, %v4029_v20  ;;  %v4078_v63 = vmul.f32 %v4063_v41, %v4063_v41  ;;  %v1915_v7 = vsub.f32 %v4010_v54, %v1875_v35 }
 0x17e   :  { %855 = vmatmul.f32.gmra.mxu2 %v5630_v15  ;;  %v4081_v0 = vpop.f32.mrf.mxu1  ;;  %v4083_v40 = vpop.eup %2890  ;;  %v2155_v12 = vsub.f32 %v1835_v51, %v2115_v1  ;;  %2892 = vrcp.f32 %v4023_v57  ;;  %v2036_v21 = vmul.f32 0.5, %v1836_v30  ;;  %v1955_v37 = vmul.f32 0.0009676536, %v1835_v51 }
 0x17f   :  { %v2752_v62 = vmul.f32 %v2712_v46, %v3968_v28  ;;  %v2553_v16 = vadd.f32 0.0033333334, %v2513_v13  ;;  %v2354_v3 = vmul.f32 -1.0020844e-08, %v4078_v63  ;;  %v5631_v19 = vand.u32 4294901760, %v5630_v15 }
 0x180   :  { %1310 = vmatmul.f32.gmra.mxu0 %v5632_v44  ;;  %v2195_v24 = vmul.f32 2.0, %v2155_v12  ;;  %v1876_v52 = vmul.f32 3.140625, %v1836_v30  ;;  %v2076_v60 = vfloor.f32 %v2036_v21  ;;  %v4093_v54 = vadd.f32 %v3996_v34, %v1240_v38  ;;  %v5633_v12 = vld [vmem:[#allocation14_spill] sm:$0xff] }
 0x181   :  { %1101 = vmatmul.f32.gmra.mxu3 %v5631_v19  ;;  %v776_v29 = vpop.f32.mrf.mxu2  ;;  %1489 = vmatmul.f32.gmra.mxu1 %v5632_v44  ;;  %v2792_v23 = vmul.f32 %v2752_v62, %v1668_v9  ;;  %v2593_v28 = vmul.f32 %v2553_v16, %v4029_v20  ;;  %v2394_v8 = vadd.f32 1.1022928e-06, %v2354_v3  ;;  %v772_v51 = vadd.f32 %v771_v11, %v3850_v47  ;;  %v5635_v19 = vld [vmem:[#allocation13_spill] sm:$0xff] }
 0x182   :  { %v4100_v53 = vmul.f32 %v4083_v40, %v3990_v27  ;;  %v1995_v2 = vsub.f32 %v1915_v7, %v1955_v37  ;;  %v2235_v32 = vsub.f32 1.0, %v2195_v24  ;;  %v2116_v35 = vmul.f32 2.0, %v2076_v60  ;;  %v1006_v43 = vpop.f32.mrf.mxu3 }
 0x183   :  { %2832 = vst [vmem:[%s5422_s3 + $0x18] sm:$0xff] %v2792_v23  ;;  %v2633_v34 = vadd.f32 -0.06666667, %v2593_v28  ;;  %v2434_v36 = vmul.f32 %v2394_v8, %v4078_v63  ;;  %v4108_v9 = vmul.f32 %v3772_v18, %v4093_v54  ;;  %v1001_v47 = vadd.f32 %v1000_v14, %v772_v51 }
 0x184   :  { %v4110_v11 = vpop.eup %2892  ;;  %v4112_v27 = vmul.f32 %v2235_v32, %v1995_v2  ;;  %v1916_v58 = vsub.f32 %v4034_v56, %v1876_v52  ;;  %v2156_v45 = vsub.f32 %v1836_v30, %v2116_v35  ;;  %v777_v1 = vadd.f32 %v776_v29, %v3854_v25 }
 0x185   :  { %v4116_v38 = vpop.f32.mrf.mxu0  ;;  %v2673_v46 = vmul.f32 %v2633_v34, %v4029_v20  ;;  %v2474_v13 = vadd.f32 -7.9365076e-05, %v2434_v36  ;;  %v1757_v15 = vmul.f32 0.31830987, %v4108_v9  ;;  %v1244_v7 = vadd.f32 %v4037_v48, %v1001_v47 }
 0x186   :  { %860 = vmatmul.f32.gmra.mxu2 %v5633_v12  ;;  %v4122_v14 = vpop.f32.mrf.mxu1  ;;  %v4126_v21 = vmul.f32 %v4112_v27, %v4112_v27  ;;  %v1956_v56 = vmul.f32 0.0009676536, %v1836_v30  ;;  %v2196_v62 = vmul.f32 2.0, %v2156_v45  ;;  %v1007_v25 = vadd.f32 %v1006_v43, %v777_v1  ;;  %v5636_v45 = vld [vmem:[#allocation16_spill] sm:$0xff] }
 0x187   :  { %v2713_v16 = vadd.f32 0.4, %v2673_v46  ;;  %v2514_v3 = vmul.f32 %v2474_v13, %v4078_v63  ;;  %v1797_v20 = vadd.f32 0.5, %v1757_v15  ;;  %v4130_v37 = vadd.f32 %v4041_v31, %v1244_v7 }
 0x188   :  { %v5634_v48 = vand.u32 4294901760, %v5633_v12  ;;  %1314 = vmatmul.f32.gmra.mxu0 %v5635_v19  ;;  %v1630_v44 = vsub.f32 2.0, %v4074_v33  ;;  %v2355_v24 = vmul.f32 -1.0020844e-08, %v4126_v21  ;;  %v1996_v52 = vsub.f32 %v1916_v58, %v1956_v56 }
 0x189   :  { %v2236_v30 = vsub.f32 1.0, %v2196_v62  ;;  %v781_v60 = vpop.f32.mrf.mxu2  ;;  %1493 = vmatmul.f32.gmra.mxu1 %v5635_v19  ;;  %v2753_v29 = vmul.f32 %v2713_v16, %v4013_v26  ;;  %v2554_v23 = vadd.f32 0.0033333334, %v2514_v3  ;;  %2894 = vrcp.f32 %v4093_v54  ;;  %v5638_v16 = vld [vmem:[#allocation15_spill] sm:$0xff] }
 0x18a   :  { %1107 = vmatmul.f32.gmra.mxu3 %v5634_v48  ;;  %v1837_v31 = vfloor.f32 %v1797_v20  ;;  %v2395_v28 = vadd.f32 1.1022928e-06, %v2355_v24  ;;  %v4144_v51 = vmul.f32 %v3772_v18, %v4130_v37  ;;  %v1248_v33 = vadd.f32 %v4069_v59, %v1007_v25  ;;  %v1012_v2 = vpop.f32.mrf.mxu3 }
 0x18b   :  { %v4140_v8 = vmul.f32 %v2236_v30, %v1996_v52  ;;  %v4149_v32 = vadd.f32 %v3742_v10, %v3739_v49  ;;  %v2793_v26 = vmul.f32 %v2753_v29, %v4066_v55  ;;  %v2594_v35 = vmul.f32 %v2554_v23, %v4078_v63 }
 0x18c   :  { %v1631_v43 = vsub.f32 2.0, %v4100_v53  ;;  %v2435_v34 = vmul.f32 %v2395_v28, %v4126_v21  ;;  %v1592_v36 = vmul.f32 %v4110_v11, %v4023_v57  ;;  %v2037_v59 = vmul.f32 0.5, %v1837_v31 }
 0x18d   :  { %v4159_v47 = vmul.f32 %v4140_v8, %v4140_v8  ;;  %v4161_v58 = vpop.f32.mrf.mxu0  ;;  %2833 = vst [vmem:[%s5422_s3 + $0x20] sm:$0xff] %v2793_v26  ;;  %v1670_v49 = vmul.f32 %v4049_v22, %v1630_v44  ;;  %v2634_v10 = vadd.f32 -0.06666667, %v2594_v35  ;;  %v1877_v55 = vmul.f32 3.140625, %v1837_v31 }
 0x18e   :  { %v1758_v53 = vmul.f32 0.31830987, %v4144_v51  ;;  %865 = vmatmul.f32.gmra.mxu2 %v5636_v45  ;;  %v4169_v57 = vpop.f32.mrf.mxu1  ;;  %v2475_v1 = vadd.f32 -7.9365076e-05, %v2435_v34  ;;  %v2077_v13 = vfloor.f32 %v2037_v59  ;;  %v4173_v15 = vadd.f32 %v4081_v0, %v1248_v33 }
 0x18f   :  { %v2356_v46 = vmul.f32 -1.0020844e-08, %v4159_v47  ;;  %v4175_v7 = vpop.eup %2894  ;;  %v2674_v12 = vmul.f32 %v2634_v10, %v4078_v63  ;;  %v4179_v22 = vmul.f32 %v4083_v40, %v1631_v43  ;;  %v782_v62 = vadd.f32 %v781_v60, %v3860_v5 }
 0x190   :  { %v1798_v56 = vadd.f32 0.5, %v1758_v53  ;;  %v5637_v25 = vand.u32 4294901760, %v5636_v45  ;;  %1318 = vmatmul.f32.gmra.mxu0 %v5638_v16  ;;  %v2515_v3 = vmul.f32 %v2475_v1, %v4126_v21  ;;  %v1632_v20 = vsub.f32 2.0, %v1592_v36 }
 0x191   :  { %v2396_v0 = vadd.f32 1.1022928e-06, %v2356_v46  ;;  %v2117_v48 = vmul.f32 2.0, %v2077_v13  ;;  %v786_v19 = vpop.f32.mrf.mxu2  ;;  %1497 = vmatmul.f32.gmra.mxu1 %v5638_v16  ;;  %v2714_v63 = vadd.f32 0.4, %v2674_v12  ;;  %v1917_v40 = vsub.f32 %v4108_v9, %v1877_v55  ;;  %v5639_v55 = vld [vmem:[#allocation18_spill] sm:$0xff] }
 0x192   :  { %1113 = vmatmul.f32.gmra.mxu3 %v5637_v25  ;;  %v1838_v44 = vfloor.f32 %v1798_v56  ;;  %v4190_v5 = vmul.f32 %v3772_v18, %v4173_v15  ;;  %v2555_v24 = vadd.f32 0.0033333334, %v2515_v3  ;;  %v4195_v30 = vmul.f32 %v4175_v7, %v4093_v54  ;;  %v4197_v29 = vpop.f32.mrf.mxu3 }
 0x193   :  { %v2436_v52 = vmul.f32 %v2396_v0, %v4159_v47  ;;  %v2157_v60 = vsub.f32 %v1837_v31, %v2117_v48  ;;  %v2754_v23 = vmul.f32 %v2714_v63, %v4063_v41  ;;  %v1957_v28 = vmul.f32 0.0009676536, %v1837_v31  ;;  %v5641_v0 = vld [vmem:[#allocation17_spill] sm:$0xff] }
 0x194   :  { %2896 = vrcp.f32 %v4130_v37  ;;  %v1013_v9 = vadd.f32 %v1012_v2, %v782_v62  ;;  %v2595_v33 = vmul.f32 %v2555_v24, %v4126_v21  ;;  %v2038_v43 = vmul.f32 0.5, %v1838_v44 }
 0x195   :  { %v2476_v26 = vadd.f32 -7.9365076e-05, %v2436_v52  ;;  %v2197_v35 = vmul.f32 2.0, %v2157_v60  ;;  %v4202_v34 = vpop.f32.mrf.mxu0  ;;  %v2794_v36 = vmul.f32 %v2754_v23, %v1670_v49  ;;  %v1997_v59 = vsub.f32 %v1917_v40, %v1957_v28 }
 0x196   :  { %v1878_v54 = vmul.f32 3.140625, %v1838_v44  ;;  %v1759_v10 = vmul.f32 0.31830987, %v4190_v5  ;;  %870 = vmatmul.f32.gmra.mxu2 %v5639_v55  ;;  %v4206_v53 = vpop.f32.mrf.mxu1  ;;  %v2635_v41 = vadd.f32 -0.06666667, %v2595_v33  ;;  %v2078_v45 = vfloor.f32 %v2038_v43 }
 0x197   :  { %v2516_v31 = vmul.f32 %v2476_v26, %v4159_v47  ;;  %v2237_v2 = vsub.f32 1.0, %v2197_v35  ;;  %2834 = vst [vmem:[%s5422_s3 + $0x28] sm:$0xff] %v2794_v36  ;;  %v4213_v1 = vmul.f32 %v4110_v11, %v1632_v20  ;;  %v1633_v49 = vsub.f32 2.0, %v4195_v30 }
 0x198   :  { %v1799_v46 = vadd.f32 0.5, %v1759_v10  ;;  %v1252_v13 = vadd.f32 %v4116_v38, %v1013_v9  ;;  %v5640_v12 = vand.u32 4294901760, %v5639_v55  ;;  %v2675_v56 = vmul.f32 %v2635_v41, %v4126_v21  ;;  %1322 = vmatmul.f32.gmra.mxu0 %v5641_v0 }
 0x199   :  { %v2556_v62 = vadd.f32 0.0033333334, %v2516_v31  ;;  %v4220_v25 = vmul.f32 %v2237_v2, %v1997_v59  ;;  %v2118_v16 = vmul.f32 2.0, %v2078_v45  ;;  %v791_v3 = vpop.f32.mrf.mxu2  ;;  %1501 = vmatmul.f32.gmra.mxu1 %v5641_v0  ;;  %v1918_v20 = vsub.f32 %v4144_v51, %v1878_v54  ;;  %v5642_v54 = vld [vmem:[#allocation20_spill] sm:$0xff] }
 0x19a   :  { %1119 = vmatmul.f32.gmra.mxu3 %v5640_v12  ;;  %v4224_v11 = vpop.eup %2896  ;;  %2898 = vrcp.f32 %v4173_v15  ;;  %v1839_v38 = vfloor.f32 %v1799_v46  ;;  %v4229_v48 = vadd.f32 %v4122_v14, %v1252_v13  ;;  %v2715_v21 = vadd.f32 0.4, %v2675_v56  ;;  %v1024_v52 = vpop.f32.mrf.mxu3  ;;  %v5644_v12 = vld [vmem:[#allocation19_spill] sm:$0xff] }
 0x19b   :  { %v2596_v63 = vmul.f32 %v2556_v62, %v4159_v47  ;;  %v4234_v40 = vmul.f32 %v4220_v25, %v4220_v25  ;;  %v2158_v24 = vsub.f32 %v1838_v44, %v2118_v16  ;;  %v1958_v60 = vmul.f32 0.0009676536, %v1838_v44 }
 0x19c   :  { %v1879_v23 = vmul.f32 3.140625, %v1839_v38  ;;  %v2039_v28 = vmul.f32 0.5, %v1839_v38  ;;  %v787_v51 = vadd.f32 %v786_v19, %v3865_v6  ;;  %v2755_v9 = vmul.f32 %v2715_v21, %v4112_v27 }
 0x19d   :  { %v2636_v33 = vadd.f32 -0.06666667, %v2596_v63  ;;  %v2357_v14 = vmul.f32 -1.0020844e-08, %v4234_v40  ;;  %v2198_v26 = vmul.f32 2.0, %v2158_v24  ;;  %v4239_v35 = vpop.f32.mrf.mxu0  ;;  %v4243_v43 = vmul.f32 %v4224_v11, %v4130_v37 }
 0x19e   :  { %v1998_v36 = vsub.f32 %v1918_v20, %v1958_v60  ;;  %v2079_v59 = vfloor.f32 %v2039_v28  ;;  %v4247_v44 = vmul.f32 %v3772_v18, %v4229_v48  ;;  %875 = vmatmul.f32.gmra.mxu2 %v5642_v54  ;;  %v4250_v6 = vpop.f32.mrf.mxu1  ;;  %v2795_v27 = vmul.f32 %v2755_v9, %v4179_v22 }
 0x19f   :  { %v2676_v19 = vmul.f32 %v2636_v33, %v4159_v47  ;;  %v2397_v10 = vadd.f32 1.1022928e-06, %v2357_v14  ;;  %v2238_v55 = vsub.f32 1.0, %v2198_v26  ;;  %v1919_v37 = vsub.f32 %v4190_v5, %v1879_v23 }
 0x1a0   :  { %v4254_v41 = vpop.eup %2898  ;;  %v2119_v31 = vmul.f32 2.0, %v2079_v59  ;;  %v1760_v2 = vmul.f32 0.31830987, %v4247_v44  ;;  %v1019_v18 = vadd.f32 %v4197_v29, %v787_v51  ;;  %v5643_v45 = vand.u32 4294901760, %v5642_v54  ;;  %2835 = vst [vmem:[%s5422_s3 + $0x30] sm:$0xff] %v2795_v27  ;;  %1326 = vmatmul.f32.gmra.mxu0 %v5644_v12 }
 0x1a1   :  { %v2716_v22 = vadd.f32 0.4, %v2676_v19  ;;  %v2437_v47 = vmul.f32 %v2397_v10, %v4234_v40  ;;  %v4265_v46 = vmul.f32 %v2238_v55, %v1998_v36  ;;  %v792_v13 = vadd.f32 %v791_v3, %v3878_v50  ;;  %v796_v5 = vpop.f32.mrf.mxu2  ;;  %1505 = vmatmul.f32.gmra.mxu1 %v5644_v12  ;;  %v4308_v10 = vld [vmem:[%s5421_s0] ss:$0 sm:$0xff] }
 0x1a2   :  { %1125 = vmatmul.f32.gmra.mxu3 %v5643_v45  ;;  %v2159_v56 = vsub.f32 %v1839_v38, %v2119_v31  ;;  %2900 = vrcp.f32 %v4229_v48  ;;  %v1800_v29 = vadd.f32 0.5, %v1760_v2  ;;  %v1256_v62 = vadd.f32 %v4161_v58, %v1019_v18  ;;  %v1030_v3 = vpop.f32.mrf.mxu3 }
 0x1a3   :  { %v2756_v16 = vmul.f32 %v2716_v22, %v4140_v8  ;;  %v2477_v0 = vadd.f32 -7.9365076e-05, %v2437_v47  ;;  %v4275_v20 = vmul.f32 %v4265_v46, %v4265_v46  ;;  %v4279_v50 = vmul.f32 %v4254_v41, %v4173_v15  ;;  %v5648_v22 = vld [vmem:[#allocation21_spill] sm:$0xff] }
 0x1a4   :  { %v1959_v21 = vmul.f32 0.0009676536, %v1839_v38  ;;  %v2199_v63 = vmul.f32 2.0, %v2159_v56  ;;  %v1840_v24 = vfloor.f32 %v1800_v29  ;;  %v4282_v60 = vadd.f32 %v4169_v57, %v1256_v62  ;;  %v5645_v38 = vld [vmem:[#allocation22_spill] sm:$0xff] }
 0x1a5   :  { %v2796_v58 = vmul.f32 %v2756_v16, %v4213_v1  ;;  %v2517_v8 = vmul.f32 %v2477_v0, %v4234_v40  ;;  %v2358_v23 = vmul.f32 -1.0020844e-08, %v4275_v20  ;;  %v1025_v28 = vadd.f32 %v1024_v52, %v792_v13  ;;  %v4287_v51 = vpop.f32.mrf.mxu0  ;;  %v5646_v57 = vld [vmem:[#allocation58_spill] sm:$0xff] }
 0x1a6   :  { %v1999_v9 = vsub.f32 %v1919_v37, %v1959_v21  ;;  %v2239_v33 = vsub.f32 1.0, %v2199_v63  ;;  %v2040_v15 = vmul.f32 0.5, %v1840_v24  ;;  %v797_v14 = vadd.f32 %v796_v5, %v3894_v61  ;;  %880 = vmatmul.f32.gmra.mxu2 %v5645_v38  ;;  %v4291_v26 = vpop.f32.mrf.mxu1 }
 0x1a7   :  { %v4295_v36 = vadd.f32 %v5646_v57, %v3750_v4  ;;  %2836 = vst [vmem:[%s5422_s3 + $0x38] sm:$0xff] %v2796_v58  ;;  %v2557_v1 = vadd.f32 0.0033333334, %v2517_v8  ;;  %v1634_v52 = vsub.f32 2.0, %v4243_v43  ;;  %v2398_v59 = vadd.f32 1.1022928e-06, %v2358_v23 }
 0x1a8   :  { %v4301_v54 = vpop.eup %2900  ;;  %v4303_v27 = vmul.f32 %v2239_v33, %v1999_v9  ;;  %v1880_v61 = vmul.f32 3.140625, %v1840_v24  ;;  %v2080_v19 = vfloor.f32 %v2040_v15  ;;  %v4312_v4 = vmul.f32 %v4308_v10, %v4282_v60  ;;  %1330 = vmatmul.f32.gmra.mxu0 %v5648_v22  ;;  %v5649_v15 = vld [vmem:[#allocation24_spill] sm:$0xff] }
 0x1a9   :  { %v5647_v55 = vand.u32 4294901760, %v5645_v38  ;;  %v2597_v37 = vmul.f32 %v2557_v1, %v4234_v40  ;;  %v2438_v31 = vmul.f32 %v2398_v59, %v4275_v20  ;;  %v1635_v2 = vsub.f32 2.0, %v4279_v50  ;;  %v4320_v45 = vpop.f32.mrf.mxu2  ;;  %1509 = vmatmul.f32.gmra.mxu1 %v5648_v22 }
 0x1aa   :  { %v1260_v18 = vadd.f32 %v4202_v34, %v1025_v28  ;;  %v4325_v47 = vmul.f32 %v4303_v27, %v4303_v27  ;;  %v2120_v13 = vmul.f32 2.0, %v2080_v19  ;;  %v1761_v5 = vmul.f32 0.31830987, %v4312_v4  ;;  %v4334_v16 = vpop.f32.mrf.mxu3 }
 0x1ab   :  { %1131 = vmatmul.f32.gmra.mxu3 %v5647_v55  ;;  %v1031_v12 = vadd.f32 %v1030_v3, %v797_v14  ;;  %v2637_v56 = vadd.f32 -0.06666667, %v2597_v37  ;;  %v2478_v29 = vadd.f32 -7.9365076e-05, %v2438_v31  ;;  %v1596_v62 = vmul.f32 %v4301_v54, %v4229_v48 }
 0x1ac   :  { %v4332_v34 = vadd.f32 %v4206_v53, %v1260_v18  ;;  %v2359_v0 = vmul.f32 -1.0020844e-08, %v4325_v47  ;;  %v1920_v50 = vsub.f32 %v4247_v44, %v1880_v61  ;;  %v2160_v21 = vsub.f32 %v1840_v24, %v2120_v13 }
 0x1ad   :  { %v1801_v63 = vadd.f32 0.5, %v1761_v5  ;;  %v2677_v3 = vmul.f32 %v2637_v56, %v4234_v40  ;;  %v2518_v58 = vmul.f32 %v2478_v29, %v4275_v20  ;;  %v1960_v8 = vmul.f32 0.0009676536, %v1840_v24  ;;  %v4344_v48 = vpop.f32.mrf.mxu0 }
 0x1ae   :  { %v4342_v23 = vmul.f32 %v4308_v10, %v4332_v34  ;;  %v2399_v53 = vadd.f32 1.1022928e-06, %v2359_v0  ;;  %v2200_v28 = vmul.f32 2.0, %v2160_v21  ;;  %v1264_v33 = vadd.f32 %v4239_v35, %v1031_v12  ;;  %885 = vmatmul.f32.gmra.mxu2 %v5649_v15  ;;  %v4348_v44 = vpop.f32.mrf.mxu1 }
 0x1af   :  { %v1841_v9 = vfloor.f32 %v1801_v63  ;;  %v1673_v40 = vmul.f32 %v4175_v7, %v1633_v49  ;;  %v2717_v24 = vadd.f32 0.4, %v2677_v3  ;;  %v2558_v14 = vadd.f32 0.0033333334, %v2518_v58  ;;  %v5651_v49 = vld [vmem:[#allocation23_spill] sm:$0xff]  ;;  %v5652_v58 = vld [vmem:[#allocation26_spill] sm:$0xff] }
 0x1b0   :  { %v1762_v38 = vmul.f32 0.31830987, %v4342_v23  ;;  %v2439_v57 = vmul.f32 %v2399_v53, %v4325_v47  ;;  %v1636_v1 = vsub.f32 2.0, %v1596_v62  ;;  %v2000_v59 = vsub.f32 %v1920_v50, %v1960_v8  ;;  %1334 = vmatmul.f32.gmra.mxu0 %v5651_v49 }
 0x1b1   :  { %v2240_v61 = vsub.f32 1.0, %v2200_v28  ;;  %v5650_v19 = vand.u32 4294901760, %v5649_v15  ;;  %v2757_v35 = vmul.f32 %v2717_v24, %v4220_v25  ;;  %v2598_v55 = vmul.f32 %v2558_v14, %v4275_v20  ;;  %v4360_v7 = vpop.f32.mrf.mxu2  ;;  %1513 = vmatmul.f32.gmra.mxu1 %v5651_v49 }
 0x1b2   :  { %2902 = vrcp.f32 %v4282_v60  ;;  %v2041_v30 = vmul.f32 0.5, %v1841_v9  ;;  %v2479_v37 = vadd.f32 -7.9365076e-05, %v2439_v57  ;;  %v1881_v18 = vmul.f32 3.140625, %v1841_v9  ;;  %v4369_v56 = vpop.f32.mrf.mxu3 }
 0x1b3   :  { %1137 = vmatmul.f32.gmra.mxu3 %v5650_v19  ;;  %v4363_v31 = vmul.f32 %v2240_v61, %v2000_v59  ;;  %v4366_v22 = vadd.f32 %v4250_v6, %v1264_v33  ;;  %v2797_v13 = vmul.f32 %v2757_v35, %v1673_v40  ;;  %v2638_v25 = vadd.f32 -0.06666667, %v2598_v55 }
 0x1b4   :  { %v2081_v5 = vfloor.f32 %v2041_v30  ;;  %v1802_v12 = vadd.f32 0.5, %v1762_v38  ;;  %v1674_v29 = vmul.f32 %v4224_v11, %v1634_v52  ;;  %v4375_v62 = vmul.f32 %v4254_v41, %v1635_v2 }
 0x1b5   :  { %v2519_v0 = vmul.f32 %v2479_v37, %v4325_v47  ;;  %v4380_v6 = vmul.f32 %v4363_v31, %v4363_v31  ;;  %2837 = vst [vmem:[%s5422_s3 + $0x40] sm:$0xff] %v2797_v13  ;;  %v2678_v50 = vmul.f32 %v2638_v25, %v4275_v20  ;;  %v4387_v21 = vmul.f32 %v4301_v54, %v1636_v1  ;;  %v4389_v52 = vpop.f32.mrf.mxu0  ;;  %v5654_v1 = vld [vmem:[#allocation25_spill] sm:$0xff] }
 0x1b6   :  { %v2121_v43 = vmul.f32 2.0, %v2081_v5  ;;  %v1842_v11 = vfloor.f32 %v1802_v12  ;;  %v4394_v63 = vmul.f32 %v4308_v10, %v4366_v22  ;;  %v802_v3 = vadd.f32 %v4320_v45, %v3899_v17  ;;  %890 = vmatmul.f32.gmra.mxu2 %v5652_v58  ;;  %v4403_v28 = vpop.f32.mrf.mxu1 }
 0x1b7   :  { %v2559_v41 = vadd.f32 0.0033333334, %v2519_v0  ;;  %v2360_v2 = vmul.f32 -1.0020844e-08, %v4380_v6  ;;  %v2718_v54 = vadd.f32 0.4, %v2678_v50  ;;  %v1921_v8 = vsub.f32 %v4312_v4, %v1881_v18 }
 0x1b8   :  { %v4399_v20 = vpop.eup %2902  ;;  %v2161_v53 = vsub.f32 %v1841_v9, %v2121_v43  ;;  %2904 = vrcp.f32 %v4332_v34  ;;  %v1961_v40 = vmul.f32 0.0009676536, %v1841_v9  ;;  %v2042_v24 = vmul.f32 0.5, %v1842_v11  ;;  %1338 = vmatmul.f32.gmra.mxu0 %v5654_v1 }
 0x1b9   :  { %v2599_v33 = vmul.f32 %v2559_v41, %v4325_v47  ;;  %v2400_v15 = vadd.f32 1.1022928e-06, %v2360_v2  ;;  %v5653_v14 = vand.u32 4294901760, %v5652_v58  ;;  %v2758_v17 = vmul.f32 %v2718_v54, %v4265_v46  ;;  %v811_v4 = vpop.f32.mrf.mxu2  ;;  %1517 = vmatmul.f32.gmra.mxu1 %v5654_v1  ;;  %v5655_v41 = vld [vmem:[#allocation28_spill] sm:$0xff] }
 0x1ba   :  { %v2201_v45 = vmul.f32 2.0, %v2161_v53  ;;  %v1882_v38 = vmul.f32 3.140625, %v1842_v11  ;;  %v1763_v57 = vmul.f32 0.31830987, %v4394_v63  ;;  %v2082_v19 = vfloor.f32 %v2042_v24  ;;  %v4414_v46 = vpop.f32.mrf.mxu3 }
 0x1bb   :  { %1143 = vmatmul.f32.gmra.mxu3 %v5653_v14  ;;  %v2639_v59 = vadd.f32 -0.06666667, %v2599_v33  ;;  %v2440_v61 = vmul.f32 %v2400_v15, %v4380_v6  ;;  %v1037_v35 = vadd.f32 %v4334_v16, %v802_v3  ;;  %v2798_v9 = vmul.f32 %v2758_v17, %v1674_v29  ;;  %v5657_v14 = vld [vmem:[#allocation27_spill] sm:$0xff] }
 0x1bc   :  { %v2001_v55 = vsub.f32 %v1921_v8, %v1961_v40  ;;  %v2241_v30 = vsub.f32 1.0, %v2201_v45  ;;  %v1803_v49 = vadd.f32 0.5, %v1763_v57  ;;  %v4419_v13 = vmul.f32 %v4399_v20, %v4282_v60 }
 0x1bd   :  { %v2679_v37 = vmul.f32 %v2639_v59, %v4325_v47  ;;  %v2480_v18 = vadd.f32 -7.9365076e-05, %v2440_v61  ;;  %v2122_v25 = vmul.f32 2.0, %v2082_v19  ;;  %2838 = vst [vmem:[%s5422_s3 + $0x48] sm:$0xff] %v2798_v9  ;;  %v1922_v12 = vsub.f32 %v4342_v23, %v1882_v38  ;;  %v4438_v23 = vpop.f32.mrf.mxu0 }
 0x1be   :  { %v4421_v5 = vpop.eup %2904  ;;  %v4426_v16 = vmul.f32 %v2241_v30, %v2001_v55  ;;  %v1843_v29 = vfloor.f32 %v1803_v49  ;;  %v1268_v0 = vadd.f32 %v4287_v51, %v1037_v35  ;;  %v807_v60 = vadd.f32 %v4360_v7, %v3919_v42  ;;  %895 = vmatmul.f32.gmra.mxu2 %v5655_v41  ;;  %v4448_v24 = vpop.f32.mrf.mxu1 }
 0x1bf   :  { %v2719_v47 = vadd.f32 0.4, %v2679_v37  ;;  %v2520_v50 = vmul.f32 %v2480_v18, %v4380_v6  ;;  %v2162_v43 = vsub.f32 %v1842_v11, %v2122_v25  ;;  %v1962_v3 = vmul.f32 0.0009676536, %v1842_v11 }
 0x1c0   :  { %v4436_v2 = vmul.f32 %v4426_v16, %v4426_v16  ;;  %v1883_v58 = vmul.f32 3.140625, %v1843_v29  ;;  %v2043_v54 = vmul.f32 0.5, %v1843_v29  ;;  %2906 = vrcp.f32 %v4366_v22  ;;  %1342 = vmatmul.f32.gmra.mxu0 %v5657_v14 }
 0x1c1   :  { %v2759_v51 = vmul.f32 %v2719_v47, %v4303_v27  ;;  %v2560_v8 = vadd.f32 0.0033333334, %v2520_v50  ;;  %v2202_v53 = vmul.f32 2.0, %v2162_v43  ;;  %v5656_v33 = vand.u32 4294901760, %v5655_v41  ;;  %v816_v11 = vpop.f32.mrf.mxu2  ;;  %1521 = vmatmul.f32.gmra.mxu1 %v5657_v14 }
 0x1c2   :  { %v2361_v42 = vmul.f32 -1.0020844e-08, %v4436_v2  ;;  %v2002_v7 = vsub.f32 %v1922_v12, %v1962_v3  ;;  %v2083_v15 = vfloor.f32 %v2043_v54  ;;  %v4446_v40 = vadd.f32 %v4291_v26, %v1268_v0  ;;  %v4458_v61 = vpop.f32.mrf.mxu3 }
 0x1c3   :  { %1149 = vmatmul.f32.gmra.mxu3 %v5656_v33  ;;  %v2799_v27 = vmul.f32 %v2759_v51, %v4375_v62  ;;  %v2600_v17 = vmul.f32 %v2560_v8, %v4380_v6  ;;  %v2242_v45 = vsub.f32 1.0, %v2202_v53  ;;  %v1043_v38 = vadd.f32 %v4369_v56, %v807_v60 }
 0x1c4   :  { %v2401_v57 = vadd.f32 1.1022928e-06, %v2361_v42  ;;  %v1598_v1 = vmul.f32 %v4421_v5, %v4332_v34  ;;  %v1923_v26 = vsub.f32 %v4394_v63, %v1883_v58  ;;  %v2123_v59 = vmul.f32 2.0, %v2083_v15  ;;  %v5660_v58 = vld [vmem:[#allocation29_spill] sm:$0xff] }
 0x1c5   :  { %2839 = vst [vmem:[%s5422_s3 + $0x50] sm:$0xff] %v2799_v27  ;;  %v2640_v62 = vadd.f32 -0.06666667, %v2600_v17  ;;  %v4463_v19 = vmul.f32 %v2242_v45, %v2002_v7  ;;  %v4467_v56 = vmul.f32 %v4308_v10, %v4446_v40  ;;  %v1272_v35 = vadd.f32 %v4344_v48, %v1043_v38  ;;  %v5658_v48 = vld [vmem:[#allocation30_spill] sm:$0xff]  ;;  %v4497_v3 = vpop.f32.mrf.mxu0 }
 0x1c6   :  { %v2441_v34 = vmul.f32 %v2401_v57, %v4436_v2  ;;  %v1963_v9 = vmul.f32 0.0009676536, %v1843_v29  ;;  %v2163_v63 = vsub.f32 %v1843_v29, %v2123_v59  ;;  %v812_v55 = vadd.f32 %v811_v4, %v4056_v39  ;;  %v4472_v30 = vpop.eup %2906  ;;  %900 = vmatmul.f32.gmra.mxu2 %v5658_v48  ;;  %v4511_v14 = vpop.f32.mrf.mxu1 }
 0x1c7   :  { %v2680_v49 = vmul.f32 %v2640_v62, %v4380_v6  ;;  %v4477_v37 = vmul.f32 %v4463_v19, %v4463_v19  ;;  %v1764_v18 = vmul.f32 0.31830987, %v4467_v56  ;;  %v4481_v25 = vadd.f32 %v4348_v44, %v1272_v35 }
 0x1c8   :  { %v1637_v12 = vsub.f32 2.0, %v4419_v13  ;;  %v2481_v29 = vadd.f32 -7.9365076e-05, %v2441_v34  ;;  %v2003_v0 = vsub.f32 %v1923_v26, %v1963_v9  ;;  %v2203_v39 = vmul.f32 2.0, %v2163_v63  ;;  %1346 = vmatmul.f32.gmra.mxu0 %v5660_v58 }
 0x1c9   :  { %v2720_v4 = vadd.f32 0.4, %v2680_v49  ;;  %v2362_v47 = vmul.f32 -1.0020844e-08, %v4477_v37  ;;  %v1804_v6 = vadd.f32 0.5, %v1764_v18  ;;  %v1049_v50 = vadd.f32 %v4414_v46, %v812_v55  ;;  %v4495_v41 = vpop.f32.mrf.mxu2  ;;  %1525 = vmatmul.f32.gmra.mxu1 %v5660_v58 }
 0x1ca   :  { %v5659_v43 = vand.u32 4294901760, %v5658_v48  ;;  %v2521_v60 = vmul.f32 %v2481_v29, %v4436_v2  ;;  %v2243_v44 = vsub.f32 1.0, %v2203_v39  ;;  %2908 = vrcp.f32 %v4446_v40  ;;  %v4509_v15 = vpop.f32.mrf.mxu3 }
 0x1cb   :  { %v4493_v13 = vmul.f32 %v4308_v10, %v4481_v25  ;;  %v2760_v46 = vmul.f32 %v2720_v4, %v4363_v31  ;;  %v1638_v54 = vsub.f32 2.0, %v1598_v1  ;;  %v2402_v51 = vadd.f32 1.1022928e-06, %v2362_v47 }
 0x1cc   :  { %1155 = vmatmul.f32.gmra.mxu3 %v5659_v43  ;;  %v1844_v8 = vfloor.f32 %v1804_v6  ;;  %v2561_v53 = vadd.f32 0.0033333334, %v2521_v60  ;;  %v4504_v33 = vmul.f32 %v4472_v30, %v4366_v22  ;;  %v4506_v42 = vmul.f32 %v2243_v44, %v2003_v0  ;;  %v5663_v0 = vld [vmem:[#allocation31_spill] sm:$0xff] }
 0x1cd   :  { %v1765_v7 = vmul.f32 0.31830987, %v4493_v13  ;;  %v2800_v31 = vmul.f32 %v2760_v46, %v4387_v21  ;;  %v2442_v27 = vmul.f32 %v2402_v51, %v4477_v37  ;;  %v1276_v17 = vadd.f32 %v4389_v52, %v1049_v50  ;;  %v4555_v60 = vpop.f32.mrf.mxu0 }
 0x1ce   :  { %v817_v45 = vadd.f32 %v816_v11, %v4149_v32  ;;  %v1677_v38 = vmul.f32 %v4399_v20, %v1637_v12  ;;  %v2601_v22 = vmul.f32 %v2561_v53, %v4436_v2  ;;  %v4521_v57 = vmul.f32 %v4506_v42, %v4506_v42  ;;  %v5661_v32 = vld [vmem:[#allocation32_spill] sm:$0xff] }
 0x1cf   :  { %v2044_v1 = vmul.f32 0.5, %v1844_v8  ;;  %2840 = vst [vmem:[%s5422_s3 + $0x58] sm:$0xff] %v2800_v31  ;;  %v4527_v21 = vmul.f32 %v4421_v5, %v1638_v54  ;;  %v2482_v26 = vadd.f32 -7.9365076e-05, %v2442_v27  ;;  %v1884_v52 = vmul.f32 3.140625, %v1844_v8  ;;  %905 = vmatmul.f32.gmra.mxu2 %v5661_v32 }
 0x1d0   :  { %v1805_v59 = vadd.f32 0.5, %v1765_v7  ;;  %v4530_v20 = vpop.eup %2908  ;;  %v2641_v11 = vadd.f32 -0.06666667, %v2601_v22  ;;  %v1639_v62 = vsub.f32 2.0, %v4504_v33  ;;  %v2363_v35 = vmul.f32 -1.0020844e-08, %v4521_v57  ;;  %1350 = vmatmul.f32.gmra.mxu0 %v5663_v0  ;;  %v4564_v33 = vpop.f32.mrf.mxu1 }
 0x1d1   :  { %v2084_v34 = vfloor.f32 %v2044_v1  ;;  %v2522_v9 = vmul.f32 %v2482_v26, %v4477_v37  ;;  %v4536_v55 = vadd.f32 %v4403_v28, %v1276_v17  ;;  %v1055_v5 = vadd.f32 %v4458_v61, %v817_v45  ;;  %v4543_v29 = vpop.f32.mrf.mxu2  ;;  %1529 = vmatmul.f32.gmra.mxu1 %v5663_v0  ;;  %v5664_v45 = vld [vmem:[#allocation34_spill] sm:$0xff] }
 0x1d2   :  { %v1845_v63 = vfloor.f32 %v1805_v59  ;;  %v5662_v49 = vand.u32 4294901760, %v5661_v32  ;;  %v2681_v18 = vmul.f32 %v2641_v11, %v4436_v2  ;;  %v2403_v48 = vadd.f32 1.1022928e-06, %v2363_v35 }
 0x1d3   :  { %v2124_v12 = vmul.f32 2.0, %v2084_v34  ;;  %2910 = vrcp.f32 %v4481_v25  ;;  %v2562_v39 = vadd.f32 0.0033333334, %v2522_v9  ;;  %v4548_v28 = vmul.f32 %v4530_v20, %v4446_v40  ;;  %v4553_v43 = vpop.f32.mrf.mxu3  ;;  %v5666_v9 = vld [vmem:[#allocation33_spill] sm:$0xff] }
 0x1d4   :  { %1161 = vmatmul.f32.gmra.mxu3 %v5662_v49  ;;  %v1924_v61 = vsub.f32 %v4467_v56, %v1884_v52  ;;  %v2045_v4 = vmul.f32 0.5, %v1845_v63  ;;  %v2721_v47 = vadd.f32 0.4, %v2681_v18  ;;  %v2443_v2 = vmul.f32 %v2403_v48, %v4521_v57 }
 0x1d5   :  { %v2164_v6 = vsub.f32 %v1844_v8, %v2124_v12  ;;  %v1885_v50 = vmul.f32 3.140625, %v1845_v63  ;;  %v2602_v44 = vmul.f32 %v2562_v39, %v4477_v37  ;;  %v1964_v58 = vmul.f32 0.0009676536, %v1844_v8 }
 0x1d6   :  { %v2085_v46 = vfloor.f32 %v2045_v4  ;;  %v4560_v40 = vmul.f32 %v4308_v10, %v4536_v55  ;;  %v2761_v56 = vmul.f32 %v2721_v47, %v4426_v16  ;;  %v2483_v54 = vadd.f32 -7.9365076e-05, %v2443_v2  ;;  %v4606_v2 = vpop.f32.mrf.mxu0 }
 0x1d7   :  { %v2204_v51 = vmul.f32 2.0, %v2164_v6  ;;  %v1280_v53 = vadd.f32 %v4438_v23, %v1055_v5  ;;  %v2642_v7 = vadd.f32 -0.06666667, %v2602_v44  ;;  %v2004_v31 = vsub.f32 %v1924_v61, %v1964_v58  ;;  %910 = vmatmul.f32.gmra.mxu2 %v5664_v45 }
 0x1d8   :  { %v2125_v27 = vmul.f32 2.0, %v2085_v46  ;;  %v1766_v17 = vmul.f32 0.31830987, %v4560_v40  ;;  %v2801_v22 = vmul.f32 %v2761_v56, %v1677_v38  ;;  %v2523_v1 = vmul.f32 %v2483_v54, %v4521_v57  ;;  %1354 = vmatmul.f32.gmra.mxu0 %v5666_v9 }
 0x1d9   :  { %v4568_v8 = vpop.eup %2910  ;;  %v2244_v26 = vsub.f32 1.0, %v2204_v51  ;;  %v1925_v16 = vsub.f32 %v4493_v13, %v1885_v50  ;;  %v2682_v52 = vmul.f32 %v2642_v7, %v4477_v37  ;;  %v4574_v32 = vadd.f32 %v4448_v24, %v1280_v53  ;;  %v4586_v13 = vpop.f32.mrf.mxu2  ;;  %1533 = vmatmul.f32.gmra.mxu1 %v5666_v9  ;;  %v5668_v7 = vld [vmem:[#allocation38_spill] sm:$0xff] }
 0x1da   :  { %v2165_v23 = vsub.f32 %v1845_v63, %v2125_v27  ;;  %v1806_v59 = vadd.f32 0.5, %v1766_v17  ;;  %v5665_v11 = vand.u32 4294901760, %v5664_v45  ;;  %2841 = vst [vmem:[%s5422_s3 + $0x60] sm:$0xff] %v2801_v22  ;;  %v1679_v38 = vmul.f32 %v4472_v30, %v1639_v62  ;;  %v4615_v51 = vpop.f32.mrf.mxu1 }
 0x1db   :  { %v2563_v35 = vadd.f32 0.0033333334, %v2523_v1  ;;  %v4582_v34 = vmul.f32 %v2244_v26, %v2004_v31  ;;  %v822_v37 = vadd.f32 %v4495_v41, %v4295_v36  ;;  %v2722_v24 = vadd.f32 0.4, %v2682_v52  ;;  %v4600_v41 = vpop.f32.mrf.mxu3  ;;  %v5670_v1 = vld [vmem:[#allocation35_spill] sm:$0xff] }
 0x1dc   :  { %1167 = vmatmul.f32.gmra.mxu3 %v5665_v11  ;;  %v1965_v5 = vmul.f32 0.0009676536, %v1845_v63  ;;  %v2205_v49 = vmul.f32 2.0, %v2165_v23  ;;  %v1846_v18 = vfloor.f32 %v1806_v59  ;;  %2912 = vrcp.f32 %v4536_v55 }
 0x1dd   :  { %v2603_v48 = vmul.f32 %v2563_v35, %v4521_v57  ;;  %v4593_v30 = vmul.f32 %v4582_v34, %v4582_v34  ;;  %v4598_v36 = vmul.f32 %v4308_v10, %v4574_v32  ;;  %v2762_v62 = vmul.f32 %v2722_v24, %v4463_v19  ;;  %v5667_v19 = vld [vmem:[#allocation36_spill] sm:$0xff] }
 0x1de   :  { %v1640_v63 = vsub.f32 2.0, %v4548_v28  ;;  %v2005_v12 = vsub.f32 %v1925_v16, %v1965_v5  ;;  %v2245_v0 = vsub.f32 1.0, %v2205_v49  ;;  %v2046_v4 = vmul.f32 0.5, %v1846_v18 }
 0x1df   :  { %v2643_v39 = vadd.f32 -0.06666667, %v2603_v48  ;;  %v2364_v61 = vmul.f32 -1.0020844e-08, %v4593_v30  ;;  %v1061_v47 = vadd.f32 %v4509_v15, %v822_v37  ;;  %v2802_v6 = vmul.f32 %v2762_v62, %v4527_v21  ;;  %915 = vmatmul.f32.gmra.mxu2 %v5667_v19 }
 0x1e0   :  { %v4609_v50 = vmul.f32 %v2245_v0, %v2005_v12  ;;  %v1886_v44 = vmul.f32 3.140625, %v1846_v18  ;;  %v1767_v58 = vmul.f32 0.31830987, %v4598_v36  ;;  %v2086_v56 = vfloor.f32 %v2046_v4  ;;  %1358 = vmatmul.f32.gmra.mxu0 %v5670_v1  ;;  %v4667_v0 = vpop.f32.mrf.mxu0 }
 0x1e1   :  { %v2683_v28 = vmul.f32 %v2643_v39, %v4521_v57  ;;  %v2404_v46 = vadd.f32 1.1022928e-06, %v2364_v61  ;;  %v1284_v54 = vadd.f32 %v4497_v3, %v1061_v47  ;;  %2842 = vst [vmem:[%s5422_s3 + $0x68] sm:$0xff] %v2802_v6  ;;  %v4621_v15 = vmul.f32 %v4530_v20, %v1640_v63  ;;  %v4638_v22 = vpop.f32.mrf.mxu2  ;;  %1537 = vmatmul.f32.gmra.mxu1 %v5670_v1  ;;  %v5671_v63 = vld [vmem:[#allocation39_spill] sm:$0xff]  ;;  %v5672_v47 = vld [vmem:[#allocation40_spill] sm:$0xff] }
 0x1e2   :  { %v4625_v21 = vmul.f32 %v4609_v50, %v4609_v50  ;;  %v1807_v53 = vadd.f32 0.5, %v1767_v58  ;;  %v827_v57 = vadd.f32 %v4543_v29, %v5668_v7  ;;  %v5669_v31 = vand.u32 4294901760, %v5667_v19  ;;  %v4631_v3 = vpop.eup %2912 }
 0x1e3   :  { %v2723_v27 = vadd.f32 0.4, %v2683_v28  ;;  %v2444_v17 = vmul.f32 %v2404_v46, %v4593_v30  ;;  %v4636_v20 = vmul.f32 %v4568_v8, %v4481_v25  ;;  %v2126_v45 = vmul.f32 2.0, %v2086_v56  ;;  %v4681_v46 = vpop.f32.mrf.mxu1  ;;  %v5674_v56 = vld [vmem:[#allocation37_spill] sm:$0xff] }
 0x1e4   :  { %1173 = vmatmul.f32.gmra.mxu3 %v5669_v31  ;;  %v2365_v26 = vmul.f32 -1.0020844e-08, %v4625_v21  ;;  %v1926_v29 = vsub.f32 %v4560_v40, %v1886_v44  ;;  %v1847_v16 = vfloor.f32 %v1807_v53  ;;  %v4644_v52 = vadd.f32 %v4511_v14, %v1284_v54  ;;  %v4653_v40 = vpop.f32.mrf.mxu3 }
 0x1e5   :  { %v2763_v23 = vmul.f32 %v2723_v27, %v4506_v42  ;;  %v2484_v59 = vadd.f32 -7.9365076e-05, %v2444_v17  ;;  %v2166_v25 = vsub.f32 %v1846_v18, %v2126_v45  ;;  %v1067_v11 = vadd.f32 %v4553_v43, %v827_v57 }
 0x1e6   :  { %v2405_v35 = vadd.f32 1.1022928e-06, %v2365_v26  ;;  %v4651_v37 = vmul.f32 %v4631_v3, %v4536_v55  ;;  %v1966_v9 = vmul.f32 0.0009676536, %v1846_v18  ;;  %v2047_v24 = vmul.f32 0.5, %v1847_v16 }
 0x1e7   :  { %v2803_v5 = vmul.f32 %v2763_v23, %v1679_v38  ;;  %v2524_v14 = vmul.f32 %v2484_v59, %v4593_v30  ;;  %v2206_v49 = vmul.f32 2.0, %v2166_v25  ;;  %2914 = vrcp.f32 %v4574_v32  ;;  %920 = vmatmul.f32.gmra.mxu2 %v5671_v63 }
 0x1e8   :  { %v2445_v42 = vmul.f32 %v2405_v35, %v4625_v21  ;;  %v2006_v48 = vsub.f32 %v1926_v29, %v1966_v9  ;;  %v1887_v62 = vmul.f32 3.140625, %v1847_v16  ;;  %v2087_v43 = vfloor.f32 %v2047_v24  ;;  %1362 = vmatmul.f32.gmra.mxu0 %v5674_v56 }
 0x1e9   :  { %2843 = vst [vmem:[%s5422_s3 + $0x70] sm:$0xff] %v2803_v5  ;;  %v2564_v55 = vadd.f32 0.0033333334, %v2524_v14  ;;  %v2246_v18 = vsub.f32 1.0, %v2206_v49  ;;  %v4664_v38 = vmul.f32 %v4308_v10, %v4644_v52  ;;  %v1288_v12 = vadd.f32 %v4555_v60, %v1067_v11  ;;  %v4687_v57 = vpop.f32.mrf.mxu2  ;;  %1541 = vmatmul.f32.gmra.mxu1 %v5674_v56 }
 0x1ea   :  { %v1641_v39 = vsub.f32 2.0, %v4636_v20  ;;  %v2485_v61 = vadd.f32 -7.9365076e-05, %v2445_v42  ;;  %v2127_v4 = vmul.f32 2.0, %v2087_v43  ;;  %v832_v6 = vadd.f32 %v4586_v13, %v5672_v47 }
 0x1eb   :  { %v5673_v44 = vand.u32 4294901760, %v5671_v63  ;;  %v2604_v58 = vmul.f32 %v2564_v55, %v4593_v30  ;;  %v4675_v19 = vmul.f32 %v2246_v18, %v2006_v48  ;;  %v1768_v28 = vmul.f32 0.31830987, %v4664_v38 }
 0x1ec   :  { %v4679_v60 = vadd.f32 %v4564_v33, %v1288_v12  ;;  %v2525_v54 = vmul.f32 %v2485_v61, %v4625_v21  ;;  %v1927_v13 = vsub.f32 %v4598_v36, %v1887_v62  ;;  %v2167_v53 = vsub.f32 %v1847_v16, %v2127_v4  ;;  %v4706_v9 = vpop.f32.mrf.mxu3  ;;  %v4733_v61 = vpop.f32.mrf.mxu1 }
 0x1ed   :  { %1179 = vmatmul.f32.gmra.mxu3 %v5673_v44  ;;  %v1073_v7 = vadd.f32 %v4600_v41, %v832_v6  ;;  %v4690_v31 = vpop.eup %2914  ;;  %v2644_v27 = vadd.f32 -0.06666667, %v2604_v58  ;;  %v1642_v33 = vsub.f32 2.0, %v4651_v37  ;;  %v4695_v17 = vmul.f32 %v4675_v19, %v4675_v19  ;;  %v5675_v6 = vld [vmem:[#allocation41_spill] sm:$0xff] }
 0x1ee   :  { %v1808_v20 = vadd.f32 0.5, %v1768_v28  ;;  %v2565_v45 = vadd.f32 0.0033333334, %v2525_v54  ;;  %v1967_v1 = vmul.f32 0.0009676536, %v1847_v16  ;;  %v2207_v36 = vmul.f32 2.0, %v2167_v53 }
 0x1ef   :  { %v4699_v41 = vmul.f32 %v4308_v10, %v4679_v60  ;;  %v2684_v26 = vmul.f32 %v2644_v27, %v4593_v30  ;;  %v2366_v29 = vmul.f32 -1.0020844e-08, %v4695_v17  ;;  %v1292_v59 = vadd.f32 %v4606_v2, %v1073_v7 }
 0x1f0   :  { %v1848_v23 = vfloor.f32 %v1808_v20  ;;  %v1681_v25 = vmul.f32 %v4568_v8, %v1641_v39  ;;  %v2605_v11 = vmul.f32 %v2565_v45, %v4625_v21  ;;  %v2007_v35 = vsub.f32 %v1927_v13, %v1967_v1 }
 0x1f1   :  { %v2247_v37 = vsub.f32 1.0, %v2207_v36  ;;  %v2724_v16 = vadd.f32 0.4, %v2684_v26  ;;  %v2406_v24 = vadd.f32 1.1022928e-06, %v2366_v29  ;;  %v4710_v5 = vmul.f32 %v4690_v31, %v4574_v32  ;;  %v4724_v32 = vpop.f32.mrf.mxu0  ;;  %v4738_v44 = vpop.f32.mrf.mxu2 }
 0x1f2   :  { %v1769_v30 = vmul.f32 0.31830987, %v4699_v41  ;;  %v2645_v14 = vadd.f32 -0.06666667, %v2605_v11  ;;  %2916 = vrcp.f32 %v4644_v52  ;;  %v2048_v8 = vmul.f32 0.5, %v1848_v23 }
 0x1f3   :  { %v4713_v49 = vmul.f32 %v2247_v37, %v2007_v35  ;;  %v2764_v2 = vmul.f32 %v2724_v16, %v4582_v34  ;;  %v4718_v42 = vmul.f32 %v4631_v3, %v1642_v33  ;;  %v2446_v48 = vmul.f32 %v2406_v24, %v4695_v17 }
 0x1f4   :  { %v4722_v62 = vadd.f32 %v4615_v51, %v1292_v59  ;;  %v2685_v43 = vmul.f32 %v2645_v14, %v4625_v21  ;;  %v1888_v55 = vmul.f32 3.140625, %v1848_v23  ;;  %v2088_v18 = vfloor.f32 %v2048_v8  ;;  %v4755_v29 = vpop.f32.mrf.mxu3  ;;  %v5676_v14 = vld [vmem:[#allocation42_spill] sm:$0xff] }
 0x1f5   :  { %v4729_v63 = vmul.f32 %v4713_v49, %v4713_v49  ;;  %v2804_v34 = vmul.f32 %v2764_v2, %v4621_v15  ;;  %v2486_v12 = vadd.f32 -7.9365076e-05, %v2446_v48  ;;  %v1643_v3 = vsub.f32 2.0, %v4710_v5 }
 0x1f6   :  { %v1809_v39 = vadd.f32 0.5, %v1769_v30  ;;  %v2725_v51 = vadd.f32 0.4, %v2685_v43  ;;  %v2128_v47 = vmul.f32 2.0, %v2088_v18  ;;  %v837_v21 = vadd.f32 %v4638_v22, %v5675_v6 }
 0x1f7   :  { %v2367_v4 = vmul.f32 -1.0020844e-08, %v4729_v63  ;;  %2844 = vst [vmem:[%s5422_s3 + $0x78] sm:$0xff] %v2804_v34  ;;  %v2526_v15 = vmul.f32 %v2486_v12, %v4695_v17  ;;  %2918 = vrcp.f32 %v4679_v60  ;;  %v4747_v28 = vmul.f32 %v4308_v10, %v4722_v62 }
 0x1f8   :  { %v1849_v58 = vfloor.f32 %v1809_v39  ;;  %v4749_v56 = vpop.eup %2916  ;;  %v2765_v54 = vmul.f32 %v2725_v51, %v4609_v50  ;;  %v1928_v13 = vsub.f32 %v4664_v38, %v1888_v55  ;;  %v2168_v53 = vsub.f32 %v1848_v23, %v2128_v47 }
 0x1f9   :  { %v2407_v22 = vadd.f32 1.1022928e-06, %v2367_v4  ;;  %v2566_v7 = vadd.f32 0.0033333334, %v2526_v15  ;;  %v1968_v27 = vmul.f32 0.0009676536, %v1848_v23  ;;  %v4760_v50 = vmul.f32 %v4749_v56, %v4644_v52  ;;  %v4771_v8 = vpop.f32.mrf.mxu0 }
 0x1fa   :  { %v1889_v33 = vmul.f32 3.140625, %v1849_v58  ;;  %v2049_v20 = vmul.f32 0.5, %v1849_v58  ;;  %v2805_v45 = vmul.f32 %v2765_v54, %v1681_v25  ;;  %v2208_v36 = vmul.f32 2.0, %v2168_v53 }
 0x1fb   :  { %v2447_v1 = vmul.f32 %v2407_v22, %v4729_v63  ;;  %v1770_v26 = vmul.f32 0.31830987, %v4747_v28  ;;  %v2606_v59 = vmul.f32 %v2566_v7, %v4695_v17  ;;  %v1079_v11 = vadd.f32 %v4653_v40, %v837_v21 }
 0x1fc   :  { %v2089_v38 = vfloor.f32 %v2049_v20  ;;  %2845 = vst [vmem:[%s5422_s3 + $0x80] sm:$0xff] %v2805_v45  ;;  %v2008_v25 = vsub.f32 %v1928_v13, %v1968_v27  ;;  %v2248_v35 = vsub.f32 1.0, %v2208_v36  ;;  %v842_v52 = vadd.f32 %v4687_v57, %v5676_v14  ;;  %v4802_v27 = vpop.f32.mrf.mxu3 }
 0x1fd   :  { %v2487_v23 = vadd.f32 -7.9365076e-05, %v2447_v1  ;;  %v1810_v37 = vadd.f32 0.5, %v1770_v26  ;;  %v4766_v16 = vpop.eup %2918  ;;  %v2646_v24 = vadd.f32 -0.06666667, %v2606_v59  ;;  %v1296_v30 = vadd.f32 %v4667_v0, %v1079_v11  ;;  %v4780_v0 = vpop.f32.mrf.mxu1 }
 0x1fe   :  { %v2129_v5 = vmul.f32 2.0, %v2089_v38  ;;  %v4774_v2 = vmul.f32 %v2248_v35, %v2008_v25  ;;  %v1929_v48 = vsub.f32 %v4699_v41, %v1889_v33  ;;  %v1683_v18 = vmul.f32 %v4690_v31, %v1643_v3  ;;  %v4789_v41 = vpop.f32.mrf.mxu2 }
 0x1ff   :  { %v2527_v40 = vmul.f32 %v2487_v23, %v4729_v63  ;;  %v1850_v43 = vfloor.f32 %v1810_v37  ;;  %v2686_v55 = vmul.f32 %v2646_v24, %v4695_v17  ;;  %v1644_v34 = vsub.f32 2.0, %v4760_v50 }
 0x200   :  { %v2169_v12 = vsub.f32 %v1849_v58, %v2129_v5  ;;  %v4784_v57 = vmul.f32 %v4774_v2, %v4774_v2  ;;  %v1969_v51 = vmul.f32 0.0009676536, %v1849_v58  ;;  %v4787_v4 = vadd.f32 %v4681_v46, %v1296_v30 }
 0x201   :  { %v2567_v39 = vadd.f32 0.0033333334, %v2527_v40  ;;  %v2726_v47 = vadd.f32 0.4, %v2686_v55  ;;  %v2050_v6 = vmul.f32 0.5, %v1850_v43  ;;  %v1085_v31 = vadd.f32 %v4706_v9, %v842_v52  ;;  %v4824_v11 = vpop.f32.mrf.mxu0 }
 0x202   :  { %v2209_v17 = vmul.f32 2.0, %v2169_v12  ;;  %v2368_v21 = vmul.f32 -1.0020844e-08, %v4784_v57  ;;  %v2009_v15 = vsub.f32 %v1929_v48, %v1969_v51  ;;  %2920 = vrcp.f32 %v4722_v62 }
 0x203   :  { %v2607_v3 = vmul.f32 %v2567_v39, %v4729_v63  ;;  %v2766_v54 = vmul.f32 %v2726_v47, %v4675_v19  ;;  %v1890_v22 = vmul.f32 3.140625, %v1850_v43  ;;  %v2090_v46 = vfloor.f32 %v2050_v6 }
 0x204   :  { %v2249_v58 = vsub.f32 1.0, %v2209_v17  ;;  %v2408_v53 = vadd.f32 1.1022928e-06, %v2368_v21  ;;  %v1605_v7 = vmul.f32 %v4766_v16, %v4679_v60  ;;  %v4800_v9 = vmul.f32 %v4308_v10, %v4787_v4  ;;  %v5677_v60 = vld [vmem:[#allocation43_spill] sm:$0xff] }
 0x205   :  { %v2647_v13 = vadd.f32 -0.06666667, %v2607_v3  ;;  %v2806_v33 = vmul.f32 %v2766_v54, %v4718_v42  ;;  %v2130_v45 = vmul.f32 2.0, %v2090_v46  ;;  %v1300_v19 = vadd.f32 %v4724_v32, %v1085_v31  ;;  %v4834_v14 = vpop.f32.mrf.mxu1 }
 0x206   :  { %v4805_v20 = vmul.f32 %v2249_v58, %v2009_v15  ;;  %v2448_v36 = vmul.f32 %v2408_v53, %v4784_v57  ;;  %v1771_v26 = vmul.f32 0.31830987, %v4800_v9  ;;  %v847_v59 = vadd.f32 %v4738_v44, %v5677_v60  ;;  %v4838_v55 = vpop.f32.mrf.mxu2  ;;  %v4856_v15 = vpop.f32.mrf.mxu3 }
 0x207   :  { %v2687_v1 = vmul.f32 %v2647_v13, %v4729_v63  ;;  %2846 = vst [vmem:[%s5422_s3 + $0x88] sm:$0xff] %v2806_v33  ;;  %v1930_v38 = vsub.f32 %v4747_v28, %v1890_v22  ;;  %v2170_v32 = vsub.f32 %v1850_v43, %v2130_v45  ;;  %v4822_v63 = vadd.f32 %v4733_v61, %v1300_v19  ;;  %v5678_v19 = vld [vmem:[#allocation44_spill] sm:$0xff] }
 0x208   :  { %v4818_v42 = vmul.f32 %v4805_v20, %v4805_v20  ;;  %v4826_v23 = vpop.eup %2920  ;;  %v2488_v44 = vadd.f32 -7.9365076e-05, %v2448_v36  ;;  %v1811_v35 = vadd.f32 0.5, %v1771_v26  ;;  %v1091_v37 = vadd.f32 %v4755_v29, %v847_v59 }
 0x209   :  { %v2727_v25 = vadd.f32 0.4, %v2687_v1  ;;  %v1970_v5 = vmul.f32 0.0009676536, %v1850_v43  ;;  %v2210_v30 = vmul.f32 2.0, %v2170_v32  ;;  %v4832_v28 = vmul.f32 %v4308_v10, %v4822_v63 }
 0x20a   :  { %v2369_v24 = vmul.f32 -1.0020844e-08, %v4818_v42  ;;  %v2528_v52 = vmul.f32 %v2488_v44, %v4784_v57  ;;  %v1645_v40 = vsub.f32 2.0, %v1605_v7  ;;  %v1851_v48 = vfloor.f32 %v1811_v35  ;;  %v4872_v7 = vpop.f32.mrf.mxu0 }
 0x20b   :  { %v2767_v61 = vmul.f32 %v2727_v25, %v4713_v49  ;;  %v2010_v29 = vsub.f32 %v1930_v38, %v1970_v5  ;;  %v2250_v39 = vsub.f32 1.0, %v2210_v30  ;;  %v1772_v43 = vmul.f32 0.31830987, %v4832_v28 }
 0x20c   :  { %v2409_v12 = vadd.f32 1.1022928e-06, %v2369_v24  ;;  %v2568_v47 = vadd.f32 0.0033333334, %v2528_v52  ;;  %v4843_v10 = vmul.f32 %v4826_v23, %v4722_v62  ;;  %v1304_v17 = vadd.f32 %v4771_v8, %v1091_v37 }
 0x20d   :  { %v2807_v51 = vmul.f32 %v2767_v61, %v1683_v18  ;;  %v4847_v6 = vmul.f32 %v2250_v39, %v2010_v29  ;;  %v2051_v31 = vmul.f32 0.5, %v1851_v48  ;;  %v1684_v18 = vmul.f32 %v4749_v56, %v1644_v34  ;;  %v4879_v59 = vpop.f32.mrf.mxu1 }
 0x20e   :  { %v2449_v49 = vmul.f32 %v2409_v12, %v4818_v42  ;;  %v2608_v3 = vmul.f32 %v2568_v47, %v4784_v57  ;;  %v1891_v21 = vmul.f32 3.140625, %v1851_v48  ;;  %v1812_v62 = vadd.f32 0.5, %v1772_v43  ;;  %v4890_v44 = vpop.f32.mrf.mxu2 }
 0x20f   :  { %2847 = vst [vmem:[%s5422_s3 + $0x90] sm:$0xff] %v2807_v51  ;;  %v4859_v8 = vmul.f32 %v4766_v16, %v1645_v40  ;;  %v4863_v58 = vmul.f32 %v4847_v6, %v4847_v6  ;;  %v2091_v22 = vfloor.f32 %v2051_v31  ;;  %v1646_v50 = vsub.f32 2.0, %v4843_v10 }
 0x210   :  { %v2489_v54 = vadd.f32 -7.9365076e-05, %v2449_v49  ;;  %v2648_v46 = vadd.f32 -0.06666667, %v2608_v3  ;;  %v1852_v13 = vfloor.f32 %v1812_v62  ;;  %v4867_v56 = vadd.f32 %v4780_v0, %v1304_v17 }
 0x211   :  { %v2370_v53 = vmul.f32 -1.0020844e-08, %v4863_v58  ;;  %2922 = vrcp.f32 %v4787_v4  ;;  %v2131_v16 = vmul.f32 2.0, %v2091_v22  ;;  %v1931_v45 = vsub.f32 %v4800_v9, %v1891_v21 }
 0x212   :  { %v2529_v34 = vmul.f32 %v2489_v54, %v4818_v42  ;;  %v2688_v33 = vmul.f32 %v2648_v46, %v4784_v57  ;;  %2924 = vrcp.f32 %v4822_v63  ;;  %v852_v1 = vadd.f32 %v4789_v41, %v5678_v19  ;;  %v4884_v57 = vld [vmem:[%s5421_s0] ss:$0 sm:$0xff] }
 0x213   :  { %v2410_v36 = vadd.f32 1.1022928e-06, %v2370_v53  ;;  %v2171_v26 = vsub.f32 %v1851_v48, %v2131_v16  ;;  %v2052_v60 = vmul.f32 0.5, %v1852_v13  ;;  %v1971_v32 = vmul.f32 0.0009676536, %v1851_v48 }
 0x214   :  { %v2569_v0 = vadd.f32 0.0033333334, %v2529_v34  ;;  %v2728_v38 = vadd.f32 0.4, %v2688_v33  ;;  %v1892_v25 = vmul.f32 3.140625, %v1852_v13  ;;  %v4888_v9 = vmul.f32 %v4884_v57, %v4867_v56  ;;  %v4921_v34 = vpop.f32.mrf.mxu0 }
 0x215   :  { %v2450_v35 = vmul.f32 %v2410_v36, %v4863_v58  ;;  %v2211_v37 = vmul.f32 2.0, %v2171_v26  ;;  %v2092_v24 = vfloor.f32 %v2052_v60  ;;  %v2011_v30 = vsub.f32 %v1931_v45, %v1971_v32  ;;  %v5679_v45 = vld [vmem:[#allocation45_spill] sm:$0xff] }
 0x216   :  { %v2609_v41 = vmul.f32 %v2569_v0, %v4818_v42  ;;  %v2768_v5 = vmul.f32 %v2728_v38, %v4774_v2  ;;  %v1773_v61 = vmul.f32 0.31830987, %v4888_v9  ;;  %v1097_v52 = vadd.f32 %v4802_v27, %v852_v1  ;;  %v4903_v2 = vpop.f32.mrf.mxu3  ;;  %v4928_v0 = vpop.f32.mrf.mxu1 }
 0x217   :  { %v4897_v40 = vpop.eup %2922  ;;  %v2490_v12 = vadd.f32 -7.9365076e-05, %v2450_v35  ;;  %v2251_v29 = vsub.f32 1.0, %v2211_v37  ;;  %v2132_v39 = vmul.f32 2.0, %v2092_v24  ;;  %v1932_v47 = vsub.f32 %v4832_v28, %v1892_v25 }
 0x218   :  { %v2649_v48 = vadd.f32 -0.06666667, %v2609_v41  ;;  %v4899_v43 = vpop.eup %2924  ;;  %v2808_v51 = vmul.f32 %v2768_v5, %v1684_v18  ;;  %v1813_v17 = vadd.f32 0.5, %v1773_v61  ;;  %v1308_v49 = vadd.f32 %v4824_v11, %v1097_v52  ;;  %v5680_v52 = vld [vmem:[#allocation46_spill] sm:$0xff] }
 0x219   :  { %v2530_v27 = vmul.f32 %v2490_v12, %v4863_v58  ;;  %v4907_v3 = vmul.f32 %v2251_v29, %v2011_v30  ;;  %v2172_v21 = vsub.f32 %v1852_v13, %v2132_v39  ;;  %v1607_v18 = vmul.f32 %v4897_v40, %v4787_v4 }
 0x21a   :  { %v2689_v31 = vmul.f32 %v2649_v48, %v4818_v42  ;;  %2848 = vst [vmem:[%s5422_s3 + $0x98] sm:$0xff] %v2808_v51  ;;  %v1972_v28 = vmul.f32 0.0009676536, %v1852_v13  ;;  %v1853_v62 = vfloor.f32 %v1813_v17  ;;  %v4915_v11 = vadd.f32 %v4834_v14, %v1308_v49 }
 0x21b   :  { %v2570_v22 = vadd.f32 0.0033333334, %v2530_v27  ;;  %v4919_v42 = vmul.f32 %v4907_v3, %v4907_v3  ;;  %v2212_v46 = vmul.f32 2.0, %v2172_v21  ;;  %v857_v4 = vadd.f32 %v4838_v55, %v5679_v45  ;;  %v866_v55 = vpop.f32.mrf.mxu2 }
 0x21c   :  { %v2729_v54 = vadd.f32 0.4, %v2689_v31  ;;  %v2012_v53 = vsub.f32 %v1932_v47, %v1972_v28  ;;  %v1893_v16 = vmul.f32 3.140625, %v1853_v62  ;;  %v2053_v33 = vmul.f32 0.5, %v1853_v62  ;;  %v1319_v21 = vpop.f32.mrf.mxu0 }
 0x21d   :  { %v2610_v14 = vmul.f32 %v2570_v22, %v4863_v58  ;;  %v2371_v19 = vmul.f32 -1.0020844e-08, %v4919_v42  ;;  %v2252_v1 = vsub.f32 1.0, %v2212_v46  ;;  %v1686_v36 = vmul.f32 %v4826_v23, %v1646_v50 }
 0x21e   :  { %v2769_v13 = vmul.f32 %v2729_v54, %v4805_v20  ;;  %v1647_v26 = vsub.f32 2.0, %v1607_v18  ;;  %v2093_v60 = vfloor.f32 %v2053_v33  ;;  %v4935_v38 = vmul.f32 %v4884_v57, %v4915_v11  ;;  %v1114_v48 = vpop.f32.mrf.mxu3 }
 0x21f   :  { %v2650_v32 = vadd.f32 -0.06666667, %v2610_v14  ;;  %v2411_v25 = vadd.f32 1.1022928e-06, %v2371_v19  ;;  %v4938_v41 = vmul.f32 %v2252_v1, %v2012_v53  ;;  %2926 = vrcp.f32 %v4867_v56 }
 0x220   :  { %v2809_v20 = vmul.f32 %v2769_v13, %v4859_v8  ;;  %v2133_v35 = vmul.f32 2.0, %v2093_v60  ;;  %v1774_v10 = vmul.f32 0.31830987, %v4935_v38  ;;  %v1103_v23 = vadd.f32 %v4856_v15, %v857_v4 }
 0x221   :  { %v2690_v50 = vmul.f32 %v2650_v32, %v4863_v58  ;;  %v2451_v37 = vmul.f32 %v2411_v25, %v4919_v42  ;;  %v4950_v8 = vmul.f32 %v4938_v41, %v4938_v41  ;;  %v1933_v24 = vsub.f32 %v4888_v9, %v1893_v16  ;;  %v5681_v9 = vld [vmem:[#allocation47_spill] sm:$0xff]  ;;  %v1498_v16 = vpop.f32.mrf.mxu1 }
 0x222   :  { %2849 = vst [vmem:[%s5422_s3 + $0xa0] sm:$0xff] %v2809_v20  ;;  %v2173_v5 = vsub.f32 %v1853_v62, %v2133_v35  ;;  %v1814_v30 = vadd.f32 0.5, %v1774_v10  ;;  %v1312_v61 = vadd.f32 %v4872_v7, %v1103_v23  ;;  %v862_v15 = vadd.f32 %v4890_v44, %v5680_v52 }
 0x223   :  { %v2730_v12 = vadd.f32 0.4, %v2690_v50  ;;  %v2491_v29 = vadd.f32 -7.9365076e-05, %v2451_v37  ;;  %v4958_v58 = vmul.f32 %v4899_v43, %v4822_v63  ;;  %v2372_v39 = vmul.f32 -1.0020844e-08, %v4950_v8  ;;  %v4975_v13 = vpop.f32.mrf.mxu2 }
 0x224   :  { %v1973_v51 = vmul.f32 0.0009676536, %v1853_v62  ;;  %v2213_v47 = vmul.f32 2.0, %v2173_v5  ;;  %v1854_v17 = vfloor.f32 %v1814_v30  ;;  %v867_v49 = vadd.f32 %v866_v55, %v5681_v9 }
 0x225   :  { %v2770_v31 = vmul.f32 %v2730_v12, %v4847_v6  ;;  %v2531_v7 = vmul.f32 %v2491_v29, %v4919_v42  ;;  %v2412_v27 = vadd.f32 1.1022928e-06, %v2372_v39  ;;  %v4965_v44 = vadd.f32 %v4879_v59, %v1312_v61  ;;  %v4967_v18 = vpop.eup %2926 }
 0x226   :  { %v2013_v63 = vsub.f32 %v1933_v24, %v1973_v51  ;;  %v2253_v28 = vsub.f32 1.0, %v2213_v47  ;;  %v2054_v54 = vmul.f32 0.5, %v1854_v17  ;;  %v1109_v62 = vadd.f32 %v4903_v2, %v862_v15  ;;  %v5000_v50 = vpop.f32.mrf.mxu3 }
 0x227   :  { %v2810_v22 = vmul.f32 %v2770_v31, %v1686_v36  ;;  %v1687_v46 = vmul.f32 %v4897_v40, %v1647_v26  ;;  %v2571_v53 = vadd.f32 0.0033333334, %v2531_v7  ;;  %v2452_v6 = vmul.f32 %v2412_v27, %v4950_v8 }
 0x228   :  { %v1648_v33 = vsub.f32 2.0, %v4958_v58  ;;  %v4973_v45 = vmul.f32 %v2253_v28, %v2013_v63  ;;  %v1894_v59 = vmul.f32 3.140625, %v1854_v17  ;;  %v2094_v4 = vfloor.f32 %v2054_v54 }
 0x229   :  { %2850 = vst [vmem:[%s5422_s3 + $0xa8] sm:$0xff] %v2810_v22  ;;  %v2611_v2 = vmul.f32 %v2571_v53, %v4919_v42  ;;  %v2492_v14 = vadd.f32 -7.9365076e-05, %v2452_v6  ;;  %v4983_v40 = vmul.f32 %v4884_v57, %v4965_v44  ;;  %v1115_v19 = vadd.f32 %v1114_v48, %v867_v49  ;;  %v5009_v48 = vpop.f32.mrf.mxu0  ;;  %v5018_v49 = vpop.f32.mrf.mxu1 }
 0x22a   :  { %v4987_v1 = vmul.f32 %v4973_v45, %v4973_v45  ;;  %2928 = vrcp.f32 %v4915_v11  ;;  %v2134_v36 = vmul.f32 2.0, %v2094_v4  ;;  %v1316_v26 = vadd.f32 %v4921_v34, %v1109_v62 }
 0x22b   :  { %v2651_v60 = vadd.f32 -0.06666667, %v2611_v2  ;;  %v2532_v55 = vmul.f32 %v2492_v14, %v4950_v8  ;;  %v1609_v20 = vmul.f32 %v4967_v18, %v4867_v56  ;;  %v1775_v32 = vmul.f32 0.31830987, %v4983_v40 }
 0x22c   :  { %v2373_v25 = vmul.f32 -1.0020844e-08, %v4987_v1  ;;  %v1934_v35 = vsub.f32 %v4935_v38, %v1894_v59  ;;  %v2174_v10 = vsub.f32 %v1854_v17, %v2134_v36  ;;  %v4998_v23 = vadd.f32 %v4928_v0, %v1316_v26 }
 0x22d   :  { %v2691_v34 = vmul.f32 %v2651_v60, %v4919_v42  ;;  %v2572_v37 = vadd.f32 0.0033333334, %v2532_v55  ;;  %v1815_v24 = vadd.f32 0.5, %v1775_v32  ;;  %v1320_v5 = vadd.f32 %v1319_v21, %v1115_v19  ;;  %v876_v21 = vpop.f32.mrf.mxu2 }
 0x22e   :  { %v2413_v30 = vadd.f32 1.1022928e-06, %v2373_v25  ;;  %v1974_v61 = vmul.f32 0.0009676536, %v1854_v17  ;;  %v2214_v56 = vmul.f32 2.0, %v2174_v10  ;;  %v5005_v52 = vmul.f32 %v4884_v57, %v4998_v23  ;;  %v1126_v36 = vpop.f32.mrf.mxu3 }
 0x22f   :  { %v2731_v15 = vadd.f32 0.4, %v2691_v34  ;;  %v2612_v38 = vmul.f32 %v2572_v37, %v4950_v8  ;;  %2930 = vrcp.f32 %v4965_v44  ;;  %v1855_v0 = vfloor.f32 %v1815_v24 }
 0x230   :  { %v5011_v12 = vpop.eup %2928  ;;  %v2453_v42 = vmul.f32 %v2413_v30, %v4987_v1  ;;  %v2014_v29 = vsub.f32 %v1934_v35, %v1974_v61  ;;  %v2254_v58 = vsub.f32 1.0, %v2214_v56  ;;  %v1776_v39 = vmul.f32 0.31830987, %v5005_v52 }
 0x231   :  { %v2771_v51 = vmul.f32 %v2731_v15, %v4907_v3  ;;  %v2652_v47 = vadd.f32 -0.06666667, %v2612_v38  ;;  %v1649_v17 = vsub.f32 2.0, %v1609_v20  ;;  %v5016_v9 = vadd.f32 %v1498_v16, %v1320_v5  ;;  %v1327_v34 = vpop.f32.mrf.mxu0 }
 0x232   :  { %v2493_v31 = vadd.f32 -7.9365076e-05, %v2453_v42  ;;  %v5020_v7 = vmul.f32 %v2254_v58, %v2014_v29  ;;  %v2055_v27 = vmul.f32 0.5, %v1855_v0  ;;  %v5025_v54 = vmul.f32 %v5011_v12, %v4915_v11 }
 0x233   :  { %v2811_v63 = vmul.f32 %v2771_v51, %v1687_v46  ;;  %v2692_v28 = vmul.f32 %v2652_v47, %v4950_v8  ;;  %v1895_v62 = vmul.f32 3.140625, %v1855_v0  ;;  %v1816_v6 = vadd.f32 0.5, %v1776_v39 }
 0x234   :  { %v2533_v3 = vmul.f32 %v2493_v31, %v4987_v1  ;;  %v5030_v22 = vmul.f32 %v5020_v7, %v5020_v7  ;;  %v2095_v53 = vfloor.f32 %v2055_v27  ;;  %v1688_v8 = vmul.f32 %v4899_v43, %v1648_v33  ;;  %v5682_v43 = vld [vmem:[#allocation48_spill] sm:$0xff]  ;;  %v5683_v27 = vld [vmem:[#allocation49_spill] sm:$0xff] }
 0x235   :  { %v5032_v16 = vpop.eup %2930  ;;  %2851 = vst [vmem:[%s5422_s3 + $0xb0] sm:$0xff] %v2811_v63  ;;  %v2732_v46 = vadd.f32 0.4, %v2692_v28  ;;  %v1689_v11 = vmul.f32 %v4967_v18, %v1649_v17  ;;  %v5041_v59 = vmul.f32 %v4884_v57, %v5016_v9  ;;  %v1856_v19 = vfloor.f32 %v1816_v6  ;;  %v881_v58 = vpop.f32.mrf.mxu2 }
 0x236   :  { %v2573_v4 = vadd.f32 0.0033333334, %v2533_v3  ;;  %v2374_v2 = vmul.f32 -1.0020844e-08, %v5030_v22  ;;  %v2135_v14 = vmul.f32 2.0, %v2095_v53  ;;  %v1650_v60 = vsub.f32 2.0, %v5025_v54 }
 0x237   :  { %v2772_v26 = vmul.f32 %v2732_v46, %v4938_v41  ;;  %v1777_v55 = vmul.f32 0.31830987, %v5041_v59  ;;  %v872_v33 = vadd.f32 %v4975_v13, %v5682_v43  ;;  %v1935_v32 = vsub.f32 %v4983_v40, %v1895_v62  ;;  %v1132_v46 = vpop.f32.mrf.mxu3 }
 0x238   :  { %v2613_v18 = vmul.f32 %v2573_v4, %v4987_v1  ;;  %v2414_v20 = vadd.f32 1.1022928e-06, %v2374_v2  ;;  %v2175_v25 = vsub.f32 %v1855_v0, %v2135_v14  ;;  %v5053_v10 = vmul.f32 %v5032_v16, %v4965_v44  ;;  %v1506_v44 = vpop.f32.mrf.mxu1 }
 0x239   :  { %v2812_v35 = vmul.f32 %v2772_v26, %v1688_v8  ;;  %2932 = vrcp.f32 %v4998_v23  ;;  %v2056_v41 = vmul.f32 0.5, %v1856_v19  ;;  %v1975_v5 = vmul.f32 0.0009676536, %v1855_v0 }
 0x23a   :  { %v2653_v37 = vadd.f32 -0.06666667, %v2613_v18  ;;  %v2454_v24 = vmul.f32 %v2414_v20, %v5030_v22  ;;  %v2215_v13 = vmul.f32 2.0, %v2175_v25  ;;  %v1896_v40 = vmul.f32 3.140625, %v1856_v19  ;;  %v1331_v20 = vpop.f32.mrf.mxu0  ;;  %v5684_v25 = vld [vmem:[#allocation50_spill] sm:$0xff] }
 0x23b   :  { %2852 = vst [vmem:[%s5422_s3 + $0xb8] sm:$0xff] %v2812_v35  ;;  %v2096_v30 = vfloor.f32 %v2056_v41  ;;  %v1817_v61 = vadd.f32 0.5, %v1777_v55  ;;  %v1121_v56 = vadd.f32 %v5000_v50, %v872_v33  ;;  %v2015_v42 = vsub.f32 %v1935_v32, %v1975_v5 }
 0x23c   :  { %v2693_v15 = vmul.f32 %v2653_v37, %v4987_v1  ;;  %v2494_v38 = vadd.f32 -7.9365076e-05, %v2454_v24  ;;  %v2255_v29 = vsub.f32 1.0, %v2215_v13  ;;  %2934 = vrcp.f32 %v5016_v9 }
 0x23d   :  { %v2136_v39 = vmul.f32 2.0, %v2096_v30  ;;  %v1857_v0 = vfloor.f32 %v1817_v61  ;;  %v1324_v51 = vadd.f32 %v5009_v48, %v1121_v56  ;;  %v877_v50 = vadd.f32 %v876_v21, %v5683_v27  ;;  %v886_v56 = vpop.f32.mrf.mxu2 }
 0x23e   :  { %v2733_v47 = vadd.f32 0.4, %v2693_v15  ;;  %v2534_v17 = vmul.f32 %v2494_v38, %v5030_v22  ;;  %v5065_v31 = vmul.f32 %v2255_v29, %v2015_v42  ;;  %v1936_v1 = vsub.f32 %v5005_v52, %v1896_v40 }
 0x23f   :  { %v5068_v63 = vpop.eup %2932  ;;  %v1976_v28 = vmul.f32 0.0009676536, %v1856_v19  ;;  %v2176_v62 = vsub.f32 %v1856_v19, %v2136_v39  ;;  %v2057_v3 = vmul.f32 0.5, %v1857_v0  ;;  %v5077_v8 = vadd.f32 %v5018_v49, %v1324_v51 }
 0x240   :  { %v2773_v53 = vmul.f32 %v2733_v47, %v4973_v45  ;;  %v2574_v6 = vadd.f32 0.0033333334, %v2534_v17  ;;  %v5074_v48 = vmul.f32 %v5065_v31, %v5065_v31  ;;  %v1897_v21 = vmul.f32 3.140625, %v1857_v0  ;;  %v1510_v5 = vpop.f32.mrf.mxu1 }
 0x241   :  { %v2216_v4 = vmul.f32 2.0, %v2176_v62  ;;  %v2097_v2 = vfloor.f32 %v2057_v3  ;;  %v1127_v14 = vadd.f32 %v1126_v36, %v877_v50  ;;  %v1612_v45 = vmul.f32 %v5068_v63, %v4998_v23  ;;  %v1138_v50 = vpop.f32.mrf.mxu3 }
 0x242   :  { %v2813_v26 = vmul.f32 %v2773_v53, %v1689_v11  ;;  %v2614_v52 = vmul.f32 %v2574_v6, %v5030_v22  ;;  %v2375_v19 = vmul.f32 -1.0020844e-08, %v5074_v48  ;;  %v5083_v55 = vpop.eup %2934  ;;  %v2016_v43 = vsub.f32 %v1936_v1, %v1976_v28 }
 0x243   :  { %v2256_v33 = vsub.f32 1.0, %v2216_v4  ;;  %v2137_v18 = vmul.f32 2.0, %v2097_v2  ;;  %v5087_v49 = vmul.f32 %v4884_v57, %v5077_v8  ;;  %v1328_v32 = vadd.f32 %v1327_v34, %v1127_v14 }
 0x244   :  { %2853 = vst [vmem:[%s5422_s3 + $0xc0] sm:$0xff] %v2813_v26  ;;  %v2654_v11 = vadd.f32 -0.06666667, %v2614_v52  ;;  %v2415_v36 = vadd.f32 1.1022928e-06, %v2375_v19  ;;  %v882_v35 = vadd.f32 %v881_v58, %v5684_v25  ;;  %v1937_v41 = vsub.f32 %v5041_v59, %v1897_v21  ;;  %v5685_v21 = vld [vmem:[#allocation51_spill] sm:$0xff] }
 0x245   :  { %v5093_v23 = vmul.f32 %v2256_v33, %v2016_v43  ;;  %v2177_v37 = vsub.f32 %v1857_v0, %v2137_v18  ;;  %v1778_v24 = vmul.f32 0.31830987, %v5087_v49  ;;  %v5099_v30 = vadd.f32 %v1506_v44, %v1328_v32  ;;  %v891_v25 = vpop.f32.mrf.mxu2 }
 0x246   :  { %v2694_v13 = vmul.f32 %v2654_v11, %v5030_v22  ;;  %v2455_v40 = vmul.f32 %v2415_v36, %v5074_v48  ;;  %v1133_v61 = vadd.f32 %v1132_v46, %v882_v35  ;;  %v1977_v15 = vmul.f32 0.0009676536, %v1857_v0 }
 0x247   :  { %v5103_v34 = vmul.f32 %v5093_v23, %v5093_v23  ;;  %v2217_v38 = vmul.f32 2.0, %v2177_v37  ;;  %v1818_v42 = vadd.f32 0.5, %v1778_v24  ;;  %v1690_v59 = vmul.f32 %v5011_v12, %v1650_v60 }
 0x248   :  { %v2734_v29 = vadd.f32 0.4, %v2694_v13  ;;  %v2495_v58 = vadd.f32 -7.9365076e-05, %v2455_v40  ;;  %v5110_v22 = vmul.f32 %v4884_v57, %v5099_v30  ;;  %v2017_v39 = vsub.f32 %v1937_v41, %v1977_v15  ;;  %v1514_v18 = vpop.f32.mrf.mxu1 }
 0x249   :  { %v2376_v44 = vmul.f32 -1.0020844e-08, %v5103_v34  ;;  %v2257_v51 = vsub.f32 1.0, %v2217_v38  ;;  %v1858_v47 = vfloor.f32 %v1818_v42  ;;  %v1332_v54 = vadd.f32 %v1331_v20, %v1133_v61 }
 0x24a   :  { %v2774_v17 = vmul.f32 %v2734_v29, %v5020_v7  ;;  %v2535_v0 = vmul.f32 %v2495_v58, %v5074_v48  ;;  %v1779_v27 = vmul.f32 0.31830987, %v5110_v22  ;;  %v1651_v12 = vsub.f32 2.0, %v5053_v10  ;;  %v1335_v10 = vpop.f32.mrf.mxu0  ;;  %v1144_v29 = vpop.f32.mrf.mxu3 }
 0x24b   :  { %v1652_v60 = vsub.f32 2.0, %v1612_v45  ;;  %v2416_v1 = vadd.f32 1.1022928e-06, %v2376_v44  ;;  %v5117_v28 = vmul.f32 %v2257_v51, %v2017_v39  ;;  %v1613_v53 = vmul.f32 %v5083_v55, %v5016_v9 }
 0x24c   :  { %v2814_v62 = vmul.f32 %v2774_v17, %v1690_v59  ;;  %v2575_v3 = vadd.f32 0.0033333334, %v2535_v0  ;;  %v2058_v6 = vmul.f32 0.5, %v1858_v47  ;;  %v1898_v4 = vmul.f32 3.140625, %v1858_v47 }
 0x24d   :  { %v2456_v7 = vmul.f32 %v2416_v1, %v5103_v34  ;;  %v5124_v46 = vmul.f32 %v5117_v28, %v5117_v28  ;;  %v887_v2 = vadd.f32 %v886_v56, %v5685_v21  ;;  %v1819_v52 = vadd.f32 0.5, %v1779_v27 }
 0x24e   :  { %2854 = vst [vmem:[%s5422_s3 + $0xc8] sm:$0xff] %v2814_v62  ;;  %v2615_v14 = vmul.f32 %v2575_v3, %v5074_v48  ;;  %v2098_v26 = vfloor.f32 %v2058_v6  ;;  %v5131_v9 = vadd.f32 %v1510_v5, %v1332_v54  ;;  %v1691_v19 = vmul.f32 %v5032_v16, %v1651_v12 }
 0x24f   :  { %v5135_v45 = vmul.f32 %v5068_v63, %v1652_v60  ;;  %v2496_v43 = vadd.f32 -7.9365076e-05, %v2456_v7  ;;  %v2377_v33 = vmul.f32 -1.0020844e-08, %v5124_v46  ;;  %v1653_v11 = vsub.f32 2.0, %v1613_v53 }
 0x250   :  { %v2655_v20 = vadd.f32 -0.06666667, %v2615_v14  ;;  %v2138_v36 = vmul.f32 2.0, %v2098_v26  ;;  %v1859_v32 = vfloor.f32 %v1819_v52  ;;  %v5141_v37 = vmul.f32 %v4884_v57, %v5131_v9 }
 0x251   :  { %v2536_v35 = vmul.f32 %v2496_v43, %v5103_v34  ;;  %v2417_v41 = vadd.f32 1.1022928e-06, %v2377_v33  ;;  %v1139_v16 = vadd.f32 %v1138_v50, %v887_v2  ;;  %2936 = vrcp.f32 %v5077_v8 }
 0x252   :  { %v2695_v63 = vmul.f32 %v2655_v20, %v5074_v48  ;;  %v1938_v24 = vsub.f32 %v5087_v49, %v1898_v4  ;;  %v2178_v5 = vsub.f32 %v1858_v47, %v2138_v36  ;;  %v1978_v61 = vmul.f32 0.0009676536, %v1858_v47  ;;  %v1339_v12 = vpop.f32.mrf.mxu0 }
 0x253   :  { %v2576_v13 = vadd.f32 0.0033333334, %v2536_v35  ;;  %v2457_v40 = vmul.f32 %v2417_v41, %v5124_v46  ;;  %v2059_v56 = vmul.f32 0.5, %v1859_v32  ;;  %v1899_v42 = vmul.f32 3.140625, %v1859_v32 }
 0x254   :  { %v2735_v15 = vadd.f32 0.4, %v2695_v63  ;;  %v2218_v38 = vmul.f32 2.0, %v2178_v5  ;;  %v1780_v59 = vmul.f32 0.31830987, %v5141_v37  ;;  %v1336_v39 = vadd.f32 %v1335_v10, %v1139_v16  ;;  %v5686_v63 = vld [vmem:[#allocation52_spill] sm:$0xff]  ;;  %v1150_v5 = vpop.f32.mrf.mxu3 }
 0x255   :  { %v2616_v58 = vmul.f32 %v2576_v13, %v5103_v34  ;;  %v2497_v44 = vadd.f32 -7.9365076e-05, %v2457_v40  ;;  %v2099_v48 = vfloor.f32 %v2059_v56  ;;  %v2018_v49 = vsub.f32 %v1938_v24, %v1978_v61 }
 0x256   :  { %v2775_v51 = vmul.f32 %v2735_v15, %v5065_v31  ;;  %v2258_v17 = vsub.f32 1.0, %v2218_v38  ;;  %v1820_v0 = vadd.f32 0.5, %v1780_v59  ;;  %v5151_v47 = vmul.f32 %v5083_v55, %v1653_v11  ;;  %v1518_v55 = vpop.f32.mrf.mxu1  ;;  %v5687_v38 = vld [vmem:[#allocation53_spill] sm:$0xff] }
 0x257   :  { %v2656_v27 = vadd.f32 -0.06666667, %v2616_v58  ;;  %v2537_v54 = vmul.f32 %v2497_v44, %v5124_v46  ;;  %v2139_v50 = vmul.f32 2.0, %v2099_v48  ;;  %v5154_v60 = vpop.eup %2936  ;;  %v1939_v3 = vsub.f32 %v5110_v22, %v1899_v42  ;;  %v896_v22 = vpop.f32.mrf.mxu2 }
 0x258   :  { %v2815_v1 = vmul.f32 %v2775_v51, %v1691_v19  ;;  %v5156_v62 = vmul.f32 %v2258_v17, %v2018_v49  ;;  %v1860_v53 = vfloor.f32 %v1820_v0  ;;  %v5160_v4 = vadd.f32 %v1514_v18, %v1336_v39 }
 0x259   :  { %v2696_v31 = vmul.f32 %v2656_v27, %v5103_v34  ;;  %v2577_v6 = vadd.f32 0.0033333334, %v2537_v54  ;;  %v2179_v7 = vsub.f32 %v1859_v32, %v2139_v50  ;;  %v1979_v2 = vmul.f32 0.0009676536, %v1859_v32 }
 0x25a   :  { %2855 = vst [vmem:[%s5422_s3 + $0xd0] sm:$0xff] %v2815_v1  ;;  %v5167_v21 = vmul.f32 %v5156_v62, %v5156_v62  ;;  %v1900_v10 = vmul.f32 3.140625, %v1860_v53  ;;  %v2060_v14 = vmul.f32 0.5, %v1860_v53  ;;  %2938 = vrcp.f32 %v5099_v30  ;;  %v1343_v58 = vpop.f32.mrf.mxu0 }
 0x25b   :  { %v2736_v26 = vadd.f32 0.4, %v2696_v31  ;;  %v2617_v34 = vmul.f32 %v2577_v6, %v5124_v46  ;;  %v2219_v52 = vmul.f32 2.0, %v2179_v7  ;;  %v1614_v19 = vmul.f32 %v5154_v60, %v5077_v8 }
 0x25c   :  { %v2378_v43 = vmul.f32 -1.0020844e-08, %v5167_v21  ;;  %v2019_v33 = vsub.f32 %v1939_v3, %v1979_v2  ;;  %v2100_v18 = vfloor.f32 %v2060_v14  ;;  %v5177_v32 = vmul.f32 %v4884_v57, %v5160_v4 }
 0x25d   :  { %v2776_v20 = vmul.f32 %v2736_v26, %v5093_v23  ;;  %v2657_v11 = vadd.f32 -0.06666667, %v2617_v34  ;;  %v2259_v36 = vsub.f32 1.0, %v2219_v52  ;;  %v1940_v41 = vsub.f32 %v5141_v37, %v1900_v10 }
 0x25e   :  { %v2418_v35 = vadd.f32 1.1022928e-06, %v2378_v43  ;;  %v2140_v16 = vmul.f32 2.0, %v2100_v18  ;;  %v892_v24 = vadd.f32 %v891_v25, %v5686_v63  ;;  %v1781_v23 = vmul.f32 0.31830987, %v5177_v32  ;;  %v1522_v0 = vpop.f32.mrf.mxu1 }
 0x25f   :  { %v2816_v8 = vmul.f32 %v2776_v20, %v5135_v45  ;;  %v2697_v13 = vmul.f32 %v2657_v11, %v5124_v46  ;;  %v5183_v40 = vmul.f32 %v2259_v36, %v2019_v33  ;;  %v897_v42 = vadd.f32 %v896_v22, %v5687_v38  ;;  %v901_v3 = vpop.f32.mrf.mxu2  ;;  %v5688_v22 = vld [vmem:[#allocation54_spill] sm:$0xff] }
 0x260   :  { %v2458_v61 = vmul.f32 %v2418_v35, %v5167_v21  ;;  %v2180_v56 = vsub.f32 %v1860_v53, %v2140_v16  ;;  %v1145_v15 = vadd.f32 %v1144_v29, %v892_v24  ;;  %v5188_v59 = vpop.eup %2938  ;;  %v1980_v45 = vmul.f32 0.0009676536, %v1860_v53 }
 0x261   :  { %2856 = vst [vmem:[%s5422_s3 + $0xd8] sm:$0xff] %v2816_v8  ;;  %v2737_v25 = vadd.f32 0.4, %v2697_v13  ;;  %v5195_v46 = vmul.f32 %v5183_v40, %v5183_v40  ;;  %v1821_v37 = vadd.f32 0.5, %v1781_v23  ;;  %v1151_v29 = vadd.f32 %v1150_v5, %v897_v42 }
 0x262   :  { %v2498_v44 = vadd.f32 -7.9365076e-05, %v2458_v61  ;;  %v2220_v48 = vmul.f32 2.0, %v2180_v56  ;;  %v1340_v39 = vadd.f32 %v1339_v12, %v1145_v15  ;;  %2940 = vrcp.f32 %v5131_v9  ;;  %v1347_v8 = vpop.f32.mrf.mxu0 }
 0x263   :  { %v2777_v51 = vmul.f32 %v2737_v25, %v5117_v28  ;;  %v2379_v49 = vmul.f32 -1.0020844e-08, %v5195_v46  ;;  %v1861_v17 = vfloor.f32 %v1821_v37  ;;  %v2020_v54 = vsub.f32 %v1940_v41, %v1980_v45 }
 0x264   :  { %v2538_v27 = vmul.f32 %v2498_v44, %v5167_v21  ;;  %v2260_v50 = vsub.f32 1.0, %v2220_v48  ;;  %v5201_v1 = vadd.f32 %v1518_v55, %v1340_v39  ;;  %v1654_v31 = vsub.f32 2.0, %v1614_v19  ;;  %v1156_v19 = vpop.f32.mrf.mxu3 }
 0x265   :  { %v2817_v53 = vmul.f32 %v2777_v51, %v5151_v47  ;;  %v2419_v12 = vadd.f32 1.1022928e-06, %v2379_v49  ;;  %v1344_v6 = vadd.f32 %v1343_v58, %v1151_v29  ;;  %v1901_v2 = vmul.f32 3.140625, %v1861_v17 }
 0x266   :  { %v2578_v7 = vadd.f32 0.0033333334, %v2538_v27  ;;  %v5204_v28 = vmul.f32 %v2260_v50, %v2020_v54  ;;  %v2061_v10 = vmul.f32 0.5, %v1861_v17  ;;  %v902_v55 = vadd.f32 %v901_v3, %v5688_v22  ;;  %v1526_v42 = vpop.f32.mrf.mxu1  ;;  %v5689_v50 = vld [vmem:[#allocation55_spill] sm:$0xff] }
 0x267   :  { %2857 = vst [vmem:[%s5422_s3 + $0xe0] sm:$0xff] %v2817_v53  ;;  %v2459_v14 = vmul.f32 %v2419_v12, %v5195_v46  ;;  %v5218_v52 = vmul.f32 %v4884_v57, %v5201_v1  ;;  %v1694_v33 = vmul.f32 %v5154_v60, %v1654_v31  ;;  %v1615_v18 = vmul.f32 %v5188_v59, %v5099_v30  ;;  %v906_v44 = vpop.f32.mrf.mxu2 }
 0x268   :  { %v2618_v26 = vmul.f32 %v2578_v7, %v5167_v21  ;;  %v5214_v47 = vmul.f32 %v5204_v28, %v5204_v28  ;;  %v2101_v34 = vfloor.f32 %v2061_v10  ;;  %v2941_v43 = vpop.eup %2940  ;;  %v5223_v11 = vadd.f32 %v1522_v0, %v1344_v6 }
 0x269   :  { %v2499_v20 = vadd.f32 -7.9365076e-05, %v2459_v14  ;;  %v1941_v41 = vsub.f32 %v5177_v32, %v1901_v2  ;;  %v1782_v24 = vmul.f32 0.31830987, %v5218_v52  ;;  %v1157_v60 = vadd.f32 %v1156_v19, %v902_v55 }
 0x26a   :  { %v2658_v36 = vadd.f32 -0.06666667, %v2618_v26  ;;  %v2380_v35 = vmul.f32 -1.0020844e-08, %v5214_v47  ;;  %v2141_v16 = vmul.f32 2.0, %v2101_v34  ;;  %v5231_v5 = vmul.f32 %v4884_v57, %v5223_v11 }
 0x26b   :  { %v2539_v63 = vmul.f32 %v2499_v20, %v5195_v46  ;;  %v1981_v23 = vmul.f32 0.0009676536, %v1861_v17  ;;  %v1616_v15 = vmul.f32 %v2941_v43, %v5131_v9  ;;  %v1822_v32 = vadd.f32 0.5, %v1782_v24 }
 0x26c   :  { %v2698_v30 = vmul.f32 %v2658_v36, %v5167_v21  ;;  %v2420_v13 = vadd.f32 1.1022928e-06, %v2380_v35  ;;  %v2181_v61 = vsub.f32 %v1861_v17, %v2141_v16  ;;  %v1783_v38 = vmul.f32 0.31830987, %v5231_v5  ;;  %v1162_v7 = vpop.f32.mrf.mxu3 }
 0x26d   :  { %v2579_v56 = vadd.f32 0.0033333334, %v2539_v63  ;;  %v1655_v45 = vsub.f32 2.0, %v1615_v18  ;;  %v2021_v39 = vsub.f32 %v1941_v41, %v1981_v23  ;;  %v1862_v21 = vfloor.f32 %v1822_v32 }
 0x26e   :  { %v2738_v25 = vadd.f32 0.4, %v2698_v30  ;;  %v2460_v37 = vmul.f32 %v2420_v13, %v5214_v47  ;;  %v2221_v58 = vmul.f32 2.0, %v2181_v61  ;;  %v1348_v29 = vadd.f32 %v1347_v8, %v1157_v60  ;;  %v1530_v24 = vpop.f32.mrf.mxu1 }
 0x26f   :  { %v2619_v48 = vmul.f32 %v2579_v56, %v5195_v46  ;;  %v1823_v9 = vadd.f32 0.5, %v1783_v38  ;;  %v1656_v27 = vsub.f32 2.0, %v1616_v15  ;;  %v2062_v54 = vmul.f32 0.5, %v1862_v21  ;;  %v911_v32 = vpop.f32.mrf.mxu2 }
 0x270   :  { %v2778_v51 = vmul.f32 %v2738_v25, %v5156_v62  ;;  %v2500_v49 = vadd.f32 -7.9365076e-05, %v2460_v37  ;;  %v2261_v17 = vsub.f32 1.0, %v2221_v58  ;;  %v907_v3 = vadd.f32 %v906_v44, %v5689_v50 }
 0x271   :  { %v2659_v0 = vadd.f32 -0.06666667, %v2619_v48  ;;  %v1902_v6 = vmul.f32 3.140625, %v1862_v21  ;;  %v1695_v2 = vmul.f32 %v5188_v59, %v1655_v45  ;;  %2942 = vrcp.f32 %v5160_v4 }
 0x272   :  { %v2818_v53 = vmul.f32 %v2778_v51, %v1694_v33  ;;  %v2540_v31 = vmul.f32 %v2500_v49, %v5214_v47  ;;  %v5241_v12 = vmul.f32 %v2261_v17, %v2021_v39  ;;  %v2102_v62 = vfloor.f32 %v2062_v54 }
 0x273   :  { %v2699_v10 = vmul.f32 %v2659_v0, %v5195_v46  ;;  %v1863_v55 = vfloor.f32 %v1823_v9  ;;  %v5253_v26 = vadd.f32 %v1526_v42, %v1348_v29  ;;  %v1696_v19 = vmul.f32 %v2941_v43, %v1656_v27  ;;  %v1351_v46 = vpop.f32.mrf.mxu0 }
 0x274   :  { %2858 = vst [vmem:[%s5422_s3 + $0xe8] sm:$0xff] %v2818_v53  ;;  %v2580_v14 = vadd.f32 0.0033333334, %v2540_v31  ;;  %v5251_v22 = vmul.f32 %v5241_v12, %v5241_v12  ;;  %v2142_v59 = vmul.f32 2.0, %v2102_v62  ;;  %v1163_v33 = vadd.f32 %v1162_v7, %v907_v3  ;;  %v1168_v51 = vpop.f32.mrf.mxu3 }
 0x275   :  { %v2739_v34 = vadd.f32 0.4, %v2699_v10  ;;  %2944 = vrcp.f32 %v5201_v1  ;;  %v1942_v36 = vsub.f32 %v5218_v52, %v1902_v6  ;;  %v1903_v16 = vmul.f32 3.140625, %v1863_v55 }
 0x276   :  { %v2620_v18 = vmul.f32 %v2580_v14, %v5214_v47  ;;  %v2381_v20 = vmul.f32 -1.0020844e-08, %v5251_v22  ;;  %v2182_v41 = vsub.f32 %v1862_v21, %v2142_v59  ;;  %v2063_v63 = vmul.f32 0.5, %v1863_v55 }
 0x277   :  { %v2779_v35 = vmul.f32 %v2739_v34, %v5183_v40  ;;  %v1982_v43 = vmul.f32 0.0009676536, %v1862_v21  ;;  %v5262_v30 = vmul.f32 %v4884_v57, %v5253_v26  ;;  %v2943_v13 = vpop.eup %2942  ;;  %v1352_v15 = vadd.f32 %v1351_v46, %v1163_v33  ;;  %v5690_v21 = vld [vmem:[#allocation56_spill] sm:$0xff] }
 0x278   :  { %v2660_v60 = vadd.f32 -0.06666667, %v2620_v18  ;;  %v2421_v8 = vadd.f32 1.1022928e-06, %v2381_v20  ;;  %v2222_v61 = vmul.f32 2.0, %v2182_v41  ;;  %v2103_v56 = vfloor.f32 %v2063_v63 }
 0x279   :  { %v2819_v23 = vmul.f32 %v2779_v35, %v1695_v2  ;;  %v2022_v38 = vsub.f32 %v1942_v36, %v1982_v43  ;;  %v1784_v42 = vmul.f32 0.31830987, %v5262_v30  ;;  %v1943_v45 = vsub.f32 %v5231_v5, %v1903_v16  ;;  %v916_v36 = vpop.f32.mrf.mxu2 }
 0x27a   :  { %v2700_v52 = vmul.f32 %v2660_v60, %v5214_v47  ;;  %v2461_v40 = vmul.f32 %v2421_v8, %v5251_v22  ;;  %v2262_v25 = vsub.f32 1.0, %v2222_v61  ;;  %v2143_v37 = vmul.f32 2.0, %v2103_v56  ;;  %v5311_v61 = vld [vmem:[%s5421_s0] ss:$0 sm:$0xff]  ;;  %v5691_v56 = vld [vmem:[#allocation57_spill] sm:$0xff] }
 0x27b   :  { %2859 = vst [vmem:[%s5422_s3 + $0xf0] sm:$0xff] %v2819_v23  ;;  %v5271_v58 = vadd.f32 %v1530_v24, %v1352_v15  ;;  %v5273_v44 = vpop.eup %2944  ;;  %v1824_v47 = vadd.f32 0.5, %v1784_v42  ;;  %v912_v29 = vadd.f32 %v911_v32, %v5690_v21  ;;  %v1617_v49 = vmul.f32 %v2943_v13, %v5160_v4  ;;  %v1355_v4 = vpop.f32.mrf.mxu0 }
 0x27c   :  { %v2740_v48 = vadd.f32 0.4, %v2700_v52  ;;  %v2501_v39 = vadd.f32 -7.9365076e-05, %v2461_v40  ;;  %v5277_v17 = vmul.f32 %v2262_v25, %v2022_v38  ;;  %v1983_v9 = vmul.f32 0.0009676536, %v1863_v55 }
 0x27d   :  { %v2183_v0 = vsub.f32 %v1863_v55, %v2143_v37  ;;  %v1864_v54 = vfloor.f32 %v1824_v47  ;;  %v5283_v50 = vmul.f32 %v4884_v57, %v5271_v58  ;;  %v1169_v31 = vadd.f32 %v1168_v51, %v912_v29  ;;  %v1534_v55 = vpop.f32.mrf.mxu1 }
 0x27e   :  { %v2780_v27 = vmul.f32 %v2740_v48, %v5204_v28  ;;  %v2541_v5 = vmul.f32 %v2501_v39, %v5251_v22  ;;  %v5287_v3 = vmul.f32 %v5277_v17, %v5277_v17  ;;  %v2023_v2 = vsub.f32 %v1943_v45, %v1983_v9 }
 0x27f   :  { %v2223_v53 = vmul.f32 2.0, %v2183_v0  ;;  %v2064_v62 = vmul.f32 0.5, %v1864_v54  ;;  %v1785_v14 = vmul.f32 0.31830987, %v5283_v50  ;;  %v1657_v57 = vsub.f32 2.0, %v1617_v49 }
 0x280   :  { %v2820_v6 = vmul.f32 %v2780_v27, %v1696_v19  ;;  %v2581_v7 = vadd.f32 0.0033333334, %v2541_v5  ;;  %v2382_v10 = vmul.f32 -1.0020844e-08, %v5287_v3  ;;  %v1904_v59 = vmul.f32 3.140625, %v1864_v54 }
 0x281   :  { %v2263_v28 = vsub.f32 1.0, %v2223_v53  ;;  %v1356_v33 = vadd.f32 %v1355_v4, %v1169_v31  ;;  %v2104_v18 = vfloor.f32 %v2064_v62  ;;  %v1825_v20 = vadd.f32 0.5, %v1785_v14  ;;  %v921_v62 = vpop.f32.mrf.mxu2 }
 0x282   :  { %2860 = vst [vmem:[%s5422_s3 + $0xf8] sm:$0xff] %v2820_v6  ;;  %v2621_v34 = vmul.f32 %v2581_v7, %v5251_v22  ;;  %v2422_v46 = vadd.f32 1.1022928e-06, %v2382_v10  ;;  %v1618_v41 = vmul.f32 %v5273_v44, %v5201_v1  ;;  %2946 = vrcp.f32 %v5223_v11 }
 0x283   :  { %v5295_v19 = vmul.f32 %v2263_v28, %v2023_v2  ;;  %v5300_v16 = vadd.f32 %v1534_v55, %v1356_v33  ;;  %v2144_v60 = vmul.f32 2.0, %v2104_v18  ;;  %v1865_v8 = vfloor.f32 %v1825_v20  ;;  %v1359_v21 = vpop.f32.mrf.mxu0 }
 0x284   :  { %v2661_v35 = vadd.f32 -0.06666667, %v2621_v34  ;;  %v2462_v63 = vmul.f32 %v2422_v46, %v5287_v3  ;;  %v1697_v43 = vmul.f32 %v2943_v13, %v1657_v57  ;;  %v917_v15 = vadd.f32 %v916_v36, %v5691_v56  ;;  %v1174_v13 = vpop.f32.mrf.mxu3 }
 0x285   :  { %v5305_v24 = vmul.f32 %v5295_v19, %v5295_v19  ;;  %v5315_v1 = vmul.f32 %v5311_v61, %v5300_v16  ;;  %v1944_v40 = vsub.f32 %v5262_v30, %v1904_v59  ;;  %v2184_v38 = vsub.f32 %v1864_v54, %v2144_v60  ;;  %v1538_v53 = vpop.f32.mrf.mxu1 }
 0x286   :  { %v2701_v23 = vmul.f32 %v2661_v35, %v5251_v22  ;;  %v2502_v32 = vadd.f32 -7.9365076e-05, %v2462_v63  ;;  %v1658_v22 = vsub.f32 2.0, %v1618_v41  ;;  %v1984_v25 = vmul.f32 0.0009676536, %v1864_v54  ;;  %v5692_v35 = vld [vmem:[#allocation59_spill] sm:$0xff] }
 0x287   :  { %v2383_v52 = vmul.f32 -1.0020844e-08, %v5305_v24  ;;  %v2065_v45 = vmul.f32 0.5, %v1865_v8  ;;  %v2224_v39 = vmul.f32 2.0, %v2184_v38  ;;  %v1905_v47 = vmul.f32 3.140625, %v1865_v8 }
 0x288   :  { %v2741_v42 = vadd.f32 0.4, %v2701_v23  ;;  %v2542_v37 = vmul.f32 %v2502_v32, %v5287_v3  ;;  %v5321_v29 = vpop.eup %2946  ;;  %v1786_v9 = vmul.f32 0.31830987, %v5315_v1  ;;  %v1175_v30 = vadd.f32 %v1174_v13, %v917_v15 }
 0x289   :  { %v2423_v48 = vadd.f32 1.1022928e-06, %v2383_v52  ;;  %v2105_v49 = vfloor.f32 %v2065_v45  ;;  %v2024_v5 = vsub.f32 %v1944_v40, %v1984_v25  ;;  %v2264_v54 = vsub.f32 1.0, %v2224_v39 }
 0x28a   :  { %v2781_v51 = vmul.f32 %v2741_v42, %v5241_v12  ;;  %v2582_v0 = vadd.f32 0.0033333334, %v2542_v37  ;;  %v1826_v6 = vadd.f32 0.5, %v1786_v9  ;;  %v1360_v7 = vadd.f32 %v1359_v21, %v1175_v30 }
 0x28b   :  { %v2463_v27 = vmul.f32 %v2423_v48, %v5305_v24  ;;  %v2145_v4 = vmul.f32 2.0, %v2105_v49  ;;  %v1698_v2 = vmul.f32 %v5273_v44, %v1658_v22  ;;  %v5328_v12 = vmul.f32 %v2264_v54, %v2024_v5  ;;  %v1363_v38 = vpop.f32.mrf.mxu0 }
 0x28c   :  { %v2821_v31 = vmul.f32 %v2781_v51, %v1697_v43  ;;  %v2622_v10 = vmul.f32 %v2582_v0, %v5287_v3  ;;  %v1619_v14 = vmul.f32 %v5321_v29, %v5223_v11  ;;  %v1945_v55 = vsub.f32 %v5283_v50, %v1905_v47  ;;  %v1180_v60 = vpop.f32.mrf.mxu3 }
 0x28d   :  { %v2503_v28 = vadd.f32 -7.9365076e-05, %v2463_v27  ;;  %v2185_v57 = vsub.f32 %v1865_v8, %v2145_v4  ;;  %v1866_v34 = vfloor.f32 %v1826_v6  ;;  %v5339_v33 = vmul.f32 %v5328_v12, %v5328_v12  ;;  %v1542_v39 = vpop.f32.mrf.mxu1 }
 0x28e   :  { %2861 = vst [vmem:[%s5422_s3 + $0x100] sm:$0xff] %v2821_v31  ;;  %v2662_v59 = vadd.f32 -0.06666667, %v2622_v10  ;;  %v5341_v46 = vadd.f32 %v1538_v53, %v1360_v7  ;;  %v1985_v18 = vmul.f32 0.0009676536, %v1865_v8  ;;  %v922_v41 = vadd.f32 %v921_v62, %v5692_v35 }
 0x28f   :  { %v2543_v44 = vmul.f32 %v2503_v28, %v5305_v24  ;;  %v2225_v20 = vmul.f32 2.0, %v2185_v57  ;;  %v2066_v36 = vmul.f32 0.5, %v1866_v34  ;;  %2948 = vrcp.f32 %v5253_v26 }
 0x290   :  { %v2702_v11 = vmul.f32 %v2662_v59, %v5287_v3  ;;  %v2384_v50 = vmul.f32 -1.0020844e-08, %v5339_v33  ;;  %v2025_v43 = vsub.f32 %v1945_v55, %v1985_v18  ;;  %v1906_v56 = vmul.f32 3.140625, %v1866_v34 }
 0x291   :  { %v2583_v63 = vadd.f32 0.0033333334, %v2543_v44  ;;  %v2265_v23 = vsub.f32 1.0, %v2225_v20  ;;  %v2106_v15 = vfloor.f32 %v2066_v36  ;;  %v5350_v40 = vmul.f32 %v5311_v61, %v5341_v46 }
 0x292   :  { %v2742_v32 = vadd.f32 0.4, %v2702_v11  ;;  %v2424_v8 = vadd.f32 1.1022928e-06, %v2384_v50  ;;  %v1659_v3 = vsub.f32 2.0, %v1619_v14  ;;  %v1181_v22 = vadd.f32 %v1180_v60, %v922_v41 }
 0x293   :  { %v2623_v52 = vmul.f32 %v2583_v63, %v5305_v24  ;;  %v5352_v13 = vmul.f32 %v2265_v23, %v2025_v43  ;;  %v2146_v42 = vmul.f32 2.0, %v2106_v15  ;;  %v1787_v48 = vmul.f32 0.31830987, %v5350_v40 }
 0x294   :  { %v2782_v25 = vmul.f32 %v2742_v32, %v5277_v17  ;;  %v2464_v37 = vmul.f32 %v2424_v8, %v5339_v33  ;;  %v1946_v21 = vsub.f32 %v5315_v1, %v1906_v56  ;;  %v1364_v49 = vadd.f32 %v1363_v38, %v1181_v22 }
 0x295   :  { %v2663_v45 = vadd.f32 -0.06666667, %v2623_v52  ;;  %v5359_v47 = vmul.f32 %v5352_v13, %v5352_v13  ;;  %v2186_v51 = vsub.f32 %v1866_v34, %v2146_v42  ;;  %v2949_v9 = vpop.eup %2948  ;;  %v1827_v17 = vadd.f32 0.5, %v1787_v48 }
 0x296   :  { %v2822_v30 = vmul.f32 %v2782_v25, %v1698_v2  ;;  %v2504_v27 = vadd.f32 -7.9365076e-05, %v2464_v37  ;;  %v1986_v54 = vmul.f32 0.0009676536, %v1866_v34  ;;  %v5364_v31 = vadd.f32 %v1542_v39, %v1364_v49 }
 0x297   :  { %v2703_v0 = vmul.f32 %v2663_v45, %v5305_v24  ;;  %v2385_v5 = vmul.f32 -1.0020844e-08, %v5359_v47  ;;  %v2226_v53 = vmul.f32 2.0, %v2186_v51  ;;  %2950 = vrcp.f32 %v5271_v58 }
 0x298   :  { %2862 = vst [vmem:[%s5422_s3 + $0x108] sm:$0xff] %v2822_v30  ;;  %v2544_v1 = vmul.f32 %v2504_v27, %v5339_v33  ;;  %v1867_v6 = vfloor.f32 %v1827_v17  ;;  %v2026_v24 = vsub.f32 %v1946_v21, %v1986_v54  ;;  %v5373_v10 = vmul.f32 %v5311_v61, %v5364_v31 }
 0x299   :  { %v2743_v4 = vadd.f32 0.4, %v2703_v0  ;;  %v2425_v7 = vadd.f32 1.1022928e-06, %v2385_v5  ;;  %v2266_v2 = vsub.f32 1.0, %v2226_v53  ;;  %v1699_v28 = vmul.f32 %v5321_v29, %v1659_v3 }
 0x29a   :  { %v2584_v14 = vadd.f32 0.0033333334, %v2544_v1  ;;  %v2067_v34 = vmul.f32 0.5, %v1867_v6  ;;  %v1620_v44 = vmul.f32 %v2949_v9, %v5253_v26  ;;  %v1907_v20 = vmul.f32 3.140625, %v1867_v6 }
 0x29b   :  { %v2783_v62 = vmul.f32 %v2743_v4, %v5295_v19  ;;  %v2465_v55 = vmul.f32 %v2425_v7, %v5359_v47  ;;  %v5378_v57 = vmul.f32 %v2266_v2, %v2026_v24  ;;  %v1788_v29 = vmul.f32 0.31830987, %v5373_v10 }
 0x29c   :  { %v2624_v18 = vmul.f32 %v2584_v14, %v5339_v33  ;;  %v2107_v35 = vfloor.f32 %v2067_v34  ;;  %v1660_v60 = vsub.f32 2.0, %v1620_v44  ;;  %v1947_v23 = vsub.f32 %v5350_v40, %v1907_v20 }
 0x29d   :  { %v2823_v59 = vmul.f32 %v2783_v62, %v1699_v28  ;;  %v2505_v36 = vadd.f32 -7.9365076e-05, %v2465_v55  ;;  %v2346_v61 = vmul.f32 %v5378_v57, %v5378_v57  ;;  %v2951_v19 = vpop.eup %2950  ;;  %v1828_v50 = vadd.f32 0.5, %v1788_v29 }
 0x29e   :  { %v2664_v41 = vadd.f32 -0.06666667, %v2624_v18  ;;  %v2147_v26 = vmul.f32 2.0, %v2107_v35  ;;  %v1621_v38 = vmul.f32 %v2951_v19, %v5271_v58  ;;  %2952 = vrcp.f32 %v5300_v16 }
 0x29f   :  { %2863 = vst [vmem:[%s5422_s3 + $0x110] sm:$0xff] %v2823_v59  ;;  %v2545_v11 = vmul.f32 %v2505_v36, %v5359_v47  ;;  %v2386_v63 = vmul.f32 -1.0020844e-08, %v2346_v61  ;;  %v1868_v52 = vfloor.f32 %v1828_v50  ;;  %v1987_v22 = vmul.f32 0.0009676536, %v1867_v6 }
 0x2a0   :  { %v2704_v43 = vmul.f32 %v2664_v41, %v5339_v33  ;;  %v2187_v32 = vsub.f32 %v1867_v6, %v2147_v26  ;;  %v1700_v45 = vmul.f32 %v2949_v9, %v1660_v60  ;;  %v1661_v49 = vsub.f32 2.0, %v1621_v38 }
 0x2a1   :  { %v2585_v56 = vadd.f32 0.0033333334, %v2545_v11  ;;  %v2426_v15 = vadd.f32 1.1022928e-06, %v2386_v63  ;;  %v2068_v33 = vmul.f32 0.5, %v1868_v52  ;;  %v2027_v39 = vsub.f32 %v1947_v23, %v1987_v22 }
 0x2a2   :  { %v2744_v8 = vadd.f32 0.4, %v2704_v43  ;;  %v2227_v25 = vmul.f32 2.0, %v2187_v32  ;;  %v1908_v30 = vmul.f32 3.140625, %v1868_v52  ;;  %v1701_v4 = vmul.f32 %v2951_v19, %v1661_v49 }
 0x2a3   :  { %v2625_v3 = vmul.f32 %v2585_v56, %v5359_v47  ;;  %v2466_v42 = vmul.f32 %v2426_v15, %v2346_v61  ;;  %v2108_v0 = vfloor.f32 %v2068_v33  ;;  %v1988_v28 = vmul.f32 0.0009676536, %v1868_v52 }
 0x2a4   :  { %v2784_v37 = vmul.f32 %v2744_v8, %v5328_v12  ;;  %v2267_v21 = vsub.f32 1.0, %v2227_v25  ;;  %v2953_v5 = vpop.eup %2952  ;;  %v1948_v1 = vsub.f32 %v5373_v10, %v1908_v30  ;;  %2954 = vrcp.f32 %v5341_v46 }
 0x2a5   :  { %v2665_v48 = vadd.f32 -0.06666667, %v2625_v3  ;;  %v2506_v40 = vadd.f32 -7.9365076e-05, %v2466_v42  ;;  %v2148_v9 = vmul.f32 2.0, %v2108_v0  ;;  %v1622_v24 = vmul.f32 %v2953_v5, %v5300_v16 }
 0x2a6   :  { %v2824_v51 = vmul.f32 %v2784_v37, %v1700_v45  ;;  %v2307_v17 = vmul.f32 %v2267_v21, %v2027_v39  ;;  %v2028_v59 = vsub.f32 %v1948_v1, %v1988_v28  ;;  %2956 = vrcp.f32 %v5364_v31 }
 0x2a7   :  { %v2705_v58 = vmul.f32 %v2665_v48, %v5359_v47  ;;  %v2546_v27 = vmul.f32 %v2506_v40, %v2346_v61  ;;  %v2188_v6 = vsub.f32 %v1868_v52, %v2148_v9  ;;  %v1662_v10 = vsub.f32 2.0, %v1622_v24 }
 0x2a8   :  { %2864 = vst [vmem:[%s5422_s3 + $0x118] sm:$0xff] %v2824_v51  ;;  %v2347_v53 = vmul.f32 %v2307_v17, %v2307_v17 }
 0x2a9   :  { %v2745_v12 = vadd.f32 0.4, %v2705_v58  ;;  %v2586_v54 = vadd.f32 0.0033333334, %v2546_v27  ;;  %v2228_v62 = vmul.f32 2.0, %v2188_v6  ;;  %v1702_v29 = vmul.f32 %v2953_v5, %v1662_v10 }
 0x2aa   :  { %v2387_v2 = vmul.f32 -1.0020844e-08, %v2347_v53  ;;  %v2955_v11 = vpop.eup %2954 }
 0x2ab   :  { %v2785_v7 = vmul.f32 %v2745_v12, %v5352_v13  ;;  %v2626_v47 = vmul.f32 %v2586_v54, %v2346_v61  ;;  %v2268_v44 = vsub.f32 1.0, %v2228_v62 }
 0x2ac   :  { %v2427_v34 = vadd.f32 1.1022928e-06, %v2387_v2  ;;  %v2957_v8 = vpop.eup %2956 }
 0x2ad   :  { %v2825_v14 = vmul.f32 %v2785_v7, %v1701_v4  ;;  %v2666_v55 = vadd.f32 -0.06666667, %v2626_v47  ;;  %v2308_v20 = vmul.f32 %v2268_v44, %v2028_v59  ;;  %v1624_v25 = vmul.f32 %v2957_v8, %v5364_v31 }
 0x2ae   :  { %v2467_v13 = vmul.f32 %v2427_v34, %v2347_v53 }
 0x2af   :  { %2865 = vst [vmem:[%s5422_s3 + $0x120] sm:$0xff] %v2825_v14  ;;  %v2706_v18 = vmul.f32 %v2666_v55, %v2346_v61  ;;  %v2348_v35 = vmul.f32 %v2308_v20, %v2308_v20  ;;  %v1623_v61 = vmul.f32 %v2955_v11, %v5341_v46  ;;  %v1664_v46 = vsub.f32 2.0, %v1624_v25 }
 0x2b0   :  { %v2507_v36 = vadd.f32 -7.9365076e-05, %v2467_v13 }
 0x2b1   :  { %v2746_v16 = vadd.f32 0.4, %v2706_v18  ;;  %v2388_v63 = vmul.f32 -1.0020844e-08, %v2348_v35  ;;  %v1663_v32 = vsub.f32 2.0, %v1623_v61  ;;  %v1704_v39 = vmul.f32 %v2957_v8, %v1664_v46 }
 0x2b2   :  { %v2547_v41 = vmul.f32 %v2507_v36, %v2347_v53 }
 0x2b3   :  { %v2786_v19 = vmul.f32 %v2746_v16, %v5378_v57  ;;  %v2428_v60 = vadd.f32 1.1022928e-06, %v2388_v63  ;;  %v1703_v42 = vmul.f32 %v2955_v11, %v1663_v32 }
 0x2b4   :  { %v2587_v50 = vadd.f32 0.0033333334, %v2547_v41 }
 0x2b5   :  { %v2826_v26 = vmul.f32 %v2786_v19, %v1702_v29  ;;  %v2468_v23 = vmul.f32 %v2428_v60, %v2348_v35 }
 0x2b6   :  { %v2627_v43 = vmul.f32 %v2587_v50, %v2347_v53 }
 0x2b7   :  { %2866 = vst [vmem:[%s5422_s3 + $0x128] sm:$0xff] %v2826_v26  ;;  %v2508_v15 = vadd.f32 -7.9365076e-05, %v2468_v23 }
 0x2b8   :  { %v2667_v56 = vadd.f32 -0.06666667, %v2627_v43 }
 0x2b9   :  { %v2548_v52 = vmul.f32 %v2508_v15, %v2348_v35 }
 0x2ba   :  { %v2707_v57 = vmul.f32 %v2667_v56, %v2347_v53 }
 0x2bb   :  { %v2588_v3 = vadd.f32 0.0033333334, %v2548_v52 }
 0x2bc   :  { %v2747_v38 = vadd.f32 0.4, %v2707_v57 }
 0x2bd   :  { %v2628_v45 = vmul.f32 %v2588_v3, %v2348_v35 }
 0x2be   :  { %v2787_v22 = vmul.f32 %v2747_v38, %v2307_v17 }
 0x2bf   :  { %v2668_v33 = vadd.f32 -0.06666667, %v2628_v45 }
 0x2c0   :  { %v2827_v37 = vmul.f32 %v2787_v22, %v1703_v42 }
 0x2c1   :  { %v2708_v48 = vmul.f32 %v2668_v33, %v2348_v35 }
 0x2c2   :  { %2867 = vst [vmem:[%s5422_s3 + $0x130] sm:$0xff] %v2827_v37 }
 0x2c3   :  { %v2748_v40 = vadd.f32 0.4, %v2708_v48 }
 0x2c5   :  { %v2788_v21 = vmul.f32 %v2748_v40, %v2308_v20 }
 0x2c7   :  { %v2828_v51 = vmul.f32 %v2788_v21, %v1704_v39 }
 0x2c9   :  { %2868 = vst [vmem:[%s5422_s3 + $0x138] sm:$0xff] %v2828_v51 }

</bundles_post_ra>
